<compile_context>
chip_gen: v7x
topology: tpu7x:2x2x1
jax: 0.10.0
libtpu: 0.0.40
codegen_flags: <defaults>
</compile_context>

<pallas_src>
import functools

import jax
import jax.numpy as jnp
from jax.experimental import pallas as pl
from jax.experimental.pallas import tpu as pltpu


# ----------------------------------------------------------------------------
# In-kernel exact-ish erf / GELU.
# lax.erf has no guaranteed Mosaic lowering, so use the Abramowitz & Stegun
# 7.1.26 polynomial (max abs error ~1.5e-7) built from exp + VPU ops only.
# ----------------------------------------------------------------------------
def _erf(v):
    a1, a2, a3, a4, a5 = (0.254829592, -0.284496736, 1.421413741,
                          -1.453152027, 1.061405429)
    p = 0.3275911
    z = jnp.abs(v)
    t = 1.0 / (1.0 + p * z)
    poly = ((((a5 * t + a4) * t + a3) * t + a2) * t + a1) * t
    e = 1.0 - poly * jnp.exp(-z * z)
    return jnp.where(v >= 0, e, -e)


def _gelu_exact(v):
    return 0.5 * v * (1.0 + _erf(v * 0.7071067811865476))


# ----------------------------------------------------------------------------
# Kernel body.
# ----------------------------------------------------------------------------
def _sca_kernel(x_ref, q_ref, g_ref, b_ref, w1_ref, b1_ref, w2_ref, b2_ref,
                out_ref, attn_ref, *, scale, eps):
    x = x_ref[...]                                        # (TB, N, D) f32
    TB, N, D = x.shape
    qb = jnp.broadcast_to(q_ref[...], (TB, 1, D))         # (TB, 1, D)

    # --- attention logits on the MXU (q @ x^T per batch row) ------------------
    s = jnp.einsum("bqd,bkd->bqk", qb, x,
                   preferred_element_type=jnp.float32)    # (TB, 1, N), pre-scale
    attn_ref[...] = s.astype(attn_ref.dtype)

    # --- softmax over N (f32, max-stabilized, exact division) -----------------
    z = s * scale
    z = z - jnp.max(z, axis=-1, keepdims=True)
    e = jnp.exp(z)
    a = e / jnp.sum(e, axis=-1, keepdims=True)            # (TB, 1, N)

    # --- context on the MXU (a @ x per batch row); no (TB,N,D) temporaries ----
    ctx3 = jnp.einsum("bqk,bkd->bqd", a, x,
                      preferred_element_type=jnp.float32)  # (TB, 1, D)
    ctx = ctx3.reshape(TB, D)                              # (TB, D)

    # --- LayerNorm(ctx) over D (biased variance, eps=1e-6) --------------------
    mu = jnp.mean(ctx, axis=-1, keepdims=True)
    xc = ctx - mu
    var = jnp.mean(xc * xc, axis=-1, keepdims=True)
    ln = xc * jax.lax.rsqrt(var + eps) * g_ref[...] + b_ref[...]

    # --- MLP: (TB,D)@(D,H) -> GELU(erf) -> (TB,H)@(H,D), f32 accumulation -----
    h = jnp.dot(ln, w1_ref[...], preferred_element_type=jnp.float32) + b1_ref[...]
    h = _gelu_exact(h)
    mlp = jnp.dot(h, w2_ref[...], preferred_element_type=jnp.float32) + b2_ref[...]

    out_ref[...] = (ctx + mlp).astype(out_ref.dtype)


# ----------------------------------------------------------------------------
# Generation-aware tiling / VMEM budgeting.
# ----------------------------------------------------------------------------
def _tpu_vmem_capacity_bytes():
    try:
        cap = getattr(pltpu.get_tpu_info(), "vmem_capacity_bytes", None)
        if cap:
            return int(cap)
    except Exception:
        pass
    return 64 << 20   # conservative default (v7x-sized)


def _round_up(v, m):
    return -(-v // m) * m


def _vmem_bytes(tb, N, D, H):
    """Accurate working-set estimate (no tile-sized temporaries: both attention
    contractions run on the MXU, and the whole estimate is not doubled)."""
    x_tile = tb * N * D * 4                        # streamed x block
    outs = (tb * D + tb * N) * 4                   # out + attn blocks
    params = (4 * D + H + 2 * D * H) * 4           # q, gamma, beta, b1, b2, w1, w2
    inter = (2 * tb * H + 6 * tb * D + 4 * tb * N) * 4   # MLP/LN/softmax temporaries
    # x and outputs double-buffered; params at most double-buffered (single when
    # pl.Buffered(1) is accepted) -- stay conservative here.
    return 2 * x_tile + 2 * outs + 2 * params + inter + (4 << 20)


def _pick_batch_tile(B, N, D, H, vmem_cap):
    row_bytes = N * D * 4
    # x tile target ~= vmem/8: ~16 MiB on 128 MiB v5e/v6e, ~8 MiB on 64 MiB v7x.
    x_tile_target = min(16 << 20, max(4 << 20, vmem_cap // 8))
    tb = max(1, min(B, x_tile_target // row_bytes))
    # Keep >= 2 grid steps when B allows, so the "parallel" axis can be sharded
    # across both v7x TensorCores (harmless ~0.35us extra step on v5e/v6e).
    if B >= 16:
        tb = min(tb, _round_up(-(-B // 2), 8))
    if tb >= 8:
        tb = (tb // 8) * 8                          # sublane-dense output blocks
    tb = max(1, min(tb, B))
    # Balance the tiles so the last grid step is not mostly padding.
    steps = -(-B // tb)
    even = -(-B // steps)
    tb = min(B, _round_up(even, 8)) if B >= 8 else min(B, even)
    # Shrink if the working set does not fit the per-generation VMEM budget.
    budget = int(vmem_cap * 0.78)
    while tb > 1 and _vmem_bytes(tb, N, D, H) > budget:
        tb = (tb - 8) if tb > 8 else max(1, tb // 2)
    if _vmem_bytes(tb, N, D, H) > budget:
        # TODO(synk): add an N-chunk grid axis with an online softmax for very
        #             large N*D instead of failing.
        raise ValueError("Simple_Cross_Attention: a single batch row does not fit "
                         "VMEM; an N-chunked online-softmax variant is required.")
    return tb


def _vmem_limit_bytes(tb, N, D, H, vmem_cap):
    est = _vmem_bytes(tb, N, D, H)
    return int(min(max(est, 32 << 20), int(vmem_cap * 0.78)))


# ----------------------------------------------------------------------------
# pallas_call wrapper.
# ----------------------------------------------------------------------------
def _build_call(B, N, D, H, TB, scale, eps, vmem_limit, single_buffer_params):
    kernel = functools.partial(_sca_kernel, scale=scale, eps=eps)

    def const_spec(shape):
        kwargs = {}
        if single_buffer_params:
            # Constant index map -> no re-fetch across steps; single buffer halves
            # the resident parameter footprint (matters for large D*H weights).
            kwargs["pipeline_mode"] = pl.Buffered(1)
        return pl.BlockSpec(shape, lambda b: (0,) * len(shape), **kwargs)

    return pl.pallas_call(
        kernel,
        out_shape=(
            jax.ShapeDtypeStruct((B, D), jnp.float32),      # out
            jax.ShapeDtypeStruct((B, 1, N), jnp.float32),    # attn (squeezed outside)
        ),
        grid_spec=pltpu.PrefetchScalarGridSpec(
            num_scalar_prefetch=0,
            grid=(pl.cdiv(B, TB),),
            in_specs=[
                pl.BlockSpec((TB, N, D), lambda b: (b, 0, 0)),   # x batch tile
                const_spec((1, 1, D)),    # learnable_query
                const_spec((1, D)),       # ln gamma
                const_spec((1, D)),       # ln beta
                const_spec((D, H)),       # fc1 weight
                const_spec((1, H)),       # fc1 bias
                const_spec((H, D)),       # fc2 weight
                const_spec((1, D)),       # fc2 bias
            ],
            out_specs=[
                pl.BlockSpec((TB, D), lambda b: (b, 0)),         # out  (lane-dense)
                pl.BlockSpec((TB, 1, N), lambda b: (b, 0, 0)),   # attn
            ],
        ),
        compiler_params=pltpu.CompilerParams(
            dimension_semantics=("parallel",),
            vmem_limit_bytes=vmem_limit,
        ),
    )


def simple_cross_attention(x, params):
    """x: (B, N, D). Returns (out (B, D), attn (B, N)); attn = pre-scale q @ x^T."""
    B, N, D = x.shape
    H = params["w1"].shape[1]
    scale = float(D) ** -0.5
    eps = 1e-6

    vmem_cap = _tpu_vmem_capacity_bytes()
    TB = _pick_batch_tile(B, N, D, H, vmem_cap)
    vmem_limit = _vmem_limit_bytes(TB, N, D, H, vmem_cap)

    q3 = params["query"].reshape(1, 1, D)
    args = (x, q3, params["ln_g"], params["ln_b"],
            params["w1"], params["b1"], params["w2"], params["b2"])

    try:
        out, attn3 = _build_call(B, N, D, H, TB, scale, eps, vmem_limit, True)(*args)
        jax.block_until_ready((out, attn3))
    except Exception:
        # pl.Buffered(1) is a pure VMEM saving; fall back to default double
        # buffering if this Pallas version rejects buffer_count=1.
        out, attn3 = _build_call(B, N, D, H, TB, scale, eps, vmem_limit, False)(*args)

    return out, attn3.reshape(B, N)


# ----------------------------------------------------------------------------
# Parameter init (mimics the module's init; init details do not affect forward
# semantics) and a pure-JAX reference for the correctness check.
# ----------------------------------------------------------------------------
def init_params(key, feat_dim, mlp_ratio=4.0):
    H = int(feat_dim * mlp_ratio)
    ks = jax.random.split(key, 6)
    std = feat_dim ** -0.5
    # trunc_normal_tf_ approximated by a scaled normal draw (init detail only).
    query = jax.random.normal(ks[0], (1, feat_dim), jnp.float32) * std
    w1 = jax.random.normal(ks[1], (feat_dim, H), jnp.float32) * (feat_dim ** -0.5)
    w2 = jax.random.normal(ks[2], (H, feat_dim), jnp.float32) * (H ** -0.5)
    return {
        "query": query,
        # slight perturbations so the affine LayerNorm terms are exercised
        "ln_g": 1.0 + 0.05 * jax.random.normal(ks[3], (1, feat_dim), jnp.float32),
        "ln_b": 0.05 * jax.random.normal(ks[4], (1, feat_dim), jnp.float32),
        "w1": w1,
        "b1": 0.05 * jax.random.normal(ks[5], (1, H), jnp.float32),
        "w2": w2,
        "b2": jnp.zeros((1, feat_dim), jnp.float32),
    }


def _reference(x, params):
    D = x.shape[-1]
    scale = float(D) ** -0.5
    hi = jax.lax.Precision.HIGHEST
    q = jnp.broadcast_to(params["query"][None], (x.shape[0], 1, D))
    attn = jnp.einsum("bod,bnd->bon", q, x, precision=hi)            # (B,1,N)
    a = jax.nn.softmax(attn * scale, axis=-1)
    ctx = jnp.einsum("bon,bnd->bod", a, x, precision=hi)[:, 0, :]    # (B,D)
    mu = jnp.mean(ctx, -1, keepdims=True)
    var = jnp.mean((ctx - mu) ** 2, -1, keepdims=True)
    ln = (ctx - mu) / jnp.sqrt(var + 1e-6) * params["ln_g"] + params["ln_b"]
    h = jax.nn.gelu(jnp.dot(ln, params["w1"], precision=hi) + params["b1"],
                    approximate=False)
    out = ctx + jnp.dot(h, params["w2"], precision=hi) + params["b2"]
    return out, attn[:, 0, :]


if __name__ == "__main__":
    # Small shapes consistent with the module: feat_dim=128 (lane-dense),
    # mlp_ratio=4 -> hidden=512, seq=16, batch=8 (one full sublane group).
    B, N, D = 8, 16, 128
    key = jax.random.PRNGKey(0)
    kx, kp = jax.random.split(key)
    x = jax.random.normal(kx, (B, N, D), jnp.float32)
    params = init_params(kp, D, mlp_ratio=4.0)

    out, attn = simple_cross_attention(x, params)
    jax.block_until_ready((out, attn))

    ref_out, ref_attn = _reference(x, params)
    assert out.shape == (B, D) and attn.shape == (B, N)
    assert jnp.allclose(attn, ref_attn, atol=2e-4, rtol=2e-4), (
        float(jnp.max(jnp.abs(attn - ref_attn))))
    assert jnp.allclose(out, ref_out, atol=1e-3, rtol=1e-3), (
        float(jnp.max(jnp.abs(out - ref_out))))
    print("KERNEL_OK")
</pallas_src>

<mosaic_0001>
module attributes {stable_mosaic.version = 11 : i64} {
  func.func @_sca_kernel(%arg0: i32, %arg1: memref<8x16x128xf32, #tpu.memory_space<vmem>>, %arg2: memref<1x1x128xf32, #tpu.memory_space<vmem>>, %arg3: memref<1x128xf32, #tpu.memory_space<vmem>>, %arg4: memref<1x128xf32, #tpu.memory_space<vmem>>, %arg5: memref<128x512xf32, #tpu.memory_space<vmem>>, %arg6: memref<1x512xf32, #tpu.memory_space<vmem>>, %arg7: memref<512x128xf32, #tpu.memory_space<vmem>>, %arg8: memref<1x128xf32, #tpu.memory_space<vmem>>, %arg9: memref<8x128xf32, #tpu.memory_space<vmem>>, %arg10: memref<8x1x16xf32, #tpu.memory_space<vmem>>) attributes {dimension_semantics = [#tpu.dimension_semantics<parallel>], iteration_bounds = array<i64: 1>, scalar_prefetch = 0 : i64, scratch_operands = 0 : i64, tpu.core_type = #tpu.core_type<tc>, window_params = [{transform_indices = @transform_0, window_bounds = array<i64: 8, 16, 128>}, {pipeline_mode = #tpu.pipeline_mode<synchronous>, transform_indices = @transform_1, window_bounds = array<i64: 1, 1, 128>}, {pipeline_mode = #tpu.pipeline_mode<synchronous>, transform_indices = @transform_2, window_bounds = array<i64: 1, 128>}, {pipeline_mode = #tpu.pipeline_mode<synchronous>, transform_indices = @transform_3, window_bounds = array<i64: 1, 128>}, {pipeline_mode = #tpu.pipeline_mode<synchronous>, transform_indices = @transform_4, window_bounds = array<i64: 128, 512>}, {pipeline_mode = #tpu.pipeline_mode<synchronous>, transform_indices = @transform_5, window_bounds = array<i64: 1, 512>}, {pipeline_mode = #tpu.pipeline_mode<synchronous>, transform_indices = @transform_6, window_bounds = array<i64: 512, 128>}, {pipeline_mode = #tpu.pipeline_mode<synchronous>, transform_indices = @transform_7, window_bounds = array<i64: 1, 128>}, {transform_indices = @transform_8, window_bounds = array<i64: 8, 128>}, {transform_indices = @transform_9, window_bounds = array<i64: 8, 1, 16>}]} {
    %c0 = arith.constant 0 : index
    %c0_0 = arith.constant 0 : index
    %c0_1 = arith.constant 0 : index
    %0 = vector.load %arg1[%c0, %c0_0, %c0_1] : memref<8x16x128xf32, #tpu.memory_space<vmem>>, vector<8x16x128xf32>
    %c0_2 = arith.constant 0 : index
    %c0_3 = arith.constant 0 : index
    %c0_4 = arith.constant 0 : index
    %1 = vector.load %arg2[%c0_2, %c0_3, %c0_4] : memref<1x1x128xf32, #tpu.memory_space<vmem>>, vector<1x1x128xf32>
    %2 = vector.shape_cast %1 : vector<1x1x128xf32> to vector<1x1x128xf32>
    %3 = vector.broadcast %2 : vector<1x1x128xf32> to vector<8x1x128xf32>
    "tpu.trace_start"() <{level = 10 : i32, message = "bqd,bkd->bqk"}> : () -> ()
    %cst = arith.constant dense<0.000000e+00> : vector<8x1x16xf32>
    %4 = tpu.matmul %3, %0, %cst {dimension_numbers = #tpu.dot_dimension_numbers<[2], [2], [1], [1], [0, 0, 0, 1, 1, 1], [0], [0]>} : vector<8x1x128xf32>, vector<8x16x128xf32>, vector<8x1x16xf32> -> vector<8x1x16xf32>
    "tpu.trace_stop"() : () -> ()
    %c0_5 = arith.constant 0 : index
    %c0_6 = arith.constant 0 : index
    %c0_7 = arith.constant 0 : index
    %5 = vector.load %arg10[%c0_5, %c0_6, %c0_7] : memref<8x1x16xf32, #tpu.memory_space<vmem>>, vector<8x1x16xf32>
    tpu.vector_store %arg10[%c0_5, %c0_6, %c0_7], %4 {strides = array<i32>} : memref<8x1x16xf32, #tpu.memory_space<vmem>>, vector<8x1x16xf32>,
    %cst_8 = arith.constant 0.0883883461 : f32
    %6 = vector.broadcast %cst_8 : f32 to vector<8x1x16xf32>
    %7 = arith.mulf %4, %6 : vector<8x1x16xf32>
    %cst_9 = arith.constant dense<0xFF800000> : vector<8x1xf32>
    %8 = vector.multi_reduction <maximumf>, %7, %cst_9 [2] : vector<8x1x16xf32> to vector<8x1xf32>
    %9 = vector.shape_cast %8 : vector<8x1xf32> to vector<8x1x1xf32>
    %10 = vector.broadcast %9 : vector<8x1x1xf32> to vector<8x1x16xf32>
    %11 = arith.subf %7, %10 : vector<8x1x16xf32>
    %12 = math.exp %11 : vector<8x1x16xf32>
    %cst_10 = arith.constant dense<0.000000e+00> : vector<8x1xf32>
    %13 = vector.multi_reduction <add>, %12, %cst_10 [2] : vector<8x1x16xf32> to vector<8x1xf32>
    %14 = vector.shape_cast %13 : vector<8x1xf32> to vector<8x1x1xf32>
    %15 = vector.broadcast %14 : vector<8x1x1xf32> to vector<8x1x16xf32>
    %16 = arith.divf %12, %15 : vector<8x1x16xf32>
    "tpu.trace_start"() <{level = 10 : i32, message = "bqk,bkd->bqd"}> : () -> ()
    %cst_11 = arith.constant dense<0.000000e+00> : vector<8x1x128xf32>
    %17 = tpu.matmul %16, %0, %cst_11 {dimension_numbers = #tpu.dot_dimension_numbers<[2], [1], [1], [2], [0, 0, 0, 1, 1, 2], [0], [0]>} : vector<8x1x16xf32>, vector<8x16x128xf32>, vector<8x1x128xf32> -> vector<8x1x128xf32>
    "tpu.trace_stop"() : () -> ()
    %18 = vector.shape_cast %17 : vector<8x1x128xf32> to vector<8x128xf32>
    %cst_12 = arith.constant dense<0.000000e+00> : vector<8xf32>
    %19 = vector.multi_reduction <add>, %18, %cst_12 [1] : vector<8x128xf32> to vector<8xf32>
    %20 = vector.shape_cast %19 : vector<8xf32> to vector<8x1xf32>
    %cst_13 = arith.constant 1.280000e+02 : f32
    %21 = vector.broadcast %cst_13 : f32 to vector<8x1xf32>
    %22 = arith.divf %20, %21 : vector<8x1xf32>
    %23 = vector.broadcast %22 : vector<8x1xf32> to vector<8x128xf32>
    %24 = arith.subf %18, %23 : vector<8x128xf32>
    %25 = arith.mulf %24, %24 : vector<8x128xf32>
    %cst_14 = arith.constant dense<0.000000e+00> : vector<8xf32>
    %26 = vector.multi_reduction <add>, %25, %cst_14 [1] : vector<8x128xf32> to vector<8xf32>
    %27 = vector.shape_cast %26 : vector<8xf32> to vector<8x1xf32>
    %cst_15 = arith.constant 1.280000e+02 : f32
    %28 = vector.broadcast %cst_15 : f32 to vector<8x1xf32>
    %29 = arith.divf %27, %28 : vector<8x1xf32>
    %cst_16 = arith.constant 9.99999997E-7 : f32
    %30 = vector.broadcast %cst_16 : f32 to vector<8x1xf32>
    %31 = arith.addf %29, %30 : vector<8x1xf32>
    %32 = math.rsqrt %31 : vector<8x1xf32>
    %33 = vector.broadcast %32 : vector<8x1xf32> to vector<8x128xf32>
    %34 = arith.mulf %24, %33 : vector<8x128xf32>
    %c0_17 = arith.constant 0 : index
    %c0_18 = arith.constant 0 : index
    %35 = vector.load %arg3[%c0_17, %c0_18] : memref<1x128xf32, #tpu.memory_space<vmem>>, vector<1x128xf32>
    %36 = vector.broadcast %35 : vector<1x128xf32> to vector<8x128xf32>
    %37 = arith.mulf %34, %36 : vector<8x128xf32>
    %c0_19 = arith.constant 0 : index
    %c0_20 = arith.constant 0 : index
    %38 = vector.load %arg4[%c0_19, %c0_20] : memref<1x128xf32, #tpu.memory_space<vmem>>, vector<1x128xf32>
    %39 = vector.broadcast %38 : vector<1x128xf32> to vector<8x128xf32>
    %40 = arith.addf %37, %39 : vector<8x128xf32>
    %c0_21 = arith.constant 0 : index
    %c0_22 = arith.constant 0 : index
    %41 = vector.load %arg5[%c0_21, %c0_22] : memref<128x512xf32, #tpu.memory_space<vmem>>, vector<128x512xf32>
    %cst_23 = arith.constant dense<0.000000e+00> : vector<8x512xf32>
    %42 = tpu.matmul %40, %41, %cst_23 {dimension_numbers = #tpu.dot_dimension_numbers<[1], [0], [0], [1], [0, 0, 1, 1], [], []>} : vector<8x128xf32>, vector<128x512xf32>, vector<8x512xf32> -> vector<8x512xf32>
    %c0_24 = arith.constant 0 : index
    %c0_25 = arith.constant 0 : index
    %43 = vector.load %arg6[%c0_24, %c0_25] : memref<1x512xf32, #tpu.memory_space<vmem>>, vector<1x512xf32>
    %44 = vector.broadcast %43 : vector<1x512xf32> to vector<8x512xf32>
    %45 = arith.addf %42, %44 : vector<8x512xf32>
    %cst_26 = arith.constant 5.000000e-01 : f32
    %46 = vector.broadcast %cst_26 : f32 to vector<8x512xf32>
    %47 = arith.mulf %46, %45 : vector<8x512xf32>
    %cst_27 = arith.constant 0.707106769 : f32
    %48 = vector.broadcast %cst_27 : f32 to vector<8x512xf32>
    %49 = arith.mulf %45, %48 : vector<8x512xf32>
    %50 = math.absf %49 : vector<8x512xf32>
    %cst_28 = arith.constant 0.327591091 : f32
    %51 = vector.broadcast %cst_28 : f32 to vector<8x512xf32>
    %52 = arith.mulf %51, %50 : vector<8x512xf32>
    %cst_29 = arith.constant 1.000000e+00 : f32
    %53 = vector.broadcast %cst_29 : f32 to vector<8x512xf32>
    %54 = arith.addf %53, %52 : vector<8x512xf32>
    %cst_30 = arith.constant 1.000000e+00 : f32
    %55 = vector.broadcast %cst_30 : f32 to vector<8x512xf32>
    %56 = arith.divf %55, %54 : vector<8x512xf32>
    %cst_31 = arith.constant 1.06140542 : f32
    %57 = vector.broadcast %cst_31 : f32 to vector<8x512xf32>
    %58 = arith.mulf %57, %56 : vector<8x512xf32>
    %cst_32 = arith.constant -1.45315206 : f32
    %59 = vector.broadcast %cst_32 : f32 to vector<8x512xf32>
    %60 = arith.addf %58, %59 : vector<8x512xf32>
    %61 = arith.mulf %60, %56 : vector<8x512xf32>
    %cst_33 = arith.constant 1.42141378 : f32
    %62 = vector.broadcast %cst_33 : f32 to vector<8x512xf32>
    %63 = arith.addf %61, %62 : vector<8x512xf32>
    %64 = arith.mulf %63, %56 : vector<8x512xf32>
    %cst_34 = arith.constant -0.284496725 : f32
    %65 = vector.broadcast %cst_34 : f32 to vector<8x512xf32>
    %66 = arith.addf %64, %65 : vector<8x512xf32>
    %67 = arith.mulf %66, %56 : vector<8x512xf32>
    %cst_35 = arith.constant 0.254829586 : f32
    %68 = vector.broadcast %cst_35 : f32 to vector<8x512xf32>
    %69 = arith.addf %67, %68 : vector<8x512xf32>
    %70 = arith.mulf %69, %56 : vector<8x512xf32>
    %cst_36 = arith.constant 0.000000e+00 : f32
    %71 = vector.broadcast %cst_36 : f32 to vector<8x512xf32>
    %72 = arith.subf %71, %50 : vector<8x512xf32>
    %73 = arith.mulf %72, %50 : vector<8x512xf32>
    %74 = math.exp %73 : vector<8x512xf32>
    %75 = arith.mulf %70, %74 : vector<8x512xf32>
    %cst_37 = arith.constant 1.000000e+00 : f32
    %76 = vector.broadcast %cst_37 : f32 to vector<8x512xf32>
    %77 = arith.subf %76, %75 : vector<8x512xf32>
    %cst_38 = arith.constant 0.000000e+00 : f32
    %78 = vector.broadcast %cst_38 : f32 to vector<8x512xf32>
    %79 = arith.cmpf oge, %49, %78 : vector<8x512xf32>
    %cst_39 = arith.constant 0.000000e+00 : f32
    %80 = vector.broadcast %cst_39 : f32 to vector<8x512xf32>
    %81 = arith.subf %80, %77 : vector<8x512xf32>
    %82 = arith.select %79, %77, %81 : vector<8x512xi1>, vector<8x512xf32>
    %cst_40 = arith.constant 1.000000e+00 : f32
    %83 = vector.broadcast %cst_40 : f32 to vector<8x512xf32>
    %84 = arith.addf %83, %82 : vector<8x512xf32>
    %85 = arith.mulf %47, %84 : vector<8x512xf32>
    %c0_41 = arith.constant 0 : index
    %c0_42 = arith.constant 0 : index
    %86 = vector.load %arg7[%c0_41, %c0_42] : memref<512x128xf32, #tpu.memory_space<vmem>>, vector<512x128xf32>
    %cst_43 = arith.constant dense<0.000000e+00> : vector<8x128xf32>
    %87 = tpu.matmul %85, %86, %cst_43 {dimension_numbers = #tpu.dot_dimension_numbers<[1], [0], [0], [1], [0, 0, 1, 1], [], []>} : vector<8x512xf32>, vector<512x128xf32>, vector<8x128xf32> -> vector<8x128xf32>
    %c0_44 = arith.constant 0 : index
    %c0_45 = arith.constant 0 : index
    %88 = vector.load %arg8[%c0_44, %c0_45] : memref<1x128xf32, #tpu.memory_space<vmem>>, vector<1x128xf32>
    %89 = vector.broadcast %88 : vector<1x128xf32> to vector<8x128xf32>
    %90 = arith.addf %87, %89 : vector<8x128xf32>
    %91 = arith.addf %18, %90 : vector<8x128xf32>
    %c0_46 = arith.constant 0 : index
    %c0_47 = arith.constant 0 : index
    %92 = vector.load %arg9[%c0_46, %c0_47] : memref<8x128xf32, #tpu.memory_space<vmem>>, vector<8x128xf32>
    tpu.vector_store %arg9[%c0_46, %c0_47], %91 {strides = array<i32>} : memref<8x128xf32, #tpu.memory_space<vmem>>, vector<8x128xf32>,
    return
  }
  func.func @transform_0(%arg0: i32) -> (i32, i32, i32) {
    %c0_i32 = arith.constant 0 : i32
    %c0_i32_0 = arith.constant 0 : i32
    %c0_i32_1 = arith.constant 0 : i32
    return %arg0, %c0_i32, %c0_i32_0 : i32, i32, i32
  }
  func.func @transform_1(%arg0: i32) -> (i32, i32, i32) {
    %c0_i32 = arith.constant 0 : i32
    %c0_i32_0 = arith.constant 0 : i32
    %c0_i32_1 = arith.constant 0 : i32
    %c0_i32_2 = arith.constant 0 : i32
    return %c0_i32, %c0_i32_0, %c0_i32_1 : i32, i32, i32
  }
  func.func @transform_2(%arg0: i32) -> (i32, i32) {
    %c0_i32 = arith.constant 0 : i32
    %c0_i32_0 = arith.constant 0 : i32
    %c0_i32_1 = arith.constant 0 : i32
    return %c0_i32, %c0_i32_0 : i32, i32
  }
  func.func @transform_3(%arg0: i32) -> (i32, i32) {
    %c0_i32 = arith.constant 0 : i32
    %c0_i32_0 = arith.constant 0 : i32
    %c0_i32_1 = arith.constant 0 : i32
    return %c0_i32, %c0_i32_0 : i32, i32
  }
  func.func @transform_4(%arg0: i32) -> (i32, i32) {
    %c0_i32 = arith.constant 0 : i32
    %c0_i32_0 = arith.constant 0 : i32
    %c0_i32_1 = arith.constant 0 : i32
    return %c0_i32, %c0_i32_0 : i32, i32
  }
  func.func @transform_5(%arg0: i32) -> (i32, i32) {
    %c0_i32 = arith.constant 0 : i32
    %c0_i32_0 = arith.constant 0 : i32
    %c0_i32_1 = arith.constant 0 : i32
    return %c0_i32, %c0_i32_0 : i32, i32
  }
  func.func @transform_6(%arg0: i32) -> (i32, i32) {
    %c0_i32 = arith.constant 0 : i32
    %c0_i32_0 = arith.constant 0 : i32
    %c0_i32_1 = arith.constant 0 : i32
    return %c0_i32, %c0_i32_0 : i32, i32
  }
  func.func @transform_7(%arg0: i32) -> (i32, i32) {
    %c0_i32 = arith.constant 0 : i32
    %c0_i32_0 = arith.constant 0 : i32
    %c0_i32_1 = arith.constant 0 : i32
    return %c0_i32, %c0_i32_0 : i32, i32
  }
  func.func @transform_8(%arg0: i32) -> (i32, i32) {
    %c0_i32 = arith.constant 0 : i32
    %c0_i32_0 = arith.constant 0 : i32
    return %arg0, %c0_i32 : i32, i32
  }
  func.func @transform_9(%arg0: i32) -> (i32, i32, i32) {
    %c0_i32 = arith.constant 0 : i32
    %c0_i32_0 = arith.constant 0 : i32
    %c0_i32_1 = arith.constant 0 : i32
    return %arg0, %c0_i32, %c0_i32_0 : i32, i32, i32
  }
}

module attributes {stable_mosaic.version = 11 : i64} {
  func.func @_sca_kernel(%arg0: i32, %arg1: memref<8x16x128xf32, #tpu.memory_space<vmem>>, %arg2: memref<1x1x128xf32, #tpu.memory_space<vmem>>, %arg3: memref<1x128xf32, #tpu.memory_space<vmem>>, %arg4: memref<1x128xf32, #tpu.memory_space<vmem>>, %arg5: memref<128x512xf32, #tpu.memory_space<vmem>>, %arg6: memref<1x512xf32, #tpu.memory_space<vmem>>, %arg7: memref<512x128xf32, #tpu.memory_space<vmem>>, %arg8: memref<1x128xf32, #tpu.memory_space<vmem>>, %arg9: memref<8x128xf32, #tpu.memory_space<vmem>>, %arg10: memref<8x1x16xf32, #tpu.memory_space<vmem>>) attributes {dimension_semantics = [#tpu.dimension_semantics<parallel>], iteration_bounds = array<i64: 1>, scalar_prefetch = 0 : i64, scratch_operands = 0 : i64, tpu.core_type = #tpu.core_type<tc>, window_params = [{transform_indices = @transform_0, window_bounds = array<i64: 8, 16, 128>}, {pipeline_mode = #tpu.pipeline_mode<synchronous>, transform_indices = @transform_1, window_bounds = array<i64: 1, 1, 128>}, {pipeline_mode = #tpu.pipeline_mode<synchronous>, transform_indices = @transform_2, window_bounds = array<i64: 1, 128>}, {pipeline_mode = #tpu.pipeline_mode<synchronous>, transform_indices = @transform_3, window_bounds = array<i64: 1, 128>}, {pipeline_mode = #tpu.pipeline_mode<synchronous>, transform_indices = @transform_4, window_bounds = array<i64: 128, 512>}, {pipeline_mode = #tpu.pipeline_mode<synchronous>, transform_indices = @transform_5, window_bounds = array<i64: 1, 512>}, {pipeline_mode = #tpu.pipeline_mode<synchronous>, transform_indices = @transform_6, window_bounds = array<i64: 512, 128>}, {pipeline_mode = #tpu.pipeline_mode<synchronous>, transform_indices = @transform_7, window_bounds = array<i64: 1, 128>}, {transform_indices = @transform_8, window_bounds = array<i64: 8, 128>}, {transform_indices = @transform_9, window_bounds = array<i64: 8, 1, 16>}]} {
    %c0 = arith.constant 0 : index
    %c0_0 = arith.constant 0 : index
    %c0_1 = arith.constant 0 : index
    %0 = vector.load %arg1[%c0, %c0_0, %c0_1] : memref<8x16x128xf32, #tpu.memory_space<vmem>>, vector<8x16x128xf32>
    %c0_2 = arith.constant 0 : index
    %c0_3 = arith.constant 0 : index
    %c0_4 = arith.constant 0 : index
    %1 = vector.load %arg2[%c0_2, %c0_3, %c0_4] : memref<1x1x128xf32, #tpu.memory_space<vmem>>, vector<1x1x128xf32>
    %2 = vector.shape_cast %1 : vector<1x1x128xf32> to vector<1x1x128xf32>
    %3 = vector.broadcast %2 : vector<1x1x128xf32> to vector<8x1x128xf32>
    "tpu.trace_start"() <{level = 10 : i32, message = "bqd,bkd->bqk"}> : () -> ()
    %cst = arith.constant dense<0.000000e+00> : vector<8x1x16xf32>
    %4 = tpu.matmul %3, %0, %cst {dimension_numbers = #tpu.dot_dimension_numbers<[2], [2], [1], [1], [0, 0, 0, 1, 1, 1], [0], [0]>} : vector<8x1x128xf32>, vector<8x16x128xf32>, vector<8x1x16xf32> -> vector<8x1x16xf32>
    "tpu.trace_stop"() : () -> ()
    %c0_5 = arith.constant 0 : index
    %c0_6 = arith.constant 0 : index
    %c0_7 = arith.constant 0 : index
    %5 = vector.load %arg10[%c0_5, %c0_6, %c0_7] : memref<8x1x16xf32, #tpu.memory_space<vmem>>, vector<8x1x16xf32>
    tpu.vector_store %arg10[%c0_5, %c0_6, %c0_7], %4 {strides = array<i32>} : memref<8x1x16xf32, #tpu.memory_space<vmem>>, vector<8x1x16xf32>,
    %cst_8 = arith.constant 0.0883883461 : f32
    %6 = vector.broadcast %cst_8 : f32 to vector<8x1x16xf32>
    %7 = arith.mulf %4, %6 : vector<8x1x16xf32>
    %cst_9 = arith.constant dense<0xFF800000> : vector<8x1xf32>
    %8 = vector.multi_reduction <maximumf>, %7, %cst_9 [2] : vector<8x1x16xf32> to vector<8x1xf32>
    %9 = vector.shape_cast %8 : vector<8x1xf32> to vector<8x1x1xf32>
    %10 = vector.broadcast %9 : vector<8x1x1xf32> to vector<8x1x16xf32>
    %11 = arith.subf %7, %10 : vector<8x1x16xf32>
    %12 = math.exp %11 : vector<8x1x16xf32>
    %cst_10 = arith.constant dense<0.000000e+00> : vector<8x1xf32>
    %13 = vector.multi_reduction <add>, %12, %cst_10 [2] : vector<8x1x16xf32> to vector<8x1xf32>
    %14 = vector.shape_cast %13 : vector<8x1xf32> to vector<8x1x1xf32>
    %15 = vector.broadcast %14 : vector<8x1x1xf32> to vector<8x1x16xf32>
    %16 = arith.divf %12, %15 : vector<8x1x16xf32>
    "tpu.trace_start"() <{level = 10 : i32, message = "bqk,bkd->bqd"}> : () -> ()
    %cst_11 = arith.constant dense<0.000000e+00> : vector<8x1x128xf32>
    %17 = tpu.matmul %16, %0, %cst_11 {dimension_numbers = #tpu.dot_dimension_numbers<[2], [1], [1], [2], [0, 0, 0, 1, 1, 2], [0], [0]>} : vector<8x1x16xf32>, vector<8x16x128xf32>, vector<8x1x128xf32> -> vector<8x1x128xf32>
    "tpu.trace_stop"() : () -> ()
    %18 = vector.shape_cast %17 : vector<8x1x128xf32> to vector<8x128xf32>
    %cst_12 = arith.constant dense<0.000000e+00> : vector<8xf32>
    %19 = vector.multi_reduction <add>, %18, %cst_12 [1] : vector<8x128xf32> to vector<8xf32>
    %20 = vector.shape_cast %19 : vector<8xf32> to vector<8x1xf32>
    %cst_13 = arith.constant 1.280000e+02 : f32
    %21 = vector.broadcast %cst_13 : f32 to vector<8x1xf32>
    %22 = arith.divf %20, %21 : vector<8x1xf32>
    %23 = vector.broadcast %22 : vector<8x1xf32> to vector<8x128xf32>
    %24 = arith.subf %18, %23 : vector<8x128xf32>
    %25 = arith.mulf %24, %24 : vector<8x128xf32>
    %cst_14 = arith.constant dense<0.000000e+00> : vector<8xf32>
    %26 = vector.multi_reduction <add>, %25, %cst_14 [1] : vector<8x128xf32> to vector<8xf32>
    %27 = vector.shape_cast %26 : vector<8xf32> to vector<8x1xf32>
    %cst_15 = arith.constant 1.280000e+02 : f32
    %28 = vector.broadcast %cst_15 : f32 to vector<8x1xf32>
    %29 = arith.divf %27, %28 : vector<8x1xf32>
    %cst_16 = arith.constant 9.99999997E-7 : f32
    %30 = vector.broadcast %cst_16 : f32 to vector<8x1xf32>
    %31 = arith.addf %29, %30 : vector<8x1xf32>
    %32 = math.rsqrt %31 : vector<8x1xf32>
    %33 = vector.broadcast %32 : vector<8x1xf32> to vector<8x128xf32>
    %34 = arith.mulf %24, %33 : vector<8x128xf32>
    %c0_17 = arith.constant 0 : index
    %c0_18 = arith.constant 0 : index
    %35 = vector.load %arg3[%c0_17, %c0_18] : memref<1x128xf32, #tpu.memory_space<vmem>>, vector<1x128xf32>
    %36 = vector.broadcast %35 : vector<1x128xf32> to vector<8x128xf32>
    %37 = arith.mulf %34, %36 : vector<8x128xf32>
    %c0_19 = arith.constant 0 : index
    %c0_20 = arith.constant 0 : index
    %38 = vector.load %arg4[%c0_19, %c0_20] : memref<1x128xf32, #tpu.memory_space<vmem>>, vector<1x128xf32>
    %39 = vector.broadcast %38 : vector<1x128xf32> to vector<8x128xf32>
    %40 = arith.addf %37, %39 : vector<8x128xf32>
    %c0_21 = arith.constant 0 : index
    %c0_22 = arith.constant 0 : index
    %41 = vector.load %arg5[%c0_21, %c0_22] : memref<128x512xf32, #tpu.memory_space<vmem>>, vector<128x512xf32>
    %cst_23 = arith.constant dense<0.000000e+00> : vector<8x512xf32>
    %42 = tpu.matmul %40, %41, %cst_23 {dimension_numbers = #tpu.dot_dimension_numbers<[1], [0], [0], [1], [0, 0, 1, 1], [], []>} : vector<8x128xf32>, vector<128x512xf32>, vector<8x512xf32> -> vector<8x512xf32>
    %c0_24 = arith.constant 0 : index
    %c0_25 = arith.constant 0 : index
    %43 = vector.load %arg6[%c0_24, %c0_25] : memref<1x512xf32, #tpu.memory_space<vmem>>, vector<1x512xf32>
    %44 = vector.broadcast %43 : vector<1x512xf32> to vector<8x512xf32>
    %45 = arith.addf %42, %44 : vector<8x512xf32>
    %cst_26 = arith.constant 5.000000e-01 : f32
    %46 = vector.broadcast %cst_26 : f32 to vector<8x512xf32>
    %47 = arith.mulf %46, %45 : vector<8x512xf32>
    %cst_27 = arith.constant 0.707106769 : f32
    %48 = vector.broadcast %cst_27 : f32 to vector<8x512xf32>
    %49 = arith.mulf %45, %48 : vector<8x512xf32>
    %50 = math.absf %49 : vector<8x512xf32>
    %cst_28 = arith.constant 0.327591091 : f32
    %51 = vector.broadcast %cst_28 : f32 to vector<8x512xf32>
    %52 = arith.mulf %51, %50 : vector<8x512xf32>
    %cst_29 = arith.constant 1.000000e+00 : f32
    %53 = vector.broadcast %cst_29 : f32 to vector<8x512xf32>
    %54 = arith.addf %53, %52 : vector<8x512xf32>
    %cst_30 = arith.constant 1.000000e+00 : f32
    %55 = vector.broadcast %cst_30 : f32 to vector<8x512xf32>
    %56 = arith.divf %55, %54 : vector<8x512xf32>
    %cst_31 = arith.constant 1.06140542 : f32
    %57 = vector.broadcast %cst_31 : f32 to vector<8x512xf32>
    %58 = arith.mulf %57, %56 : vector<8x512xf32>
    %cst_32 = arith.constant -1.45315206 : f32
    %59 = vector.broadcast %cst_32 : f32 to vector<8x512xf32>
    %60 = arith.addf %58, %59 : vector<8x512xf32>
    %61 = arith.mulf %60, %56 : vector<8x512xf32>
    %cst_33 = arith.constant 1.42141378 : f32
    %62 = vector.broadcast %cst_33 : f32 to vector<8x512xf32>
    %63 = arith.addf %61, %62 : vector<8x512xf32>
    %64 = arith.mulf %63, %56 : vector<8x512xf32>
    %cst_34 = arith.constant -0.284496725 : f32
    %65 = vector.broadcast %cst_34 : f32 to vector<8x512xf32>
    %66 = arith.addf %64, %65 : vector<8x512xf32>
    %67 = arith.mulf %66, %56 : vector<8x512xf32>
    %cst_35 = arith.constant 0.254829586 : f32
    %68 = vector.broadcast %cst_35 : f32 to vector<8x512xf32>
    %69 = arith.addf %67, %68 : vector<8x512xf32>
    %70 = arith.mulf %69, %56 : vector<8x512xf32>
    %cst_36 = arith.constant 0.000000e+00 : f32
    %71 = vector.broadcast %cst_36 : f32 to vector<8x512xf32>
    %72 = arith.subf %71, %50 : vector<8x512xf32>
    %73 = arith.mulf %72, %50 : vector<8x512xf32>
    %74 = math.exp %73 : vector<8x512xf32>
    %75 = arith.mulf %70, %74 : vector<8x512xf32>
    %cst_37 = arith.constant 1.000000e+00 : f32
    %76 = vector.broadcast %cst_37 : f32 to vector<8x512xf32>
    %77 = arith.subf %76, %75 : vector<8x512xf32>
    %cst_38 = arith.constant 0.000000e+00 : f32
    %78 = vector.broadcast %cst_38 : f32 to vector<8x512xf32>
    %79 = arith.cmpf oge, %49, %78 : vector<8x512xf32>
    %cst_39 = arith.constant 0.000000e+00 : f32
    %80 = vector.broadcast %cst_39 : f32 to vector<8x512xf32>
    %81 = arith.subf %80, %77 : vector<8x512xf32>
    %82 = arith.select %79, %77, %81 : vector<8x512xi1>, vector<8x512xf32>
    %cst_40 = arith.constant 1.000000e+00 : f32
    %83 = vector.broadcast %cst_40 : f32 to vector<8x512xf32>
    %84 = arith.addf %83, %82 : vector<8x512xf32>
    %85 = arith.mulf %47, %84 : vector<8x512xf32>
    %c0_41 = arith.constant 0 : index
    %c0_42 = arith.constant 0 : index
    %86 = vector.load %arg7[%c0_41, %c0_42] : memref<512x128xf32, #tpu.memory_space<vmem>>, vector<512x128xf32>
    %cst_43 = arith.constant dense<0.000000e+00> : vector<8x128xf32>
    %87 = tpu.matmul %85, %86, %cst_43 {dimension_numbers = #tpu.dot_dimension_numbers<[1], [0], [0], [1], [0, 0, 1, 1], [], []>} : vector<8x512xf32>, vector<512x128xf32>, vector<8x128xf32> -> vector<8x128xf32>
    %c0_44 = arith.constant 0 : index
    %c0_45 = arith.constant 0 : index
    %88 = vector.load %arg8[%c0_44, %c0_45] : memref<1x128xf32, #tpu.memory_space<vmem>>, vector<1x128xf32>
    %89 = vector.broadcast %88 : vector<1x128xf32> to vector<8x128xf32>
    %90 = arith.addf %87, %89 : vector<8x128xf32>
    %91 = arith.addf %18, %90 : vector<8x128xf32>
    %c0_46 = arith.constant 0 : index
    %c0_47 = arith.constant 0 : index
    %92 = vector.load %arg9[%c0_46, %c0_47] : memref<8x128xf32, #tpu.memory_space<vmem>>, vector<8x128xf32>
    tpu.vector_store %arg9[%c0_46, %c0_47], %91 {strides = array<i32>} : memref<8x128xf32, #tpu.memory_space<vmem>>, vector<8x128xf32>,
    return
  }
  func.func @transform_0(%arg0: i32) -> (i32, i32, i32) {
    %c0_i32 = arith.constant 0 : i32
    %c0_i32_0 = arith.constant 0 : i32
    %c0_i32_1 = arith.constant 0 : i32
    return %arg0, %c0_i32, %c0_i32_0 : i32, i32, i32
  }
  func.func @transform_1(%arg0: i32) -> (i32, i32, i32) {
    %c0_i32 = arith.constant 0 : i32
    %c0_i32_0 = arith.constant 0 : i32
    %c0_i32_1 = arith.constant 0 : i32
    %c0_i32_2 = arith.constant 0 : i32
    return %c0_i32, %c0_i32_0, %c0_i32_1 : i32, i32, i32
  }
  func.func @transform_2(%arg0: i32) -> (i32, i32) {
    %c0_i32 = arith.constant 0 : i32
    %c0_i32_0 = arith.constant 0 : i32
    %c0_i32_1 = arith.constant 0 : i32
    return %c0_i32, %c0_i32_0 : i32, i32
  }
  func.func @transform_3(%arg0: i32) -> (i32, i32) {
    %c0_i32 = arith.constant 0 : i32
    %c0_i32_0 = arith.constant 0 : i32
    %c0_i32_1 = arith.constant 0 : i32
    return %c0_i32, %c0_i32_0 : i32, i32
  }
  func.func @transform_4(%arg0: i32) -> (i32, i32) {
    %c0_i32 = arith.constant 0 : i32
    %c0_i32_0 = arith.constant 0 : i32
    %c0_i32_1 = arith.constant 0 : i32
    return %c0_i32, %c0_i32_0 : i32, i32
  }
  func.func @transform_5(%arg0: i32) -> (i32, i32) {
    %c0_i32 = arith.constant 0 : i32
    %c0_i32_0 = arith.constant 0 : i32
    %c0_i32_1 = arith.constant 0 : i32
    return %c0_i32, %c0_i32_0 : i32, i32
  }
  func.func @transform_6(%arg0: i32) -> (i32, i32) {
    %c0_i32 = arith.constant 0 : i32
    %c0_i32_0 = arith.constant 0 : i32
    %c0_i32_1 = arith.constant 0 : i32
    return %c0_i32, %c0_i32_0 : i32, i32
  }
  func.func @transform_7(%arg0: i32) -> (i32, i32) {
    %c0_i32 = arith.constant 0 : i32
    %c0_i32_0 = arith.constant 0 : i32
    %c0_i32_1 = arith.constant 0 : i32
    return %c0_i32, %c0_i32_0 : i32, i32
  }
  func.func @transform_8(%arg0: i32) -> (i32, i32) {
    %c0_i32 = arith.constant 0 : i32
    %c0_i32_0 = arith.constant 0 : i32
    return %arg0, %c0_i32 : i32, i32
  }
  func.func @transform_9(%arg0: i32) -> (i32, i32, i32) {
    %c0_i32 = arith.constant 0 : i32
    %c0_i32_0 = arith.constant 0 : i32
    %c0_i32_1 = arith.constant 0 : i32
    return %arg0, %c0_i32, %c0_i32_0 : i32, i32, i32
  }
}

</mosaic_0001>

<bundles_post_ra>
// kernel: tpu_custom_call.1
= control target key start
LH: loop header
LB: loop body
LE: loop exit
PB: predicated region body
PF: predicated region fallthrough
CT: control target
= control target key end

     0   :  { %15 = vsyncpa [#allocation3], 0  ;;  %s3123_s0 = inlined_call_operand.hbm [shape: f32[8,16,128], index: 0, kind: input, shape index: {}]   ;;  %s3124_s1 = inlined_call_operand.vmem [shape: f32[1,1,128], index: 1, kind: input, shape index: {}]   ;;  %s3125_s2 = inlined_call_operand.vmem [shape: f32[1,128], index: 2, kind: input, shape index: {}]   ;;  %s3126_s3 = inlined_call_operand.vmem [shape: f32[1,128], index: 3, kind: input, shape index: {}]   ;;  %s3127_s4 = inlined_call_operand.hbm [shape: f32[128,512], index: 4, kind: input, shape index: {}]   ;;  %s3128_s5 = inlined_call_operand.vmem [shape: f32[1,512], index: 5, kind: input, shape index: {}]   ;;  %s3129_s6 = inlined_call_operand.hbm [shape: f32[512,128], index: 6, kind: input, shape index: {}]   ;;  %s3130_s7 = inlined_call_operand.vmem [shape: f32[1,128], index: 7, kind: input, shape index: {}]   ;;  %s3131_s8 = inlined_call_operand.hbm [shape: f32[8,128], index: 8, kind: output, shape index: {0}]   ;;  %s3132_s9 = inlined_call_operand.hbm [shape: f32[8,1,16], index: 9, kind: output, shape index: {1}]  }
   0x1   :  { %16 = vsyncpa [#allocation6], 0 }
   0x2   :  { %17 = vsyncpa [#allocation4], 0 }
   0x3   :  { %18 = vsyncpa [#allocation10], 0  ;;  %s2738_s30 = smov [#allocation5]   ;;  %s2620_s13 = scalar_lea.hbm %s3127_s4, 8192 }
   0x4   :  { %s42_s10 = sshll.u32 %s2738_s30, 4  ;;  %p2621_p0 = scmp.ne.s32.totalorder %s3127_s4, %s2620_s13  ;;  %s43_s10 = int_to_ptr.vmem [resolvable:$true] %s42_s10 }
   0x5   :  { %p2624_p1 = scmp.lt.u32.totalorder %s2620_s13, %s3127_s4 }
   0x7   :  { %p2626_p2 = pnand %p2624_p1, %p2621_p0 }
   0x9   :  { %2629 = shalt.err (!%p2626_p2)
}
   0xa   :  { %s2630_s18 = scalar_lea.vmem %s43_s10, 8192  ;;  %p2635_p4 = scmp.lt.s32.totalorder %s43_s10, %s43_s10 }
   0xb   :  { %p2631_p3 = scmp.ne.s32.totalorder %s43_s10, %s2630_s18  ;;  %p2636_p5 = scmp.lt.s32.totalorder %s2630_s18, %s2630_s18 }
   0xd   :  { %p2637_p6 = por %p2636_p5, %p2635_p4 }
   0xf   :  { %p2638_p7 = pnand %p2637_p6, %p2631_p3 }
  0x11   :  { %2641 = shalt.err (!%p2638_p7)
}
  0x12   :  { %s2739_s19 = smov 512   ;;  %s2740_s20 = smov 32  }
  0x13   :  { %48 = dma.hbm_to_vmem [thread:$0]  %s3127_s4, 8192, %s43_s10, [#allocation6], %s2739_s19, %s2739_s19, %s2740_s20  }
  0x14   :  { %s2741_s23 = smov [#allocation2]   ;;  %s2642_s27 = scalar_lea.hbm %s3123_s0, 2048 }
  0x15   :  { %s24_s24 = sshll.u32 %s2741_s23, 4  ;;  %p2643_p8 = scmp.ne.s32.totalorder %s3123_s0, %s2642_s27  ;;  %s25_s24 = int_to_ptr.vmem [resolvable:$true] %s24_s24 }
  0x16   :  { %p2646_p9 = scmp.lt.u32.totalorder %s2642_s27, %s3123_s0 }
  0x18   :  { %p2648_p10 = pnand %p2646_p9, %p2643_p8 }
  0x1a   :  { %2651 = shalt.err (!%p2648_p10)
}
  0x1b   :  { %s2652_s12 = scalar_lea.vmem %s25_s24, 2048  ;;  %p2657_p12 = scmp.lt.s32.totalorder %s25_s24, %s25_s24 }
  0x1c   :  { %p2653_p11 = scmp.ne.s32.totalorder %s25_s24, %s2652_s12  ;;  %p2658_p13 = scmp.lt.s32.totalorder %s2652_s12, %s2652_s12 }
  0x1e   :  { %p2659_p0 = por %p2658_p13, %p2657_p12 }
  0x20   :  { %p2660_p1 = pnand %p2659_p0, %p2653_p11 }
  0x22   :  { %2663 = shalt.err (!%p2660_p1)
}
  0x23   :  { %s2742_s4 = smov 128   ;;  %s2743_s10 = smov 8  }
  0x24   :  { %30 = dma.hbm_to_vmem [thread:$0]  %s3123_s0, 2048, %s25_s24, [#allocation3], %s2742_s4, %s2742_s4, %s2743_s10  }
  0x25   :  { %s2744_s15 = smov [#allocation7]   ;;  %s2664_s19 = scalar_lea.hbm %s3129_s6, 8192 }
  0x26   :  { %s56_s16 = sshll.u32 %s2744_s15, 4  ;;  %p2665_p2 = scmp.ne.s32.totalorder %s3129_s6, %s2664_s19  ;;  %s57_s16 = int_to_ptr.vmem [resolvable:$true] %s56_s16 }
  0x27   :  { %p2668_p3 = scmp.lt.u32.totalorder %s2664_s19, %s3129_s6 }
  0x29   :  { %p2670_p4 = pnand %p2668_p3, %p2665_p2 }
  0x2b   :  { %2673 = shalt.err (!%p2670_p4)
}
  0x2c   :  { %s2674_s25 = scalar_lea.vmem %s57_s16, 8192  ;;  %p2679_p6 = scmp.lt.s32.totalorder %s57_s16, %s57_s16 }
  0x2d   :  { %p2675_p5 = scmp.ne.s32.totalorder %s57_s16, %s2674_s25  ;;  %p2680_p7 = scmp.lt.s32.totalorder %s2674_s25, %s2674_s25 }
  0x2f   :  { %p2681_p8 = por %p2680_p7, %p2679_p6 }
  0x31   :  { %p2682_p9 = pnand %p2681_p8, %p2675_p5 }
  0x33   :  { %2685 = shalt.err (!%p2682_p9)
}
  0x34   :  { %62 = dma.hbm_to_vmem [thread:$0]  %s3129_s6, 8192, %s57_s16, [#allocation6], %s2742_s4, %s2742_s4, %s2743_s10  }
  0x35   :  { %2730 = dma.done.wait [#allocation3], 2048  }
  0x36   :  { %2731 = vsyncadd [#allocation3], 4294965248 }
  0x37   :  { %2732 = dma.done.wait [#allocation6], 16384  }
  0x38   :  { %2733 = vsyncadd [#allocation6], 4294950912  ;;  %v2745_v0 = vmov 0.0|0.0   ;;  %vm2746_vm0 = vmmov 0   ;;  %v2747_v1 = vmov 0.0   ;;  %v74_v2 = vld [vmem:[#allocation2] sm:$0xff] }
  0x39   :  { %2380 = vmatprep.subr.bf16.mxu0 %v2745_v0  ;;  %2383 = vmatprep.subr.bf16.mxu1 %v2745_v0  ;;  %v75_v3 = vld [vmem:[#allocation2 + $0x8] sm:$0xff]  ;;  %v76_v4 = vld [vmem:[#allocation2 + $0x10] sm:$0xff]  ;;  %v77_v6 = vld [vmem:[#allocation2 + $0x18] sm:$0xff]  ;;  %vm651_vm1 = vcmask 122880   ;;  %vm756_vm2 = vcmask 130048   ;;  %vm1350_vm3 = vcmask 1041409  }
  0x3a   :  { %2272 = vmatprep.mubr.msk.f32.mxu0 %vm2746_vm0, %v2747_v1  ;;  %2279 = vmatprep.mubr.msk.f32.mxu1 %vm2746_vm0, %v2747_v1  ;;  %v2381_v5 = vpack.c.bf16 %v75_v3, %v74_v2  ;;  %v2384_v7 = vpack.c.bf16 %v77_v6, %v76_v4  ;;  %v78_v8 = vld [vmem:[#allocation2 + $0x20] sm:$0xff]  ;;  %v79_v9 = vld [vmem:[#allocation2 + $0x28] sm:$0xff]  ;;  %v80_v10 = vld [vmem:[#allocation2 + $0x30] sm:$0xff]  ;;  %vm1353_vm4 = vcmask 1042434   ;;  %vm1356_vm5 = vcmask 1043459  }
  0x3b   :  { %v81_v11 = vld [vmem:[#allocation2 + $0x38] sm:$0xff]  ;;  %v90_v12 = vld [vmem:[%s3124_s1] sm:$0x1]  ;;  %v2849_v13 = vpack.c.bf16 %v79_v9, %v78_v8  ;;  %v83_v16 = vld [vmem:[#allocation2 + $0x48] sm:$0xff]  ;;  %vm1359_vm6 = vcmask 1044484   ;;  %vm1362_vm7 = vcmask 1045509  }
  0x3c   :  { %2382 = vmatpush3.bf16.xpose.msra.mxu0 %v2381_v5  ;;  %2385 = vmatpush3.bf16.xpose.msra.mxu1 %v2384_v7  ;;  %v2851_v14 = vpack.c.bf16 %v81_v11, %v80_v10  ;;  %v82_v15 = vld [vmem:[#allocation2 + $0x40] sm:$0xff]  ;;  %v84_v17 = vld [vmem:[#allocation2 + $0x50] sm:$0xff]  ;;  %v85_v18 = vld [vmem:[#allocation2 + $0x58] sm:$0xff]  ;;  %vm1365_vm8 = vcmask 1046534   ;;  %vm1368_vm9 = vcmask 1047559  }
  0x3d   :  { %2386 = vmatprep.subr.bf16.mxu0 %v2745_v0  ;;  %2389 = vmatprep.subr.bf16.mxu1 %v2745_v0  ;;  %v2861_v19 = vpack.c.bf16 %v83_v16, %v82_v15  ;;  %v2863_v20 = vpack.c.bf16 %v85_v18, %v84_v17  ;;  %v86_v21 = vld [vmem:[#allocation2 + $0x60] sm:$0xff]  ;;  %v87_v22 = vld [vmem:[#allocation2 + $0x68] sm:$0xff]  ;;  %v88_v23 = vld [vmem:[#allocation2 + $0x70] sm:$0xff] }
  0x3e   :  { %v89_v24 = vld [vmem:[#allocation2 + $0x78] sm:$0xff]  ;;  %v2873_v25 = vpack.c.bf16 %v87_v22, %v86_v21 }
  0x3f   :  { %v2875_v26 = vpack.c.bf16 %v89_v24, %v88_v23 }
  0x43   :  { %2273 = vmatmul.mubr.f32.vlgmr.msra.gmra.mrb[0].mxu0 %v90_v12  ;;  %2280 = vmatmul.mubr.f32.vlgmr.msra.gmra.mrb[0].mxu1 %v90_v12 }
  0x44   :  { %2388 = vmatpush3.bf16.xpose.msra.mxu0 %v2849_v13  ;;  %2391 = vmatpush3.bf16.xpose.msra.mxu1 %v2851_v14 }
  0x45   :  { %2286 = vmatprep.mubr.msk.f32.mxu0 %vm2746_vm0, %v2747_v1  ;;  %2293 = vmatprep.mubr.msk.f32.mxu1 %vm2746_vm0, %v2747_v1 }
  0x46   :  { %2392 = vmatprep.subr.bf16.mxu0 %v2745_v0  ;;  %2395 = vmatprep.subr.bf16.mxu1 %v2745_v0 }
  0x4b   :  { %2287 = vmatmul.mubr.f32.vlgmr.msra.gmra.mrb[2].mxu0 %v90_v12  ;;  %2294 = vmatmul.mubr.f32.vlgmr.msra.gmra.mrb[2].mxu1 %v90_v12 }
  0x4c   :  { %2394 = vmatpush3.bf16.xpose.msra.mxu0 %v2861_v19  ;;  %2397 = vmatpush3.bf16.xpose.msra.mxu1 %v2863_v20 }
  0x4d   :  { %2300 = vmatprep.mubr.msk.f32.mxu0 %vm2746_vm0, %v2747_v1  ;;  %2307 = vmatprep.mubr.msk.f32.mxu1 %vm2746_vm0, %v2747_v1 }
  0x4e   :  { %2398 = vmatprep.subr.bf16.mxu0 %v2745_v0  ;;  %2401 = vmatprep.subr.bf16.mxu1 %v2745_v0 }
  0x53   :  { %2301 = vmatmul.mubr.f32.vlgmr.msra.gmra.mrb[4].mxu0 %v90_v12  ;;  %2308 = vmatmul.mubr.f32.vlgmr.msra.gmra.mrb[4].mxu1 %v90_v12 }
  0x54   :  { %2400 = vmatpush3.bf16.xpose.msra.mxu0 %v2873_v25  ;;  %2403 = vmatpush3.bf16.xpose.msra.mxu1 %v2875_v26 }
  0x55   :  { %2314 = vmatprep.mubr.msk.f32.mxu0 %vm2746_vm0, %v2747_v1  ;;  %2321 = vmatprep.mubr.msk.f32.mxu1 %vm2746_vm0, %v2747_v1 }
  0x56   :  { %2404 = vmatprep.subr.bf16.mxu0 %v2745_v0  ;;  %2407 = vmatprep.subr.bf16.mxu1 %v2745_v0 }
  0x5b   :  { %2315 = vmatmul.mubr.f32.vlgmr.msra.gmra.mrb[6].mxu0 %v90_v12  ;;  %2322 = vmatmul.mubr.f32.vlgmr.msra.gmra.mrb[6].mxu1 %v90_v12 }
  0x5c   :  { %2406 = vmatpush3.bf16.msra.mxu0 %v2381_v5  ;;  %2328 = vmatprep.mubr.msk.f32.mxu0 %vm2746_vm0, %v2747_v1 }
  0x5d   :  { %2409 = vmatpush3.bf16.msra.mxu1 %v2384_v7  ;;  %2335 = vmatprep.mubr.msk.f32.mxu1 %vm2746_vm0, %v2747_v1 }
  0x5e   :  { %2410 = vmatprep.subr.bf16.mxu0 %v2745_v0  ;;  %2413 = vmatprep.subr.bf16.mxu1 %v2745_v0 }
 0x116   :  { %v157_v27 = vpop.f32.mrb[0].mxu0  ;;  %v227_v29 = vpop.f32.mrb[0].mxu1 }
 0x117   :  { %652 = vst.msk [vmem:[#allocation9] sm:$0x1] %vm651_vm1, %v157_v27  ;;  %v2274_v28 = vpop.f32.mrb[1].mxu0  ;;  %v660_v30 = vmul.f32 0.088388346, %v157_v27  ;;  %v2281_v31 = vpop.f32.mrb[1].mxu1 }
 0x118   :  { %653 = vst.msk [vmem:[#allocation9 + $0x1] sm:$0x1] %vm651_vm1, %v227_v29  ;;  %v661_v32 = vmul.f32 0.088388346, %v227_v29 }
 0x119   :  { %v668_v33 = vsel %vm651_vm1, %v660_v30, -inf }
 0x11a   :  { %669 = vmax.xlane.f32.xlu0 %v668_v33  ;;  %v671_v34 = vsel %vm651_vm1, %v661_v32, -inf }
 0x11e   :  { %672 = vmax.xlane.f32.xlu0 %v671_v34  ;;  %v297_v35 = vpop.f32.mrb[2].mxu0  ;;  %v367_v37 = vpop.f32.mrb[2].mxu1 }
 0x11f   :  { %654 = vst.msk [vmem:[#allocation9 + $0x2] sm:$0x1] %vm651_vm1, %v297_v35  ;;  %v2288_v36 = vpop.f32.mrb[3].mxu0  ;;  %v662_v38 = vmul.f32 0.088388346, %v297_v35  ;;  %v2295_v39 = vpop.f32.mrb[3].mxu1 }
 0x120   :  { %655 = vst.msk [vmem:[#allocation9 + $0x3] sm:$0x1] %vm651_vm1, %v367_v37  ;;  %v663_v40 = vmul.f32 0.088388346, %v367_v37 }
 0x121   :  { %v674_v41 = vsel %vm651_vm1, %v662_v38, -inf }
 0x122   :  { %675 = vmax.xlane.f32.xlu1 %v674_v41  ;;  %v677_v42 = vsel %vm651_vm1, %v663_v40, -inf }
 0x126   :  { %678 = vmax.xlane.f32.xlu1 %v677_v42  ;;  %v437_v43 = vpop.f32.mrb[4].mxu0  ;;  %v507_v44 = vpop.f32.mrb[4].mxu1 }
 0x127   :  { %656 = vst.msk [vmem:[#allocation9 + $0x4] sm:$0x1] %vm651_vm1, %v437_v43  ;;  %v664_v45 = vmul.f32 0.088388346, %v437_v43  ;;  %v2302_v46 = vpop.f32.mrb[5].mxu0  ;;  %v2309_v48 = vpop.f32.mrb[5].mxu1 }
 0x128   :  { %657 = vst.msk [vmem:[#allocation9 + $0x5] sm:$0x1] %vm651_vm1, %v507_v44  ;;  %v665_v47 = vmul.f32 0.088388346, %v507_v44 }
 0x129   :  { %v680_v49 = vsel %vm651_vm1, %v664_v45, -inf }
 0x12a   :  { %v683_v50 = vsel %vm651_vm1, %v665_v47, -inf  ;;  %681 = vmax.xlane.f32.xlu0 %v680_v49 }
 0x12b   :  { %684 = vmax.xlane.f32.xlu1 %v683_v50 }
 0x12e   :  { %v577_v51 = vpop.f32.mrb[6].mxu0  ;;  %v647_v53 = vpop.f32.mrb[6].mxu1 }
 0x12f   :  { %658 = vst.msk [vmem:[#allocation9 + $0x6] sm:$0x1] %vm651_vm1, %v577_v51  ;;  %v666_v52 = vmul.f32 0.088388346, %v577_v51  ;;  %v2316_v54 = vpop.f32.mrb[7].mxu0  ;;  %v2323_v56 = vpop.f32.mrb[7].mxu1 }
 0x130   :  { %659 = vst.msk [vmem:[#allocation9 + $0x7] sm:$0x1] %vm651_vm1, %v647_v53  ;;  %v667_v55 = vmul.f32 0.088388346, %v647_v53 }
 0x131   :  { %v686_v57 = vsel %vm651_vm1, %v666_v52, -inf }
 0x132   :  { %v689_v58 = vsel %vm651_vm1, %v667_v55, -inf  ;;  %687 = vmax.xlane.f32.xlu0 %v686_v57 }
 0x133   :  { %690 = vmax.xlane.f32.xlu1 %v689_v58 }
 0x1a7   :  { %v670_v59 = vpop.xlane.xlu0 %669 }
 0x1a8   :  { %v692_v60 = vsub.f32 %v660_v30, %v670_v59 }
 0x1aa   :  { %v700_v61 = vmul.f32 1.442695, %v692_v60 }
 0x1ab   :  { %v673_v62 = vpop.xlane.xlu0 %672 }
 0x1ac   :  { %2570 = vpow2.f32 %v700_v61  ;;  %v693_v63 = vsub.f32 %v661_v32, %v673_v62 }
 0x1ae   :  { %v702_v2 = vmul.f32 1.442695, %v693_v63 }
 0x1af   :  { %v676_v3 = vpop.xlane.xlu1 %675 }
 0x1b0   :  { %2572 = vpow2.f32 %v702_v2  ;;  %v694_v4 = vsub.f32 %v662_v38, %v676_v3 }
 0x1b2   :  { %v704_v5 = vmul.f32 1.442695, %v694_v4 }
 0x1b3   :  { %v679_v6 = vpop.xlane.xlu1 %678 }
 0x1b4   :  { %2574 = vpow2.f32 %v704_v5  ;;  %v695_v7 = vsub.f32 %v663_v40, %v679_v6 }
 0x1b6   :  { %v2571_v8 = vpop.eup %2570  ;;  %v706_v9 = vmul.f32 1.442695, %v695_v7 }
 0x1b7   :  { %v682_v10 = vpop.xlane.xlu0 %681  ;;  %v716_v11 = vsel %vm651_vm1, %v2571_v8, 0.0 }
 0x1b8   :  { %2576 = vpow2.f32 %v706_v9  ;;  %v685_v12 = vpop.xlane.xlu1 %684  ;;  %v696_v15 = vsub.f32 %v664_v45, %v682_v10  ;;  %717 = vadd.xlane.f32.xlu0 %v716_v11 }
 0x1b9   :  { %v697_v16 = vsub.f32 %v665_v47, %v685_v12 }
 0x1ba   :  { %v2573_v17 = vpop.eup %2572  ;;  %v708_v18 = vmul.f32 1.442695, %v696_v15 }
 0x1bb   :  { %v710_v21 = vmul.f32 1.442695, %v697_v16  ;;  %v719_v22 = vsel %vm651_vm1, %v2573_v17, 0.0 }
 0x1bc   :  { %2578 = vpow2.f32 %v708_v18  ;;  %720 = vadd.xlane.f32.xlu1 %v719_v22 }
 0x1bd   :  { %2580 = vpow2.f32 %v710_v21 }
 0x1be   :  { %v2575_v23 = vpop.eup %2574 }
 0x1bf   :  { %v688_v24 = vpop.xlane.xlu0 %687  ;;  %v722_v27 = vsel %vm651_vm1, %v2575_v23, 0.0 }
 0x1c0   :  { %v691_v28 = vpop.xlane.xlu1 %690  ;;  %v698_v29 = vsub.f32 %v666_v52, %v688_v24  ;;  %723 = vadd.xlane.f32.xlu0 %v722_v27 }
 0x1c1   :  { %v699_v30 = vsub.f32 %v667_v55, %v691_v28 }
 0x1c2   :  { %v2577_v31 = vpop.eup %2576  ;;  %v712_v32 = vmul.f32 1.442695, %v698_v29 }
 0x1c3   :  { %v714_v33 = vmul.f32 1.442695, %v699_v30  ;;  %v725_v34 = vsel %vm651_vm1, %v2577_v31, 0.0 }
 0x1c4   :  { %2582 = vpow2.f32 %v712_v32  ;;  %726 = vadd.xlane.f32.xlu1 %v725_v34 }
 0x1c5   :  { %2584 = vpow2.f32 %v714_v33 }
 0x1c6   :  { %v2579_v35 = vpop.eup %2578 }
 0x1c7   :  { %v2581_v36 = vpop.eup %2580  ;;  %v728_v37 = vsel %vm651_vm1, %v2579_v35, 0.0 }
 0x1c8   :  { %v731_v38 = vsel %vm651_vm1, %v2581_v36, 0.0  ;;  %729 = vadd.xlane.f32.xlu0 %v728_v37 }
 0x1c9   :  { %732 = vadd.xlane.f32.xlu1 %v731_v38 }
 0x1ce   :  { %v2583_v39 = vpop.eup %2582 }
 0x1cf   :  { %v2585_v40 = vpop.eup %2584  ;;  %v734_v41 = vsel %vm651_vm1, %v2583_v39, 0.0 }
 0x1d0   :  { %v737_v42 = vsel %vm651_vm1, %v2585_v40, 0.0  ;;  %735 = vadd.xlane.f32.xlu0 %v734_v41 }
 0x1d1   :  { %738 = vadd.xlane.f32.xlu1 %v737_v42 }
 0x245   :  { %v718_v43 = vpop.xlane.xlu0 %717 }
 0x246   :  { %2586 = vrcp.f32 %v718_v43 }
 0x249   :  { %v721_v44 = vpop.xlane.xlu1 %720 }
 0x24a   :  { %2588 = vrcp.f32 %v721_v44 }
 0x24d   :  { %v724_v45 = vpop.xlane.xlu0 %723 }
 0x24e   :  { %2590 = vrcp.f32 %v724_v45 }
 0x250   :  { %v2587_v46 = vpop.eup %2586 }
 0x251   :  { %v741_v47 = vmul.f32 %v2587_v46, %v2571_v8  ;;  %v727_v48 = vpop.xlane.xlu1 %726 }
 0x252   :  { %2592 = vrcp.f32 %v727_v48 }
 0x253   :  { %2329 = vmatmul.mubr.msk.f32.vlgmr.msra.gmra.mrb[8].mxu0 %vm756_vm2, %v741_v47 }
 0x254   :  { %v2589_v49 = vpop.eup %2588  ;;  %2412 = vmatpush3.bf16.msra.mxu0 %v2849_v13  ;;  %2342 = vmatprep.mubr.msk.f32.mxu0 %vm2746_vm0, %v2747_v1 }
 0x255   :  { %v743_v50 = vmul.f32 %v2589_v49, %v2573_v17  ;;  %v730_v51 = vpop.xlane.xlu0 %729  ;;  %2416 = vmatprep.subr.bf16.mxu0 %v2745_v0 }
 0x256   :  { %v733_v52 = vpop.xlane.xlu1 %732  ;;  %2594 = vrcp.f32 %v730_v51 }
 0x257   :  { %2596 = vrcp.f32 %v733_v52  ;;  %2336 = vmatmul.mubr.msk.f32.vlgmr.msra.gmra.mrb[8].mxu1 %vm756_vm2, %v743_v50 }
 0x258   :  { %v2591_v53 = vpop.eup %2590  ;;  %2415 = vmatpush3.bf16.msra.mxu1 %v2851_v14  ;;  %2349 = vmatprep.mubr.msk.f32.mxu1 %vm2746_vm0, %v2747_v1 }
 0x259   :  { %v745_v54 = vmul.f32 %v2591_v53, %v2575_v23  ;;  %2419 = vmatprep.subr.bf16.mxu1 %v2745_v0 }
 0x25b   :  { %2343 = vmatmul.mubr.msk.f32.vlgmr.msra.gmra.mrb[10].mxu0 %vm756_vm2, %v745_v54 }
 0x25c   :  { %v2593_v13 = vpop.eup %2592  ;;  %2418 = vmatpush3.bf16.msra.mxu0 %v2861_v19  ;;  %2356 = vmatprep.mubr.msk.f32.mxu0 %vm2746_vm0, %v2747_v1 }
 0x25d   :  { %v747_v55 = vmul.f32 %v2593_v13, %v2577_v31  ;;  %v736_v56 = vpop.xlane.xlu0 %735  ;;  %2422 = vmatprep.subr.bf16.mxu0 %v2745_v0 }
 0x25e   :  { %v739_v57 = vpop.xlane.xlu1 %738  ;;  %2598 = vrcp.f32 %v736_v56 }
 0x25f   :  { %2600 = vrcp.f32 %v739_v57  ;;  %2350 = vmatmul.mubr.msk.f32.vlgmr.msra.gmra.mrb[10].mxu1 %vm756_vm2, %v747_v55 }
 0x260   :  { %v2595_v14 = vpop.eup %2594  ;;  %2421 = vmatpush3.bf16.msra.mxu1 %v2863_v20  ;;  %2363 = vmatprep.mubr.msk.f32.mxu1 %vm2746_vm0, %v2747_v1 }
 0x261   :  { %v2597_v58 = vpop.eup %2596  ;;  %v749_v19 = vmul.f32 %v2595_v14, %v2579_v35  ;;  %2425 = vmatprep.subr.bf16.mxu1 %v2745_v0 }
 0x262   :  { %v751_v59 = vmul.f32 %v2597_v58, %v2581_v36 }
 0x263   :  { %2357 = vmatmul.mubr.msk.f32.vlgmr.msra.gmra.mrb[12].mxu0 %vm756_vm2, %v749_v19 }
 0x264   :  { %2364 = vmatmul.mubr.msk.f32.vlgmr.msra.gmra.mrb[12].mxu1 %vm756_vm2, %v751_v59  ;;  %2424 = vmatpush3.bf16.msra.mxu0 %v2873_v25 }
 0x265   :  { %2427 = vmatpush3.bf16.msra.mxu1 %v2875_v26  ;;  %2370 = vmatprep.mubr.msk.f32.mxu0 %vm2746_vm0, %v2747_v1 }
 0x266   :  { %2377 = vmatprep.mubr.msk.f32.mxu1 %vm2746_vm0, %v2747_v1 }
 0x268   :  { %v2599_v20 = vpop.eup %2598 }
 0x269   :  { %v2601_v60 = vpop.eup %2600  ;;  %v753_v61 = vmul.f32 %v2599_v20, %v2583_v39 }
 0x26a   :  { %v755_v62 = vmul.f32 %v2601_v60, %v2585_v40 }
 0x26b   :  { %2371 = vmatmul.mubr.msk.f32.vlgmr.msra.gmra.mrb[14].mxu0 %vm756_vm2, %v753_v61 }
 0x26c   :  { %2378 = vmatmul.mubr.msk.f32.vlgmr.msra.gmra.mrb[14].mxu1 %vm756_vm2, %v755_v62  ;;  %1662 = vmatprep.mubr.f32.mxu0 %v2747_v1 }
 0x26d   :  { %1733 = vmatprep.mubr.f32.mxu1 %v2747_v1 }
 0x326   :  { %v2947_v0 = vpop.f32.mrb[8].mxu0 }
 0x327   :  { %v2330_v25 = vpop.f32.mrb[9].mxu0 }
 0x32a   :  { %v2949_v26 = vpop.f32.mrb[8].mxu1 }
 0x32b   :  { %v1349_v63 = vrot.slane %v2949_v26, 7  ;;  %v2337_v2 = vpop.f32.mrb[9].mxu1 }
 0x32d   :  { %v1351_v3 = vsel %vm1350_vm3, %v1349_v63, %v2947_v0 }
 0x32e   :  { %v2954_v4 = vpop.f32.mrb[10].mxu0 }
 0x32f   :  { %v1352_v5 = vrot.slane %v2954_v4, 6  ;;  %v2344_v6 = vpop.f32.mrb[11].mxu0 }
 0x330   :  { %v1490_v6 = vld [vmem:[#allocation5 + $0x8] sm:$0xff] }
 0x331   :  { %v1354_v1 = vsel %vm1353_vm4, %v1352_v5, %v1351_v3 }
 0x332   :  { %v2958_v7 = vpop.f32.mrb[10].mxu1 }
 0x333   :  { %v1355_v8 = vrot.slane %v2958_v7, 5  ;;  %v2351_v9 = vpop.f32.mrb[11].mxu1 }
 0x335   :  { %v1357_v10 = vsel %vm1356_vm5, %v1355_v8, %v1354_v1  ;;  %v1494_v1 = vld [vmem:[#allocation5 + $0x28] sm:$0xff]  ;;  %v1492_v8 = vld [vmem:[#allocation5 + $0x18] sm:$0xff] }
 0x336   :  { %v2962_v11 = vpop.f32.mrb[12].mxu0  ;;  %v2428_v9 = vpack.c.bf16 %v1494_v1, %v1490_v6  ;;  %v1526_v6 = vld [vmem:[#allocation5 + $0x128] sm:$0xff]  ;;  %v1524_v1 = vld [vmem:[#allocation5 + $0x118] sm:$0xff] }
 0x337   :  { %v1358_v12 = vrot.slane %v2962_v11, 4  ;;  %v2965_v15 = vpop.f32.mrb[12].mxu1  ;;  %v2358_v16 = vpop.f32.mrb[13].mxu0 }
 0x338   :  { %v1361_v17 = vrot.slane %v2965_v15, 3  ;;  %v2365_v18 = vpop.f32.mrb[13].mxu1  ;;  %v1493_v16 = vld [vmem:[#allocation5 + $0x20] sm:$0xff]  ;;  %2429 = vmatprep.subr.bf16.mxu0 %v2428_v9 }
 0x339   :  { %v1360_v21 = vsel %vm1359_vm6, %v1358_v12, %v1357_v10  ;;  %v1496_v10 = vld [vmem:[#allocation5 + $0x38] sm:$0xff]  ;;  %v1489_v12 = vld [vmem:[#allocation5] sm:$0xff] }
 0x33a   :  { %v1363_v22 = vsel %vm1362_vm7, %v1361_v17, %v1360_v21  ;;  %v2460_v17 = vpack.c.bf16 %v1496_v10, %v1492_v8  ;;  %v2430_v18 = vpack.c.bf16 %v1493_v16, %v1489_v12  ;;  %v1491_v21 = vld [vmem:[#allocation5 + $0x10] sm:$0xff]  ;;  %v1528_v10 = vld [vmem:[#allocation5 + $0x138] sm:$0xff]  ;;  %v1521_v12 = vld [vmem:[#allocation5 + $0x100] sm:$0xff] }
 0x33b   :  { %v1525_v16 = vld [vmem:[#allocation5 + $0x120] sm:$0xff] }
 0x33c   :  { %2461 = vmatprep.subr.bf16.mxu1 %v2460_v17  ;;  %2431 = vmatpush1.bf16.msra.mxu0 %v2430_v18  ;;  %v2476_v17 = vpack.c.bf16 %v1528_v10, %v1524_v1  ;;  %v1523_v18 = vld [vmem:[#allocation5 + $0x110] sm:$0xff] }
 0x33e   :  { %v2970_v23 = vpop.f32.mrb[14].mxu0 }
 0x33f   :  { %v1364_v24 = vrot.slane %v2970_v23, 2  ;;  %v2973_v27 = vpop.f32.mrb[14].mxu1  ;;  %v2372_v28 = vpop.f32.mrb[15].mxu0 }
 0x340   :  { %v1367_v29 = vrot.slane %v2973_v27, 1  ;;  %v2379_v30 = vpop.f32.mrb[15].mxu1  ;;  %v1498_v28 = vld [vmem:[#allocation5 + $0x48] sm:$0xff] }
 0x341   :  { %v1366_v31 = vsel %vm1365_vm8, %v1364_v24, %v1363_v22  ;;  %v1495_v22 = vld [vmem:[#allocation5 + $0x30] sm:$0xff]  ;;  %v1500_v30 = vld [vmem:[#allocation5 + $0x58] sm:$0xff] }
 0x342   :  { %v1369_v32 = vsel %vm1368_vm9, %v1367_v29, %v1366_v31  ;;  %v2462_v24 = vpack.c.bf16 %v1495_v22, %v1491_v21  ;;  %v1502_v29 = vld [vmem:[#allocation5 + $0x68] sm:$0xff]  ;;  %v1527_v21 = vld [vmem:[#allocation5 + $0x130] sm:$0xff] }
 0x343   :  { %1371 = vadd.xlane.f32.xlu0 %v1369_v32  ;;  %v2432_v31 = vpack.c.bf16 %v1502_v29, %v1498_v28  ;;  %v1504_v32 = vld [vmem:[#allocation5 + $0x78] sm:$0xff]  ;;  %v1530_v22 = vld [vmem:[#allocation5 + $0x148] sm:$0xff] }
 0x344   :  { %2463 = vmatpush1.bf16.msra.mxu1 %v2462_v24  ;;  %v1534_v24 = vld [vmem:[#allocation5 + $0x168] sm:$0xff]  ;;  %v1532_v28 = vld [vmem:[#allocation5 + $0x158] sm:$0xff] }
 0x345   :  { %2433 = vmatprep.subr.bf16.mxu0 %v2432_v31  ;;  %v1536_v29 = vld [vmem:[#allocation5 + $0x178] sm:$0xff]  ;;  %v2478_v31 = vpack.c.bf16 %v1527_v21, %v1523_v18  ;;  %v2147_v18 = vld [vmem:[%s3125_s2] ss:$0 sm:$0xff] }
 0x3d0   :  { %v1372_v33 = vpop.xlane.xlu0 %1371 }
 0x3d1   :  { %v1374_v34 = vmul.f32 0.0078125, %v1372_v33  ;;  %v1497_v33 = vld [vmem:[#allocation5 + $0x40] sm:$0xff] }
 0x3d3   :  { %v1376_v35 = vrot.slane %v1374_v34, 1  ;;  %v1377_v36 = vrot.slane %v1374_v34, 2  ;;  %v1378_v37 = vrot.slane %v1374_v34, 3  ;;  %v1379_v38 = vrot.slane %v1374_v34, 4 }
 0x3d4   :  { %v1380_v39 = vrot.slane %v1374_v34, 5  ;;  %v1381_v40 = vrot.slane %v1374_v34, 6  ;;  %v1382_v41 = vrot.slane %v1374_v34, 7  ;;  %v2979_v42 = vsub.f32 %v2947_v0, %v1374_v34  ;;  %v1501_v34 = vld [vmem:[#allocation5 + $0x60] sm:$0xff] }
 0x3d5   :  { %v2982_v43 = vsub.f32 %v2949_v26, %v1376_v35  ;;  %v2985_v44 = vsub.f32 %v2954_v4, %v1377_v36  ;;  %v2988_v45 = vsub.f32 %v2958_v7, %v1378_v37  ;;  %v2991_v46 = vsub.f32 %v2962_v11, %v1379_v38  ;;  %v1499_v37 = vld [vmem:[#allocation5 + $0x50] sm:$0xff] }
 0x3d6   :  { %v2994_v47 = vsub.f32 %v2965_v15, %v1380_v39  ;;  %v2997_v48 = vsub.f32 %v2970_v23, %v1381_v40  ;;  %v3000_v49 = vsub.f32 %v2973_v27, %v1382_v41  ;;  %v1399_v54 = vmul.f32 %v2979_v42, %v2979_v42  ;;  %v1503_v38 = vld [vmem:[#allocation5 + $0x70] sm:$0xff]  ;;  %v1506_v39 = vld [vmem:[#allocation5 + $0x88] sm:$0xff] }
 0x3d7   :  { %v1400_v50 = vmul.f32 %v2982_v43, %v2982_v43  ;;  %v1401_v51 = vmul.f32 %v2985_v44, %v2985_v44  ;;  %v1402_v52 = vmul.f32 %v2988_v45, %v2988_v45  ;;  %v1403_v53 = vmul.f32 %v2991_v46, %v2991_v46  ;;  %v1510_v41 = vld [vmem:[#allocation5 + $0xa8] sm:$0xff] }
 0x3d8   :  { %v1404_v13 = vmul.f32 %v2994_v47, %v2994_v47  ;;  %v1405_v57 = vmul.f32 %v2997_v48, %v2997_v48  ;;  %v1406_v14 = vmul.f32 %v3000_v49, %v3000_v49  ;;  %v2464_v35 = vpack.c.bf16 %v1504_v32, %v1500_v30 }
 0x3d9   :  { %v1415_v55 = vrot.slane %v1400_v50, 7  ;;  %v1417_v56 = vrot.slane %v1401_v51, 6  ;;  %v1419_v19 = vrot.slane %v1402_v52, 5  ;;  %v1421_v20 = vrot.slane %v1403_v53, 4  ;;  %v1508_v50 = vld [vmem:[#allocation5 + $0x98] sm:$0xff] }
 0x3da   :  { %v1423_v61 = vrot.slane %v1404_v13, 3  ;;  %v1425_v25 = vrot.slane %v1405_v57, 2  ;;  %v1427_v2 = vrot.slane %v1406_v14, 1  ;;  %v2434_v36 = vpack.c.bf16 %v1501_v34, %v1497_v33  ;;  %v1512_v51 = vld [vmem:[#allocation5 + $0xb8] sm:$0xff]  ;;  %2465 = vmatprep.subr.bf16.mxu1 %v2464_v35  ;;  %v1509_v13 = vld [vmem:[#allocation5 + $0xa0] sm:$0xff]  ;;  %v1511_v57 = vld [vmem:[#allocation5 + $0xb0] sm:$0xff] }
 0x3db   :  { %v1416_v58 = vsel %vm1350_vm3, %v1415_v55, %v1399_v54  ;;  %v2466_v40 = vpack.c.bf16 %v1503_v38, %v1499_v37  ;;  %v2436_v52 = vpack.c.bf16 %v1510_v41, %v1506_v39  ;;  %v2468_v53 = vpack.c.bf16 %v1512_v51, %v1508_v50  ;;  %v1505_v54 = vld [vmem:[#allocation5 + $0x80] sm:$0xff]  ;;  %v1507_v55 = vld [vmem:[#allocation5 + $0x90] sm:$0xff]  ;;  %v1514_v14 = vld [vmem:[#allocation5 + $0xc8] sm:$0xff] }
 0x3dc   :  { %v1418_v59 = vsel %vm1353_vm4, %v1417_v56, %v1416_v58  ;;  %2435 = vmatpush1.bf16.msra.mxu0 %v2434_v36  ;;  %v2438_v56 = vpack.c.bf16 %v1509_v13, %v1505_v54  ;;  %v1518_v58 = vld [vmem:[#allocation5 + $0xe8] sm:$0xff]  ;;  %v2446_v30 = vpack.c.bf16 %v1525_v16, %v1521_v12  ;;  %v2448_v32 = vpack.c.bf16 %v1534_v24, %v1530_v22  ;;  %v1529_v33 = vld [vmem:[#allocation5 + $0x140] sm:$0xff]  ;;  %v1531_v35 = vld [vmem:[#allocation5 + $0x150] sm:$0xff] }
 0x3dd   :  { %v1420_v60 = vsel %vm1356_vm5, %v1419_v19, %v1418_v59  ;;  %2467 = vmatpush1.bf16.msra.mxu1 %v2466_v40  ;;  %2437 = vmatprep.subr.bf16.mxu0 %v2436_v52  ;;  %v2470_v19 = vpack.c.bf16 %v1511_v57, %v1507_v55  ;;  %v2440_v59 = vpack.c.bf16 %v1518_v58, %v1514_v14  ;;  %v1533_v34 = vld [vmem:[#allocation5 + $0x160] sm:$0xff]  ;;  %v1535_v37 = vld [vmem:[#allocation5 + $0x170] sm:$0xff]  ;;  %v1538_v38 = vld [vmem:[#allocation5 + $0x188] sm:$0xff] }
 0x3de   :  { %v1422_v62 = vsel %vm1359_vm6, %v1421_v20, %v1420_v60  ;;  %2469 = vmatprep.subr.bf16.mxu1 %v2468_v53  ;;  %v1516_v20 = vld [vmem:[#allocation5 + $0xd8] sm:$0xff]  ;;  %v2480_v36 = vpack.c.bf16 %v1536_v29, %v1532_v28  ;;  %v1542_v39 = vld [vmem:[#allocation5 + $0x1a8] sm:$0xff]  ;;  %v2450_v50 = vpack.c.bf16 %v1533_v34, %v1529_v33  ;;  %v2482_v51 = vpack.c.bf16 %v1535_v37, %v1531_v35  ;;  %v1537_v53 = vld [vmem:[#allocation5 + $0x180] sm:$0xff] }
 0x3df   :  { %v1424_v63 = vsel %vm1362_vm7, %v1423_v61, %v1422_v62  ;;  %v1520_v60 = vld [vmem:[#allocation5 + $0xf8] sm:$0xff]  ;;  %v1513_v61 = vld [vmem:[#allocation5 + $0xc0] sm:$0xff]  ;;  %v2452_v52 = vpack.c.bf16 %v1542_v39, %v1538_v38  ;;  %v1539_v13 = vld [vmem:[#allocation5 + $0x190] sm:$0xff] }
 0x3e0   :  { %v1426_v3 = vsel %vm1365_vm8, %v1425_v25, %v1424_v63  ;;  %v2472_v62 = vpack.c.bf16 %v1520_v60, %v1516_v20  ;;  %v1517_v25 = vld [vmem:[#allocation5 + $0xe0] sm:$0xff]  ;;  %v1515_v63 = vld [vmem:[#allocation5 + $0xd0] sm:$0xff]  ;;  %2439 = vmatpush1.bf16.msra.mxu0 %v2438_v56  ;;  %v1540_v40 = vld [vmem:[#allocation5 + $0x198] sm:$0xff] }
 0x3e1   :  { %v1428_v5 = vsel %vm1368_vm9, %v1427_v2, %v1426_v3  ;;  %v1519_v2 = vld [vmem:[#allocation5 + $0xf0] sm:$0xff]  ;;  %v2442_v3 = vpack.c.bf16 %v1517_v25, %v1513_v61  ;;  %2471 = vmatpush1.bf16.msra.mxu1 %v2470_v19  ;;  %2441 = vmatprep.subr.bf16.mxu0 %v2440_v59  ;;  %v1544_v41 = vld [vmem:[#allocation5 + $0x1b8] sm:$0xff]  ;;  %v1541_v54 = vld [vmem:[#allocation5 + $0x1a0] sm:$0xff] }
 0x3e2   :  { %1430 = vadd.xlane.f32.xlu1 %v1428_v5  ;;  %v1522_v5 = vld [vmem:[#allocation5 + $0x108] sm:$0xff]  ;;  %v2474_v8 = vpack.c.bf16 %v1519_v2, %v1515_v63  ;;  %2473 = vmatprep.subr.bf16.mxu1 %v2472_v62  ;;  %v2484_v55 = vpack.c.bf16 %v1544_v41, %v1540_v40  ;;  %v1543_v56 = vld [vmem:[#allocation5 + $0x1b0] sm:$0xff]  ;;  %v1548_v58 = vld [vmem:[#allocation5 + $0x1d8] sm:$0xff]  ;;  %v2454_v59 = vpack.c.bf16 %v1541_v54, %v1537_v53 }
 0x3e3   :  { %v2444_v9 = vpack.c.bf16 %v1526_v6, %v1522_v5  ;;  %v1546_v57 = vld [vmem:[#allocation5 + $0x1c8] sm:$0xff]  ;;  %v1552_v19 = vld [vmem:[#allocation5 + $0x1f8] sm:$0xff]  ;;  %v2486_v20 = vpack.c.bf16 %v1543_v56, %v1539_v13  ;;  %v1545_v61 = vld [vmem:[#allocation5 + $0x1c0] sm:$0xff] }
 0x3e4   :  { %2443 = vmatpush1.bf16.msra.mxu0 %v2442_v3  ;;  %v1550_v14 = vld [vmem:[#allocation5 + $0x1e8] sm:$0xff]  ;;  %v1549_v62 = vld [vmem:[#allocation5 + $0x1e0] sm:$0xff]  ;;  %v2488_v25 = vpack.c.bf16 %v1552_v19, %v1548_v58  ;;  %v1547_v63 = vld [vmem:[#allocation5 + $0x1d0] sm:$0xff] }
 0x3e5   :  { %2475 = vmatpush1.bf16.msra.mxu1 %v2474_v8  ;;  %2445 = vmatprep.subr.bf16.mxu0 %v2444_v9  ;;  %v2456_v60 = vpack.c.bf16 %v1550_v14, %v1546_v57  ;;  %v1551_v2 = vld [vmem:[#allocation5 + $0x1f0] sm:$0xff]  ;;  %v2458_v3 = vpack.c.bf16 %v1549_v62, %v1545_v61 }
 0x3e6   :  { %2477 = vmatprep.subr.bf16.mxu1 %v2476_v17  ;;  %v2490_v5 = vpack.c.bf16 %v1551_v2, %v1547_v63  ;;  %v1865_v63 = vld [vmem:[#allocation7 + $0x88] sm:$0xff]  ;;  %v1896_v2 = vld [vmem:[#allocation7 + $0x180] sm:$0xff] }
 0x3e8   :  { %2447 = vmatpush1.bf16.msra.mxu0 %v2446_v30 }
 0x3e9   :  { %2479 = vmatpush1.bf16.msra.mxu1 %v2478_v31  ;;  %2449 = vmatprep.subr.bf16.mxu0 %v2448_v32 }
 0x3ea   :  { %2481 = vmatprep.subr.bf16.mxu1 %v2480_v36 }
 0x3ec   :  { %2451 = vmatpush1.bf16.msra.mxu0 %v2450_v50 }
 0x3ed   :  { %2483 = vmatpush1.bf16.msra.mxu1 %v2482_v51  ;;  %2453 = vmatprep.subr.bf16.mxu0 %v2452_v52 }
 0x3ee   :  { %2485 = vmatprep.subr.bf16.mxu1 %v2484_v55 }
 0x3f0   :  { %2455 = vmatpush1.bf16.msra.mxu0 %v2454_v59 }
 0x3f1   :  { %2487 = vmatpush1.bf16.msra.mxu1 %v2486_v20  ;;  %2457 = vmatprep.subr.bf16.mxu0 %v2456_v60 }
 0x3f2   :  { %2489 = vmatprep.subr.bf16.mxu1 %v2488_v25  ;;  %v1864_v25 = vld [vmem:[#allocation7 + $0x80] sm:$0xff] }
 0x3f4   :  { %2459 = vmatpush1.bf16.msra.mxu0 %v2458_v3  ;;  %v2492_v3 = vpack.c.bf16 %v1865_v63, %v1864_v25  ;;  %v1888_v63 = vld [vmem:[#allocation7 + $0x140] sm:$0xff] }
 0x3f5   :  { %2491 = vmatpush1.bf16.msra.mxu1 %v2490_v5  ;;  %v1897_v5 = vld [vmem:[#allocation7 + $0x188] sm:$0xff] }
 0x3f6   :  { %2493 = vmatprep.subr.bf16.mxu0 %v2492_v3 }
 0x46f   :  { %v1431_v6 = vpop.xlane.xlu1 %1430 }
 0x470   :  { %v1432_v1 = vmul.f32 0.0078125, %v1431_v6  ;;  %v1848_v6 = vld [vmem:[#allocation7] sm:$0xff] }
 0x472   :  { %v1433_v8 = vadd.f32 1e-06, %v1432_v1  ;;  %v1849_v1 = vld [vmem:[#allocation7 + $0x8] sm:$0xff] }
 0x474   :  { %2602 = vrsqrt.f32 %v1433_v8  ;;  %v2524_v8 = vpack.c.bf16 %v1897_v5, %v1896_v2  ;;  %v1889_v2 = vld [vmem:[#allocation7 + $0x148] sm:$0xff]  ;;  %v1874_v5 = vld [vmem:[#allocation7 + $0xd0] sm:$0xff] }
 0x475   :  { %v2542_v3 = vpack.c.bf16 %v1889_v2, %v1888_v63 }
 0x476   :  { %2525 = vmatprep.subr.bf16.mxu1 %v2524_v8 }
 0x47e   :  { %v2603_v9 = vpop.eup %2602 }
 0x47f   :  { %v1436_v10 = vrot.slane %v2603_v9, 1  ;;  %v1437_v12 = vrot.slane %v2603_v9, 2  ;;  %v1438_v16 = vrot.slane %v2603_v9, 3  ;;  %v1439_v17 = vrot.slane %v2603_v9, 4 }
 0x480   :  { %v1440_v21 = vrot.slane %v2603_v9, 5  ;;  %v1441_v22 = vrot.slane %v2603_v9, 6  ;;  %v1442_v24 = vrot.slane %v2603_v9, 7  ;;  %v1451_v28 = vmul.f32 %v2603_v9, %v2979_v42 }
 0x481   :  { %v1452_v29 = vmul.f32 %v1436_v10, %v2982_v43  ;;  %v1453_v30 = vmul.f32 %v1437_v12, %v2985_v44  ;;  %v1454_v31 = vmul.f32 %v1438_v16, %v2988_v45  ;;  %v1455_v32 = vmul.f32 %v1439_v17, %v2991_v46  ;;  %v2148_v43 = vld [vmem:[%s3126_s3] ss:$0 sm:$0xff]  ;;  %v1881_v12 = vld [vmem:[#allocation7 + $0x108] sm:$0xff]  ;;  %v1866_v17 = vld [vmem:[#allocation7 + $0x90] sm:$0xff] }
 0x482   :  { %v1456_v33 = vmul.f32 %v1440_v21, %v2994_v47  ;;  %v1457_v34 = vmul.f32 %v1441_v22, %v2997_v48  ;;  %v1458_v35 = vmul.f32 %v1442_v24, %v3000_v49  ;;  %v1466_v36 = vmul.f32 %v2147_v18, %v1451_v28  ;;  %v1880_v10 = vld [vmem:[#allocation7 + $0x100] sm:$0xff]  ;;  %v1898_v21 = vld [vmem:[#allocation7 + $0x190] sm:$0xff]  ;;  %v1899_v24 = vld [vmem:[#allocation7 + $0x198] sm:$0xff] }
 0x483   :  { %v1467_v37 = vmul.f32 %v2147_v18, %v1452_v29  ;;  %v1468_v38 = vmul.f32 %v2147_v18, %v1453_v30  ;;  %v1469_v39 = vmul.f32 %v2147_v18, %v1454_v31  ;;  %v1470_v40 = vmul.f32 %v2147_v18, %v1455_v32  ;;  %v1850_v28 = vld [vmem:[#allocation7 + $0x10] sm:$0xff]  ;;  %v1851_v29 = vld [vmem:[#allocation7 + $0x18] sm:$0xff] }
 0x484   :  { %v1471_v42 = vmul.f32 %v2147_v18, %v1456_v33  ;;  %v1472_v41 = vmul.f32 %v2147_v18, %v1457_v34  ;;  %v1473_v44 = vmul.f32 %v2147_v18, %v1458_v35  ;;  %v1481_v51 = vadd.f32 %v2148_v43, %v1466_v36  ;;  %v1867_v18 = vld [vmem:[#allocation7 + $0x98] sm:$0xff]  ;;  %v1882_v32 = vld [vmem:[#allocation7 + $0x110] sm:$0xff]  ;;  %v1868_v35 = vld [vmem:[#allocation7 + $0xa0] sm:$0xff] }
 0x485   :  { %v1482_v45 = vadd.f32 %v2148_v43, %v1467_v37  ;;  %v1483_v46 = vadd.f32 %v2148_v43, %v1468_v38  ;;  %v1484_v50 = vadd.f32 %v2148_v43, %v1469_v39  ;;  %v1485_v47 = vadd.f32 %v2148_v43, %v1470_v40  ;;  %v1883_v33 = vld [vmem:[#allocation7 + $0x118] sm:$0xff]  ;;  %v1869_v36 = vld [vmem:[#allocation7 + $0xa8] sm:$0xff]  ;;  %v1900_v37 = vld [vmem:[#allocation7 + $0x1a0] sm:$0xff] }
 0x486   :  { %v1486_v48 = vadd.f32 %v2148_v43, %v1471_v42  ;;  %v1487_v53 = vadd.f32 %v2148_v43, %v1472_v41  ;;  %v1488_v54 = vadd.f32 %v2148_v43, %v1473_v44  ;;  %v2494_v9 = vpack.c.bf16 %v1849_v1, %v1848_v6  ;;  %v1901_v39 = vld [vmem:[#allocation7 + $0x1a8] sm:$0xff]  ;;  %v1852_v40 = vld [vmem:[#allocation7 + $0x20] sm:$0xff]  ;;  %v1875_v6 = vld [vmem:[#allocation7 + $0xd8] sm:$0xff] }
 0x487   :  { %v1583_v52 = vrot.slane %v1482_v45, 7  ;;  %v1585_v49 = vrot.slane %v1483_v46, 6  ;;  %v1587_v55 = vrot.slane %v1484_v50, 5  ;;  %v1589_v57 = vrot.slane %v1485_v47, 4  ;;  %v1853_v42 = vld [vmem:[#allocation7 + $0x28] sm:$0xff]  ;;  %v1884_v44 = vld [vmem:[#allocation7 + $0x120] sm:$0xff] }
 0x488   :  { %v1591_v58 = vrot.slane %v1486_v48, 3  ;;  %v1593_v59 = vrot.slane %v1487_v53, 2  ;;  %v1595_v60 = vrot.slane %v1488_v54, 1  ;;  %v2526_v16 = vpack.c.bf16 %v1881_v12, %v1880_v10  ;;  %v1885_v45 = vld [vmem:[#allocation7 + $0x128] sm:$0xff]  ;;  %v1870_v50 = vld [vmem:[#allocation7 + $0xb0] sm:$0xff]  ;;  %v1871_v47 = vld [vmem:[#allocation7 + $0xb8] sm:$0xff] }
 0x489   :  { %v1584_v13 = vsel %vm1350_vm3, %v1583_v52, %v1481_v51  ;;  %v2496_v22 = vpack.c.bf16 %v1867_v18, %v1866_v17  ;;  %v2528_v30 = vpack.c.bf16 %v1899_v24, %v1898_v21  ;;  %v2498_v31 = vpack.c.bf16 %v1851_v29, %v1850_v28  ;;  %v1902_v51 = vld [vmem:[#allocation7 + $0x1b0] sm:$0xff]  ;;  %v1903_v52 = vld [vmem:[#allocation7 + $0x1b8] sm:$0xff]  ;;  %v1876_v24 = vld [vmem:[#allocation7 + $0xe0] sm:$0xff] }
 0x48a   :  { %v1586_v56 = vsel %vm1353_vm4, %v1585_v49, %v1584_v13  ;;  %v2530_v34 = vpack.c.bf16 %v1883_v33, %v1882_v32  ;;  %v2500_v38 = vpack.c.bf16 %v1869_v36, %v1868_v35  ;;  %v2532_v41 = vpack.c.bf16 %v1901_v39, %v1900_v37  ;;  %v1854_v49 = vld [vmem:[#allocation7 + $0x30] sm:$0xff]  ;;  %v1855_v53 = vld [vmem:[#allocation7 + $0x38] sm:$0xff]  ;;  %v1877_v28 = vld [vmem:[#allocation7 + $0xe8] sm:$0xff] }
 0x48b   :  { %v1588_v14 = vsel %vm1356_vm5, %v1587_v55, %v1586_v56  ;;  %v2502_v43 = vpack.c.bf16 %v1853_v42, %v1852_v40  ;;  %v2534_v46 = vpack.c.bf16 %v1885_v45, %v1884_v44  ;;  %v2504_v48 = vpack.c.bf16 %v1871_v47, %v1870_v50  ;;  %v1886_v55 = vld [vmem:[#allocation7 + $0x130] sm:$0xff]  ;;  %v1887_v56 = vld [vmem:[#allocation7 + $0x138] sm:$0xff]  ;;  %v1908_v29 = vld [vmem:[#allocation7 + $0x1e0] sm:$0xff] }
 0x48c   :  { %v1590_v19 = vsel %vm1359_vm6, %v1589_v57, %v1588_v14  ;;  %v2536_v54 = vpack.c.bf16 %v1903_v52, %v1902_v51  ;;  %v2506_v13 = vpack.c.bf16 %v1855_v53, %v1854_v49  ;;  %v2538_v57 = vpack.c.bf16 %v1887_v56, %v1886_v55  ;;  %v1872_v14 = vld [vmem:[#allocation7 + $0xc0] sm:$0xff]  ;;  %v1906_v1 = vld [vmem:[#allocation7 + $0x1d0] sm:$0xff]  ;;  %v1859_v12 = vld [vmem:[#allocation7 + $0x58] sm:$0xff] }
 0x48d   :  { %v1592_v20 = vsel %vm1362_vm7, %v1591_v58, %v1590_v19  ;;  %v1873_v58 = vld [vmem:[#allocation7 + $0xc8] sm:$0xff]  ;;  %v1904_v19 = vld [vmem:[#allocation7 + $0x1c0] sm:$0xff]  ;;  %v2512_v8 = vpack.c.bf16 %v1875_v6, %v1874_v5  ;;  %v1858_v10 = vld [vmem:[#allocation7 + $0x50] sm:$0xff]  ;;  %v1555_v52 = vlaneseq }
 0x48e   :  { %v1594_v61 = vsel %vm1365_vm8, %v1593_v59, %v1592_v20  ;;  %v2508_v59 = vpack.c.bf16 %v1873_v58, %v1872_v14  ;;  %v1905_v20 = vld [vmem:[#allocation7 + $0x1c8] sm:$0xff]  ;;  %v2514_v17 = vpack.c.bf16 %v1859_v12, %v1858_v10  ;;  %v1890_v18 = vld [vmem:[#allocation7 + $0x150] sm:$0xff]  ;;  %v1891_v21 = vld [vmem:[#allocation7 + $0x158] sm:$0xff] }
 0x48f   :  { %v1596_v62 = vsel %vm1368_vm9, %v1595_v60, %v1594_v61  ;;  %v1856_v60 = vld [vmem:[#allocation7 + $0x40] sm:$0xff]  ;;  %v1857_v61 = vld [vmem:[#allocation7 + $0x48] sm:$0xff]  ;;  %v1878_v39 = vld [vmem:[#allocation7 + $0xf0] sm:$0xff]  ;;  %v1556_v49 = vshrl.u32 %v1555_v52, 7 }
 0x490   :  { %1663 = vmatmul.mubr.f32.vlgmr.msra.gmra.mrb[16].mxu0 %v1596_v62  ;;  %1734 = vmatmul.mubr.f32.vlgmr.msra.gmra.mrb[16].mxu1 %v1596_v62  ;;  %v2540_v62 = vpack.c.bf16 %v1905_v20, %v1904_v19  ;;  %v2510_v25 = vpack.c.bf16 %v1857_v61, %v1856_v60  ;;  %v1860_v32 = vld [vmem:[#allocation7 + $0x60] sm:$0xff]  ;;  %v1861_v33 = vld [vmem:[#allocation7 + $0x68] sm:$0xff]  ;;  %v1879_v40 = vld [vmem:[#allocation7 + $0xf8] sm:$0xff] }
 0x491   :  { %2495 = vmatpush3.bf16.msra.mxu0 %v2494_v9  ;;  %2527 = vmatpush3.bf16.msra.mxu1 %v2526_v16  ;;  %v1907_v9 = vld [vmem:[#allocation7 + $0x1d8] sm:$0xff]  ;;  %v2518_v35 = vpack.c.bf16 %v1861_v33, %v1860_v32  ;;  %v1892_v36 = vld [vmem:[#allocation7 + $0x160] sm:$0xff]  ;;  %v1893_v37 = vld [vmem:[#allocation7 + $0x168] sm:$0xff]  ;;  %v1557_v53 = vsub.s32 0, %v1556_v49  ;;  %v1561_v55 = vsub.s32 1, %v1556_v49  ;;  %v1569_v56 = vsub.s32 3, %v1556_v49 }
 0x492   :  { %2497 = vmatprep.subr.bf16.mxu0 %v2496_v22  ;;  %2529 = vmatprep.subr.bf16.mxu1 %v2528_v30  ;;  %v2544_v16 = vpack.c.bf16 %v1907_v9, %v1906_v1  ;;  %v2546_v22 = vpack.c.bf16 %v1891_v21, %v1890_v18  ;;  %v2516_v30 = vpack.c.bf16 %v1877_v28, %v1876_v24  ;;  %v1910_v42 = vld [vmem:[#allocation7 + $0x1f0] sm:$0xff]  ;;  %v1863_v45 = vld [vmem:[#allocation7 + $0x78] sm:$0xff] }
 0x493   :  { %v1862_v44 = vld [vmem:[#allocation7 + $0x70] sm:$0xff]  ;;  %v1895_v51 = vld [vmem:[#allocation7 + $0x178] sm:$0xff] }
 0x494   :  { %v2522_v50 = vpack.c.bf16 %v1863_v45, %v1862_v44  ;;  %v1894_v47 = vld [vmem:[#allocation7 + $0x170] sm:$0xff] }
 0x495   :  { %2499 = vmatpush3.bf16.msra.mxu0 %v2498_v31  ;;  %2531 = vmatpush3.bf16.msra.mxu1 %v2530_v34  ;;  %v1909_v31 = vld [vmem:[#allocation7 + $0x1e8] sm:$0xff] }
 0x496   :  { %2501 = vmatprep.subr.bf16.mxu0 %v2500_v38  ;;  %2533 = vmatprep.subr.bf16.mxu1 %v2532_v41  ;;  %v2548_v34 = vpack.c.bf16 %v1909_v31, %v1908_v29  ;;  %v2550_v38 = vpack.c.bf16 %v1893_v37, %v1892_v36  ;;  %v2520_v41 = vpack.c.bf16 %v1879_v40, %v1878_v39 }
 0x499   :  { %2503 = vmatpush3.bf16.msra.mxu0 %v2502_v43  ;;  %2535 = vmatpush3.bf16.msra.mxu1 %v2534_v46  ;;  %v1911_v43 = vld [vmem:[#allocation7 + $0x1f8] sm:$0xff] }
 0x49a   :  { %2505 = vmatprep.subr.bf16.mxu0 %v2504_v48  ;;  %2537 = vmatprep.subr.bf16.mxu1 %v2536_v54  ;;  %v2552_v46 = vpack.c.bf16 %v1911_v43, %v1910_v42  ;;  %v2554_v48 = vpack.c.bf16 %v1895_v51, %v1894_v47  ;;  %v1565_v54 = vsub.s32 2, %v1556_v49 }
 0x49d   :  { %2507 = vmatpush3.bf16.msra.mxu0 %v2506_v13  ;;  %2539 = vmatpush3.bf16.msra.mxu1 %v2538_v57  ;;  %v1553_v13 = vld [vmem:[%s3128_s5] sm:$0xf]  ;;  %s2748_s5 = smov [#allocation9]  }
 0x49e   :  { %2509 = vmatprep.subr.bf16.mxu0 %v2508_v59  ;;  %2541 = vmatprep.subr.bf16.mxu1 %v2540_v62  ;;  %v1558_v57 = vrot.slane %v1553_v13, %v1557_v53  ;;  %v1566_v14 = vrot.slane %v1553_v13, %v1565_v54  ;;  %v1562_v58 = vrot.slane %v1553_v13, %v1561_v55  ;;  %s2122_s30 = sshll.u32 %s2748_s5, 4  ;;  %s2123_s30 = int_to_ptr.vmem [resolvable:$true] %s2122_s30 }
 0x49f   :  { %v1570_v19 = vrot.slane %v1553_v13, %v1569_v56  ;;  %s2686_s11 = scalar_lea.vmem %s2123_s30, 128  ;;  %p2691_p11 = scmp.lt.s32.totalorder %s2123_s30, %s2123_s30 }
 0x4a0   :  { %p2687_p10 = scmp.ne.s32.totalorder %s2123_s30, %s2686_s11  ;;  %p2692_p12 = scmp.lt.s32.totalorder %s2686_s11, %s2686_s11 }
 0x4a1   :  { %2511 = vmatpush3.bf16.msra.mxu0 %v2510_v25  ;;  %2543 = vmatpush3.bf16.msra.mxu1 %v2542_v3 }
 0x4a2   :  { %2513 = vmatprep.subr.bf16.mxu0 %v2512_v8  ;;  %2545 = vmatprep.subr.bf16.mxu1 %v2544_v16  ;;  %p2693_p13 = por %p2692_p12, %p2691_p11 }
 0x4a4   :  { %p2694_p0 = pnand %p2693_p13, %p2687_p10 }
 0x4a5   :  { %2515 = vmatpush3.bf16.msra.mxu0 %v2514_v17  ;;  %2547 = vmatpush3.bf16.msra.mxu1 %v2546_v22 }
 0x4a6   :  { %2517 = vmatprep.subr.bf16.mxu0 %v2516_v30  ;;  %2549 = vmatprep.subr.bf16.mxu1 %v2548_v34 }
 0x4a9   :  { %2519 = vmatpush3.bf16.msra.mxu0 %v2518_v35  ;;  %2551 = vmatpush3.bf16.msra.mxu1 %v2550_v38 }
 0x4aa   :  { %2521 = vmatprep.subr.bf16.mxu0 %v2520_v41  ;;  %2553 = vmatprep.subr.bf16.mxu1 %v2552_v46 }
 0x4ad   :  { %2523 = vmatpush3.bf16.msra.mxu0 %v2522_v50  ;;  %2555 = vmatpush3.bf16.msra.mxu1 %v2554_v48 }
 0x563   :  { %v1664_v59 = vpop.f32.mrb[16].mxu0  ;;  %v1735_v20 = vpop.f32.mrb[16].mxu1 }
 0x564   :  { %v3049_v60 = vadd.f32 %v1664_v59, %v1558_v57  ;;  %v3051_v61 = vadd.f32 %v1735_v20, %v1566_v14  ;;  %v1666_v62 = vpop.f32.mrb[17].mxu0  ;;  %v1737_v25 = vpop.f32.mrb[17].mxu1 }
 0x565   :  { %v3053_v63 = vadd.f32 %v1666_v62, %v1562_v58  ;;  %v3055_v2 = vadd.f32 %v1737_v25, %v1570_v19 }
 0x566   :  { %v3058_v3 = vmul.f32 0.70710677, %v3049_v60  ;;  %v3061_v5 = vmul.f32 0.70710677, %v3051_v61 }
 0x567   :  { %v3064_v6 = vmul.f32 0.70710677, %v3053_v63  ;;  %v3067_v1 = vmul.f32 0.70710677, %v3055_v2 }
 0x568   :  { %v1748_v8 = vand.u32 2147483647, %v3058_v3  ;;  %v1750_v9 = vand.u32 2147483647, %v3061_v5  ;;  %vm1828_vm10 = vcmp.ge.f32.partialorder %v3058_v3, 0.0  ;;  %vm1830_vm11 = vcmp.ge.f32.partialorder %v3061_v5, 0.0 }
 0x569   :  { %v1749_v10 = vand.u32 2147483647, %v3064_v6  ;;  %v1751_v12 = vand.u32 2147483647, %v3067_v1  ;;  %vm1829_vm12 = vcmp.ge.f32.partialorder %v3064_v6, 0.0  ;;  %vm1831_vm13 = vcmp.ge.f32.partialorder %v3067_v1, 0.0 }
 0x56a   :  { %v1752_v16 = vmul.f32 0.3275911, %v1748_v8  ;;  %v1754_v17 = vmul.f32 0.3275911, %v1750_v9  ;;  %v1804_v30 = vsub.f32 0.0, %v1748_v8  ;;  %v1806_v31 = vsub.f32 0.0, %v1750_v9 }
 0x56b   :  { %v1753_v18 = vmul.f32 0.3275911, %v1749_v10  ;;  %v1755_v24 = vmul.f32 0.3275911, %v1751_v12  ;;  %v1805_v34 = vsub.f32 0.0, %v1749_v10  ;;  %v1807_v39 = vsub.f32 0.0, %v1751_v12 }
 0x56c   :  { %v1756_v21 = vadd.f32 1.0, %v1752_v16  ;;  %v1758_v22 = vadd.f32 1.0, %v1754_v17  ;;  %v1808_v33 = vmul.f32 %v1804_v30, %v1748_v8  ;;  %v1810_v37 = vmul.f32 %v1806_v31, %v1750_v9 }
 0x56d   :  { %v1757_v28 = vadd.f32 1.0, %v1753_v18  ;;  %v1759_v29 = vadd.f32 1.0, %v1755_v24  ;;  %v1809_v44 = vmul.f32 %v1805_v34, %v1749_v10  ;;  %v1811_v48 = vmul.f32 %v1807_v39, %v1751_v12 }
 0x56e   :  { %2604 = vrcp.f32 %v1756_v21  ;;  %v1812_v41 = vmul.f32 1.442695, %v1808_v33  ;;  %v1816_v46 = vmul.f32 1.442695, %v1810_v37  ;;  %v1740_v3 = vmul.f32 0.5, %v3049_v60 }
 0x56f   :  { %2606 = vrcp.f32 %v1758_v22  ;;  %v1814_v13 = vmul.f32 1.442695, %v1809_v44  ;;  %v1818_v58 = vmul.f32 1.442695, %v1811_v48 }
 0x570   :  { %2608 = vrcp.f32 %v1757_v28 }
 0x571   :  { %2610 = vrcp.f32 %v1759_v29 }
 0x572   :  { %2612 = vpow2.f32 %v1812_v41 }
 0x573   :  { %2614 = vpow2.f32 %v1816_v46 }
 0x574   :  { %2616 = vpow2.f32 %v1814_v13  ;;  %v1741_v13 = vmul.f32 0.5, %v3053_v63 }
 0x575   :  { %2618 = vpow2.f32 %v1818_v58 }
 0x578   :  { %v2605_v32 = vpop.eup %2604 }
 0x579   :  { %v2607_v35 = vpop.eup %2606  ;;  %v1768_v36 = vmul.f32 1.0614054, %v2605_v32 }
 0x57a   :  { %v1770_v38 = vmul.f32 1.0614054, %v2607_v35  ;;  %v2609_v42 = vpop.eup %2608 }
 0x57b   :  { %v1772_v40 = vadd.f32 -1.4531521, %v1768_v36  ;;  %v1769_v50 = vmul.f32 1.0614054, %v2609_v42  ;;  %v2611_v47 = vpop.eup %2610 }
 0x57c   :  { %v1774_v43 = vadd.f32 -1.4531521, %v1770_v38  ;;  %v1771_v53 = vmul.f32 1.0614054, %v2611_v47  ;;  %v2613_v28 = vpop.eup %2612 }
 0x57d   :  { %v1776_v45 = vmul.f32 %v2605_v32, %v1772_v40  ;;  %v1773_v49 = vadd.f32 -1.4531521, %v1769_v50  ;;  %v2615_v30 = vpop.eup %2614 }
 0x57e   :  { %v1778_v51 = vmul.f32 %v2607_v35, %v1774_v43  ;;  %v1775_v57 = vadd.f32 -1.4531521, %v1771_v53  ;;  %v2617_v40 = vpop.eup %2616 }
 0x57f   :  { %v1780_v52 = vadd.f32 1.4214138, %v1776_v45  ;;  %v1777_v56 = vmul.f32 %v2609_v42, %v1773_v49  ;;  %v2619_v46 = vpop.eup %2618 }
 0x580   :  { %v1782_v54 = vadd.f32 1.4214138, %v1778_v51  ;;  %v1779_v20 = vmul.f32 %v2611_v47, %v1775_v57  ;;  %v1743_v57 = vmul.f32 0.5, %v3055_v2 }
 0x581   :  { %v1784_v55 = vmul.f32 %v2605_v32, %v1780_v52  ;;  %v1781_v59 = vadd.f32 1.4214138, %v1777_v56 }
 0x582   :  { %v1786_v14 = vmul.f32 %v2607_v35, %v1782_v54  ;;  %v1783_v9 = vadd.f32 1.4214138, %v1779_v20 }
 0x583   :  { %v1788_v19 = vadd.f32 -0.28449672, %v1784_v55  ;;  %v1785_v8 = vmul.f32 %v2609_v42, %v1781_v59 }
 0x584   :  { %v1790_v62 = vadd.f32 -0.28449672, %v1786_v14  ;;  %v1787_v17 = vmul.f32 %v2611_v47, %v1783_v9 }
 0x585   :  { %v1792_v25 = vmul.f32 %v2605_v32, %v1788_v19  ;;  %v1789_v16 = vadd.f32 -0.28449672, %v1785_v8  ;;  %v1742_v19 = vmul.f32 0.5, %v3051_v61 }
 0x586   :  { %v1794_v10 = vmul.f32 %v2607_v35, %v1790_v62  ;;  %v1791_v24 = vadd.f32 -0.28449672, %v1787_v17 }
 0x587   :  { %v1796_v12 = vadd.f32 0.2548296, %v1792_v25  ;;  %v1793_v22 = vmul.f32 %v2609_v42, %v1789_v16 }
 0x588   :  { %v1798_v18 = vadd.f32 0.2548296, %v1794_v10  ;;  %v1795_v34 = vmul.f32 %v2611_v47, %v1791_v24 }
 0x589   :  { %v1800_v21 = vmul.f32 %v2605_v32, %v1796_v12  ;;  %v1797_v33 = vadd.f32 0.2548296, %v1793_v22 }
 0x58a   :  { %v1802_v29 = vmul.f32 %v2607_v35, %v1798_v18  ;;  %v1799_v39 = vadd.f32 0.2548296, %v1795_v34 }
 0x58b   :  { %v1820_v31 = vmul.f32 %v2613_v28, %v1800_v21  ;;  %v1801_v38 = vmul.f32 %v2609_v42, %v1797_v33 }
 0x58c   :  { %v1822_v36 = vmul.f32 %v2615_v30, %v1802_v29  ;;  %v1803_v45 = vmul.f32 %v2611_v47, %v1799_v39 }
 0x58d   :  { %v1824_v37 = vsub.f32 1.0, %v1820_v31  ;;  %v1821_v44 = vmul.f32 %v2617_v40, %v1801_v38 }
 0x58e   :  { %v1826_v41 = vsub.f32 1.0, %v1822_v36  ;;  %v1823_v51 = vmul.f32 %v2619_v46, %v1803_v45 }
 0x58f   :  { %v1832_v43 = vsub.f32 0.0, %v1824_v37  ;;  %v1825_v32 = vsub.f32 1.0, %v1821_v44 }
 0x590   :  { %v1834_v50 = vsub.f32 0.0, %v1826_v41  ;;  %v1827_v52 = vsub.f32 1.0, %v1823_v51 }
 0x591   :  { %v1836_v35 = vsel %vm1828_vm10, %v1824_v37, %v1832_v43  ;;  %v1833_v48 = vsub.f32 0.0, %v1825_v32 }
 0x592   :  { %v1838_v49 = vsel %vm1830_vm11, %v1826_v41, %v1834_v50  ;;  %v1840_v42 = vadd.f32 1.0, %v1836_v35  ;;  %v1835_v54 = vsub.f32 0.0, %v1827_v52 }
 0x593   :  { %v1837_v53 = vsel %vm1829_vm12, %v1825_v32, %v1833_v48  ;;  %v1842_v55 = vadd.f32 1.0, %v1838_v49 }
 0x594   :  { %v1841_v47 = vadd.f32 1.0, %v1837_v53  ;;  %v1839_v56 = vsel %vm1831_vm13, %v1827_v52, %v1835_v54  ;;  %v1844_v58 = vmul.f32 %v1840_v42, %v1740_v3 }
 0x595   :  { %v1843_v14 = vadd.f32 1.0, %v1839_v56  ;;  %v1846_v59 = vmul.f32 %v1842_v55, %v1742_v19 }
 0x596   :  { %v1845_v5 = vmul.f32 %v1841_v47, %v1741_v13 }
 0x597   :  { %v1847_v6 = vmul.f32 %v1843_v14, %v1743_v57 }
 0x598   :  { %1983 = vmatprep.mubr.f32.mxu0 %v1845_v5 }
 0x599   :  { %1984 = vmatmul.mubr.f32.vlgmr.msra.gmra.mrb[18].mxu0 %v1844_v58  ;;  %2053 = vmatprep.mubr.f32.mxu1 %v1847_v6 }
 0x59a   :  { %2054 = vmatmul.mubr.f32.vlgmr.msra.gmra.mrb[18].mxu1 %v1846_v59 }
 0x59b   :  { %2697 = shalt.err (!%p2694_p0)
}
 0x59c   :  { %s2698_s10 = scalar_lea.hbm %s3132_s9, 128 }
 0x59d   :  { %p2699_p1 = scmp.ne.s32.totalorder %s3132_s9, %s2698_s10  ;;  %p2702_p2 = scmp.lt.u32.totalorder %s2698_s10, %s3132_s9 }
 0x59f   :  { %p2704_p3 = pnand %p2702_p2, %p2699_p1 }
 0x5a1   :  { %2707 = shalt.err (!%p2704_p3)
}
 0x5a2   :  { %s2749_s17 = smov 16   ;;  %s2750_s18 = smov 1   ;;  %v2149_v61 = vld [vmem:[%s3130_s7] ss:$0 sm:$0xff] }
 0x5a3   :  { %2128 = dma.vmem_to_hbm [thread:$0]  %s2123_s30, 128, %s3132_s9, [#allocation10], %s2749_s17, %s2749_s17, %s2750_s18  }
 0x5a4   :  { %s2751_s7 = smov [#allocation8]  }
 0x5a5   :  { %s2113_s9 = sshll.u32 %s2751_s7, 4  ;;  %s2114_s9 = int_to_ptr.vmem [resolvable:$true] %s2113_s9 }
 0x5a6   :  { %s2708_s23 = scalar_lea.vmem %s2114_s9, 128  ;;  %p2713_p5 = scmp.lt.s32.totalorder %s2114_s9, %s2114_s9 }
 0x5a7   :  { %p2709_p4 = scmp.ne.s32.totalorder %s2114_s9, %s2708_s23  ;;  %p2714_p6 = scmp.lt.s32.totalorder %s2708_s23, %s2708_s23 }
 0x5a9   :  { %p2715_p7 = por %p2714_p6, %p2713_p5 }
 0x5ab   :  { %p2716_p8 = pnand %p2715_p7, %p2709_p4 }
 0x66c   :  { %v2230_v60 = vpop.f32.mrb[18].mxu0 }
 0x66d   :  { %v2231_v63 = vpop.f32.mrb[19].mxu0  ;;  %v2265_v2 = vpop.f32.mrb[18].mxu1 }
 0x66e   :  { %v2232_v1 = vadd.f32 %v2231_v63, %v2230_v60  ;;  %v2266_v20 = vpop.f32.mrb[19].mxu1 }
 0x66f   :  { %v2267_v25 = vadd.f32 %v2266_v20, %v2265_v2 }
 0x670   :  { %v1986_v62 = vadd.f32 %v2232_v1, %v2149_v61 }
 0x672   :  { %v2056_v8 = vadd.f32 %v2267_v25, %v1986_v62 }
 0x674   :  { %v2060_v9 = vrot.slane %v2056_v8, 1  ;;  %v2061_v10 = vrot.slane %v2056_v8, 2  ;;  %v2062_v12 = vrot.slane %v2056_v8, 3  ;;  %v2063_v16 = vrot.slane %v2056_v8, 4 }
 0x675   :  { %v2064_v17 = vrot.slane %v2056_v8, 5  ;;  %v2065_v18 = vrot.slane %v2056_v8, 6  ;;  %v2066_v21 = vrot.slane %v2056_v8, 7  ;;  %v2075_v22 = vadd.f32 %v2056_v8, %v2947_v0 }
 0x676   :  { %v2076_v24 = vadd.f32 %v2060_v9, %v2949_v26  ;;  %v2077_v28 = vadd.f32 %v2061_v10, %v2954_v4  ;;  %v2078_v29 = vadd.f32 %v2062_v12, %v2958_v7  ;;  %v2079_v30 = vadd.f32 %v2063_v16, %v2962_v11 }
 0x677   :  { %v2080_v31 = vadd.f32 %v2064_v17, %v2965_v15  ;;  %v2081_v33 = vadd.f32 %v2065_v18, %v2970_v23  ;;  %v2082_v34 = vadd.f32 %v2066_v21, %v2973_v27 }
 0x678   :  { %v2091_v36 = vrot.slane %v2076_v24, 7  ;;  %v2093_v37 = vrot.slane %v2077_v28, 6  ;;  %v2095_v39 = vrot.slane %v2078_v29, 5  ;;  %v2097_v26 = vrot.slane %v2079_v30, 4 }
 0x679   :  { %v2099_v40 = vrot.slane %v2080_v31, 3  ;;  %v2101_v11 = vrot.slane %v2081_v33, 2  ;;  %v2103_v23 = vrot.slane %v2082_v34, 1 }
 0x67a   :  { %v2092_v38 = vsel %vm1350_vm3, %v2091_v36, %v2075_v22 }
 0x67b   :  { %v2094_v0 = vsel %vm1353_vm4, %v2093_v37, %v2092_v38 }
 0x67c   :  { %v2096_v4 = vsel %vm1356_vm5, %v2095_v39, %v2094_v0 }
 0x67d   :  { %v2098_v7 = vsel %vm1359_vm6, %v2097_v26, %v2096_v4 }
 0x67e   :  { %v2100_v15 = vsel %vm1362_vm7, %v2099_v40, %v2098_v7 }
 0x67f   :  { %v2102_v27 = vsel %vm1365_vm8, %v2101_v11, %v2100_v15 }
 0x680   :  { %v2104_v41 = vsel %vm1368_vm9, %v2103_v23, %v2102_v27 }
 0x681   :  { %2106 = vst [vmem:[#allocation8] sm:$0xff] %v2104_v41 }
 0x682   :  { %2719 = shalt.err (!%p2716_p8)
}
 0x683   :  { %s2720_s24 = scalar_lea.hbm %s3131_s8, 128 }
 0x684   :  { %p2721_p9 = scmp.ne.s32.totalorder %s3131_s8, %s2720_s24  ;;  %p2724_p10 = scmp.lt.u32.totalorder %s2720_s24, %s3131_s8 }
 0x686   :  { %p2726_p11 = pnand %p2724_p10, %p2721_p9 }
 0x688   :  { %2729 = shalt.err (!%p2726_p11)
}
 0x689   :  { %2116 = dma.vmem_to_hbm [thread:$0]  %s2114_s9, 128, %s3131_s8, [#allocation4]  }
 0x68a   :  { %2734 = dma.done.wait [#allocation4], 128  }
 0x68b   :  { %2735 = vsyncadd [#allocation4], 4294967168 }
 0x68c   :  { %2736 = dma.done.wait [#allocation10], 128  }
 0x68d   :  { %2737 = vsyncadd [#allocation10], 4294967168 }
 0x68e   :  { %2135 = vsyncpa [#allocation3], 1 }
 0x68f   :  { %2136 = vsyncpa [#allocation6], 1 }
 0x690   :  { %2137 = vsyncpa [#allocation4], 1 }
 0x691   :  { %2138 = vsyncpa [#allocation10], 1 }

// kernel: tpu_custom_call.1
= control target key start
LH: loop header
LB: loop body
LE: loop exit
PB: predicated region body
PF: predicated region fallthrough
CT: control target
= control target key end

     0   :  { %15 = vsyncpa [#allocation3], 0  ;;  %s3123_s0 = inlined_call_operand.hbm [shape: f32[8,16,128], index: 0, kind: input, shape index: {}]   ;;  %s3124_s1 = inlined_call_operand.vmem [shape: f32[1,1,128], index: 1, kind: input, shape index: {}]   ;;  %s3125_s2 = inlined_call_operand.vmem [shape: f32[1,128], index: 2, kind: input, shape index: {}]   ;;  %s3126_s3 = inlined_call_operand.vmem [shape: f32[1,128], index: 3, kind: input, shape index: {}]   ;;  %s3127_s4 = inlined_call_operand.hbm [shape: f32[128,512], index: 4, kind: input, shape index: {}]   ;;  %s3128_s5 = inlined_call_operand.vmem [shape: f32[1,512], index: 5, kind: input, shape index: {}]   ;;  %s3129_s6 = inlined_call_operand.hbm [shape: f32[512,128], index: 6, kind: input, shape index: {}]   ;;  %s3130_s7 = inlined_call_operand.vmem [shape: f32[1,128], index: 7, kind: input, shape index: {}]   ;;  %s3131_s8 = inlined_call_operand.hbm [shape: f32[8,128], index: 8, kind: output, shape index: {0}]   ;;  %s3132_s9 = inlined_call_operand.hbm [shape: f32[8,1,16], index: 9, kind: output, shape index: {1}]  }
   0x1   :  { %16 = vsyncpa [#allocation6], 0 }
   0x2   :  { %17 = vsyncpa [#allocation4], 0 }
   0x3   :  { %18 = vsyncpa [#allocation10], 0  ;;  %s2738_s30 = smov [#allocation5]   ;;  %s2620_s13 = scalar_lea.hbm %s3127_s4, 8192 }
   0x4   :  { %s42_s10 = sshll.u32 %s2738_s30, 4  ;;  %p2621_p0 = scmp.ne.s32.totalorder %s3127_s4, %s2620_s13  ;;  %s43_s10 = int_to_ptr.vmem [resolvable:$true] %s42_s10 }
   0x5   :  { %p2624_p1 = scmp.lt.u32.totalorder %s2620_s13, %s3127_s4 }
   0x7   :  { %p2626_p2 = pnand %p2624_p1, %p2621_p0 }
   0x9   :  { %2629 = shalt.err (!%p2626_p2)
}
   0xa   :  { %s2630_s18 = scalar_lea.vmem %s43_s10, 8192  ;;  %p2635_p4 = scmp.lt.s32.totalorder %s43_s10, %s43_s10 }
   0xb   :  { %p2631_p3 = scmp.ne.s32.totalorder %s43_s10, %s2630_s18  ;;  %p2636_p5 = scmp.lt.s32.totalorder %s2630_s18, %s2630_s18 }
   0xd   :  { %p2637_p6 = por %p2636_p5, %p2635_p4 }
   0xf   :  { %p2638_p7 = pnand %p2637_p6, %p2631_p3 }
  0x11   :  { %2641 = shalt.err (!%p2638_p7)
}
  0x12   :  { %s2739_s19 = smov 512   ;;  %s2740_s20 = smov 32  }
  0x13   :  { %48 = dma.hbm_to_vmem [thread:$0]  %s3127_s4, 8192, %s43_s10, [#allocation6], %s2739_s19, %s2739_s19, %s2740_s20  }
  0x14   :  { %s2741_s23 = smov [#allocation2]   ;;  %s2642_s27 = scalar_lea.hbm %s3123_s0, 2048 }
  0x15   :  { %s24_s24 = sshll.u32 %s2741_s23, 4  ;;  %p2643_p8 = scmp.ne.s32.totalorder %s3123_s0, %s2642_s27  ;;  %s25_s24 = int_to_ptr.vmem [resolvable:$true] %s24_s24 }
  0x16   :  { %p2646_p9 = scmp.lt.u32.totalorder %s2642_s27, %s3123_s0 }
  0x18   :  { %p2648_p10 = pnand %p2646_p9, %p2643_p8 }
  0x1a   :  { %2651 = shalt.err (!%p2648_p10)
}
  0x1b   :  { %s2652_s12 = scalar_lea.vmem %s25_s24, 2048  ;;  %p2657_p12 = scmp.lt.s32.totalorder %s25_s24, %s25_s24 }
  0x1c   :  { %p2653_p11 = scmp.ne.s32.totalorder %s25_s24, %s2652_s12  ;;  %p2658_p13 = scmp.lt.s32.totalorder %s2652_s12, %s2652_s12 }
  0x1e   :  { %p2659_p0 = por %p2658_p13, %p2657_p12 }
  0x20   :  { %p2660_p1 = pnand %p2659_p0, %p2653_p11 }
  0x22   :  { %2663 = shalt.err (!%p2660_p1)
}
  0x23   :  { %s2742_s4 = smov 128   ;;  %s2743_s10 = smov 8  }
  0x24   :  { %30 = dma.hbm_to_vmem [thread:$0]  %s3123_s0, 2048, %s25_s24, [#allocation3], %s2742_s4, %s2742_s4, %s2743_s10  }
  0x25   :  { %s2744_s15 = smov [#allocation7]   ;;  %s2664_s19 = scalar_lea.hbm %s3129_s6, 8192 }
  0x26   :  { %s56_s16 = sshll.u32 %s2744_s15, 4  ;;  %p2665_p2 = scmp.ne.s32.totalorder %s3129_s6, %s2664_s19  ;;  %s57_s16 = int_to_ptr.vmem [resolvable:$true] %s56_s16 }
  0x27   :  { %p2668_p3 = scmp.lt.u32.totalorder %s2664_s19, %s3129_s6 }
  0x29   :  { %p2670_p4 = pnand %p2668_p3, %p2665_p2 }
  0x2b   :  { %2673 = shalt.err (!%p2670_p4)
}
  0x2c   :  { %s2674_s25 = scalar_lea.vmem %s57_s16, 8192  ;;  %p2679_p6 = scmp.lt.s32.totalorder %s57_s16, %s57_s16 }
  0x2d   :  { %p2675_p5 = scmp.ne.s32.totalorder %s57_s16, %s2674_s25  ;;  %p2680_p7 = scmp.lt.s32.totalorder %s2674_s25, %s2674_s25 }
  0x2f   :  { %p2681_p8 = por %p2680_p7, %p2679_p6 }
  0x31   :  { %p2682_p9 = pnand %p2681_p8, %p2675_p5 }
  0x33   :  { %2685 = shalt.err (!%p2682_p9)
}
  0x34   :  { %62 = dma.hbm_to_vmem [thread:$0]  %s3129_s6, 8192, %s57_s16, [#allocation6], %s2742_s4, %s2742_s4, %s2743_s10  }
  0x35   :  { %2730 = dma.done.wait [#allocation3], 2048  }
  0x36   :  { %2731 = vsyncadd [#allocation3], 4294965248 }
  0x37   :  { %2732 = dma.done.wait [#allocation6], 16384  }
  0x38   :  { %2733 = vsyncadd [#allocation6], 4294950912  ;;  %v2745_v0 = vmov 0.0|0.0   ;;  %vm2746_vm0 = vmmov 0   ;;  %v2747_v1 = vmov 0.0   ;;  %v74_v2 = vld [vmem:[#allocation2] sm:$0xff] }
  0x39   :  { %2380 = vmatprep.subr.bf16.mxu0 %v2745_v0  ;;  %2383 = vmatprep.subr.bf16.mxu1 %v2745_v0  ;;  %v75_v3 = vld [vmem:[#allocation2 + $0x8] sm:$0xff]  ;;  %v76_v4 = vld [vmem:[#allocation2 + $0x10] sm:$0xff]  ;;  %v77_v6 = vld [vmem:[#allocation2 + $0x18] sm:$0xff]  ;;  %vm651_vm1 = vcmask 122880   ;;  %vm756_vm2 = vcmask 130048   ;;  %vm1350_vm3 = vcmask 1041409  }
  0x3a   :  { %2272 = vmatprep.mubr.msk.f32.mxu0 %vm2746_vm0, %v2747_v1  ;;  %2279 = vmatprep.mubr.msk.f32.mxu1 %vm2746_vm0, %v2747_v1  ;;  %v2381_v5 = vpack.c.bf16 %v75_v3, %v74_v2  ;;  %v2384_v7 = vpack.c.bf16 %v77_v6, %v76_v4  ;;  %v78_v8 = vld [vmem:[#allocation2 + $0x20] sm:$0xff]  ;;  %v79_v9 = vld [vmem:[#allocation2 + $0x28] sm:$0xff]  ;;  %v80_v10 = vld [vmem:[#allocation2 + $0x30] sm:$0xff]  ;;  %vm1353_vm4 = vcmask 1042434   ;;  %vm1356_vm5 = vcmask 1043459  }
  0x3b   :  { %v81_v11 = vld [vmem:[#allocation2 + $0x38] sm:$0xff]  ;;  %v90_v12 = vld [vmem:[%s3124_s1] sm:$0x1]  ;;  %v2849_v13 = vpack.c.bf16 %v79_v9, %v78_v8  ;;  %v83_v16 = vld [vmem:[#allocation2 + $0x48] sm:$0xff]  ;;  %vm1359_vm6 = vcmask 1044484   ;;  %vm1362_vm7 = vcmask 1045509  }
  0x3c   :  { %2382 = vmatpush3.bf16.xpose.msra.mxu0 %v2381_v5  ;;  %2385 = vmatpush3.bf16.xpose.msra.mxu1 %v2384_v7  ;;  %v2851_v14 = vpack.c.bf16 %v81_v11, %v80_v10  ;;  %v82_v15 = vld [vmem:[#allocation2 + $0x40] sm:$0xff]  ;;  %v84_v17 = vld [vmem:[#allocation2 + $0x50] sm:$0xff]  ;;  %v85_v18 = vld [vmem:[#allocation2 + $0x58] sm:$0xff]  ;;  %vm1365_vm8 = vcmask 1046534   ;;  %vm1368_vm9 = vcmask 1047559  }
  0x3d   :  { %2386 = vmatprep.subr.bf16.mxu0 %v2745_v0  ;;  %2389 = vmatprep.subr.bf16.mxu1 %v2745_v0  ;;  %v2861_v19 = vpack.c.bf16 %v83_v16, %v82_v15  ;;  %v2863_v20 = vpack.c.bf16 %v85_v18, %v84_v17  ;;  %v86_v21 = vld [vmem:[#allocation2 + $0x60] sm:$0xff]  ;;  %v87_v22 = vld [vmem:[#allocation2 + $0x68] sm:$0xff]  ;;  %v88_v23 = vld [vmem:[#allocation2 + $0x70] sm:$0xff] }
  0x3e   :  { %v89_v24 = vld [vmem:[#allocation2 + $0x78] sm:$0xff]  ;;  %v2873_v25 = vpack.c.bf16 %v87_v22, %v86_v21 }
  0x3f   :  { %v2875_v26 = vpack.c.bf16 %v89_v24, %v88_v23 }
  0x43   :  { %2273 = vmatmul.mubr.f32.vlgmr.msra.gmra.mrb[0].mxu0 %v90_v12  ;;  %2280 = vmatmul.mubr.f32.vlgmr.msra.gmra.mrb[0].mxu1 %v90_v12 }
  0x44   :  { %2388 = vmatpush3.bf16.xpose.msra.mxu0 %v2849_v13  ;;  %2391 = vmatpush3.bf16.xpose.msra.mxu1 %v2851_v14 }
  0x45   :  { %2286 = vmatprep.mubr.msk.f32.mxu0 %vm2746_vm0, %v2747_v1  ;;  %2293 = vmatprep.mubr.msk.f32.mxu1 %vm2746_vm0, %v2747_v1 }
  0x46   :  { %2392 = vmatprep.subr.bf16.mxu0 %v2745_v0  ;;  %2395 = vmatprep.subr.bf16.mxu1 %v2745_v0 }
  0x4b   :  { %2287 = vmatmul.mubr.f32.vlgmr.msra.gmra.mrb[2].mxu0 %v90_v12  ;;  %2294 = vmatmul.mubr.f32.vlgmr.msra.gmra.mrb[2].mxu1 %v90_v12 }
  0x4c   :  { %2394 = vmatpush3.bf16.xpose.msra.mxu0 %v2861_v19  ;;  %2397 = vmatpush3.bf16.xpose.msra.mxu1 %v2863_v20 }
  0x4d   :  { %2300 = vmatprep.mubr.msk.f32.mxu0 %vm2746_vm0, %v2747_v1  ;;  %2307 = vmatprep.mubr.msk.f32.mxu1 %vm2746_vm0, %v2747_v1 }
  0x4e   :  { %2398 = vmatprep.subr.bf16.mxu0 %v2745_v0  ;;  %2401 = vmatprep.subr.bf16.mxu1 %v2745_v0 }
  0x53   :  { %2301 = vmatmul.mubr.f32.vlgmr.msra.gmra.mrb[4].mxu0 %v90_v12  ;;  %2308 = vmatmul.mubr.f32.vlgmr.msra.gmra.mrb[4].mxu1 %v90_v12 }
  0x54   :  { %2400 = vmatpush3.bf16.xpose.msra.mxu0 %v2873_v25  ;;  %2403 = vmatpush3.bf16.xpose.msra.mxu1 %v2875_v26 }
  0x55   :  { %2314 = vmatprep.mubr.msk.f32.mxu0 %vm2746_vm0, %v2747_v1  ;;  %2321 = vmatprep.mubr.msk.f32.mxu1 %vm2746_vm0, %v2747_v1 }
  0x56   :  { %2404 = vmatprep.subr.bf16.mxu0 %v2745_v0  ;;  %2407 = vmatprep.subr.bf16.mxu1 %v2745_v0 }
  0x5b   :  { %2315 = vmatmul.mubr.f32.vlgmr.msra.gmra.mrb[6].mxu0 %v90_v12  ;;  %2322 = vmatmul.mubr.f32.vlgmr.msra.gmra.mrb[6].mxu1 %v90_v12 }
  0x5c   :  { %2406 = vmatpush3.bf16.msra.mxu0 %v2381_v5  ;;  %2328 = vmatprep.mubr.msk.f32.mxu0 %vm2746_vm0, %v2747_v1 }
  0x5d   :  { %2409 = vmatpush3.bf16.msra.mxu1 %v2384_v7  ;;  %2335 = vmatprep.mubr.msk.f32.mxu1 %vm2746_vm0, %v2747_v1 }
  0x5e   :  { %2410 = vmatprep.subr.bf16.mxu0 %v2745_v0  ;;  %2413 = vmatprep.subr.bf16.mxu1 %v2745_v0 }
 0x116   :  { %v157_v27 = vpop.f32.mrb[0].mxu0  ;;  %v227_v29 = vpop.f32.mrb[0].mxu1 }
 0x117   :  { %652 = vst.msk [vmem:[#allocation9] sm:$0x1] %vm651_vm1, %v157_v27  ;;  %v2274_v28 = vpop.f32.mrb[1].mxu0  ;;  %v660_v30 = vmul.f32 0.088388346, %v157_v27  ;;  %v2281_v31 = vpop.f32.mrb[1].mxu1 }
 0x118   :  { %653 = vst.msk [vmem:[#allocation9 + $0x1] sm:$0x1] %vm651_vm1, %v227_v29  ;;  %v661_v32 = vmul.f32 0.088388346, %v227_v29 }
 0x119   :  { %v668_v33 = vsel %vm651_vm1, %v660_v30, -inf }
 0x11a   :  { %669 = vmax.xlane.f32.xlu0 %v668_v33  ;;  %v671_v34 = vsel %vm651_vm1, %v661_v32, -inf }
 0x11e   :  { %672 = vmax.xlane.f32.xlu0 %v671_v34  ;;  %v297_v35 = vpop.f32.mrb[2].mxu0  ;;  %v367_v37 = vpop.f32.mrb[2].mxu1 }
 0x11f   :  { %654 = vst.msk [vmem:[#allocation9 + $0x2] sm:$0x1] %vm651_vm1, %v297_v35  ;;  %v2288_v36 = vpop.f32.mrb[3].mxu0  ;;  %v662_v38 = vmul.f32 0.088388346, %v297_v35  ;;  %v2295_v39 = vpop.f32.mrb[3].mxu1 }
 0x120   :  { %655 = vst.msk [vmem:[#allocation9 + $0x3] sm:$0x1] %vm651_vm1, %v367_v37  ;;  %v663_v40 = vmul.f32 0.088388346, %v367_v37 }
 0x121   :  { %v674_v41 = vsel %vm651_vm1, %v662_v38, -inf }
 0x122   :  { %675 = vmax.xlane.f32.xlu1 %v674_v41  ;;  %v677_v42 = vsel %vm651_vm1, %v663_v40, -inf }
 0x126   :  { %678 = vmax.xlane.f32.xlu1 %v677_v42  ;;  %v437_v43 = vpop.f32.mrb[4].mxu0  ;;  %v507_v44 = vpop.f32.mrb[4].mxu1 }
 0x127   :  { %656 = vst.msk [vmem:[#allocation9 + $0x4] sm:$0x1] %vm651_vm1, %v437_v43  ;;  %v664_v45 = vmul.f32 0.088388346, %v437_v43  ;;  %v2302_v46 = vpop.f32.mrb[5].mxu0  ;;  %v2309_v48 = vpop.f32.mrb[5].mxu1 }
 0x128   :  { %657 = vst.msk [vmem:[#allocation9 + $0x5] sm:$0x1] %vm651_vm1, %v507_v44  ;;  %v665_v47 = vmul.f32 0.088388346, %v507_v44 }
 0x129   :  { %v680_v49 = vsel %vm651_vm1, %v664_v45, -inf }
 0x12a   :  { %v683_v50 = vsel %vm651_vm1, %v665_v47, -inf  ;;  %681 = vmax.xlane.f32.xlu0 %v680_v49 }
 0x12b   :  { %684 = vmax.xlane.f32.xlu1 %v683_v50 }
 0x12e   :  { %v577_v51 = vpop.f32.mrb[6].mxu0  ;;  %v647_v53 = vpop.f32.mrb[6].mxu1 }
 0x12f   :  { %658 = vst.msk [vmem:[#allocation9 + $0x6] sm:$0x1] %vm651_vm1, %v577_v51  ;;  %v666_v52 = vmul.f32 0.088388346, %v577_v51  ;;  %v2316_v54 = vpop.f32.mrb[7].mxu0  ;;  %v2323_v56 = vpop.f32.mrb[7].mxu1 }
 0x130   :  { %659 = vst.msk [vmem:[#allocation9 + $0x7] sm:$0x1] %vm651_vm1, %v647_v53  ;;  %v667_v55 = vmul.f32 0.088388346, %v647_v53 }
 0x131   :  { %v686_v57 = vsel %vm651_vm1, %v666_v52, -inf }
 0x132   :  { %v689_v58 = vsel %vm651_vm1, %v667_v55, -inf  ;;  %687 = vmax.xlane.f32.xlu0 %v686_v57 }
 0x133   :  { %690 = vmax.xlane.f32.xlu1 %v689_v58 }
 0x1a7   :  { %v670_v59 = vpop.xlane.xlu0 %669 }
 0x1a8   :  { %v692_v60 = vsub.f32 %v660_v30, %v670_v59 }
 0x1aa   :  { %v700_v61 = vmul.f32 1.442695, %v692_v60 }
 0x1ab   :  { %v673_v62 = vpop.xlane.xlu0 %672 }
 0x1ac   :  { %2570 = vpow2.f32 %v700_v61  ;;  %v693_v63 = vsub.f32 %v661_v32, %v673_v62 }
 0x1ae   :  { %v702_v2 = vmul.f32 1.442695, %v693_v63 }
 0x1af   :  { %v676_v3 = vpop.xlane.xlu1 %675 }
 0x1b0   :  { %2572 = vpow2.f32 %v702_v2  ;;  %v694_v4 = vsub.f32 %v662_v38, %v676_v3 }
 0x1b2   :  { %v704_v5 = vmul.f32 1.442695, %v694_v4 }
 0x1b3   :  { %v679_v6 = vpop.xlane.xlu1 %678 }
 0x1b4   :  { %2574 = vpow2.f32 %v704_v5  ;;  %v695_v7 = vsub.f32 %v663_v40, %v679_v6 }
 0x1b6   :  { %v2571_v8 = vpop.eup %2570  ;;  %v706_v9 = vmul.f32 1.442695, %v695_v7 }
 0x1b7   :  { %v682_v10 = vpop.xlane.xlu0 %681  ;;  %v716_v11 = vsel %vm651_vm1, %v2571_v8, 0.0 }
 0x1b8   :  { %2576 = vpow2.f32 %v706_v9  ;;  %v685_v12 = vpop.xlane.xlu1 %684  ;;  %v696_v15 = vsub.f32 %v664_v45, %v682_v10  ;;  %717 = vadd.xlane.f32.xlu0 %v716_v11 }
 0x1b9   :  { %v697_v16 = vsub.f32 %v665_v47, %v685_v12 }
 0x1ba   :  { %v2573_v17 = vpop.eup %2572  ;;  %v708_v18 = vmul.f32 1.442695, %v696_v15 }
 0x1bb   :  { %v710_v21 = vmul.f32 1.442695, %v697_v16  ;;  %v719_v22 = vsel %vm651_vm1, %v2573_v17, 0.0 }
 0x1bc   :  { %2578 = vpow2.f32 %v708_v18  ;;  %720 = vadd.xlane.f32.xlu1 %v719_v22 }
 0x1bd   :  { %2580 = vpow2.f32 %v710_v21 }
 0x1be   :  { %v2575_v23 = vpop.eup %2574 }
 0x1bf   :  { %v688_v24 = vpop.xlane.xlu0 %687  ;;  %v722_v27 = vsel %vm651_vm1, %v2575_v23, 0.0 }
 0x1c0   :  { %v691_v28 = vpop.xlane.xlu1 %690  ;;  %v698_v29 = vsub.f32 %v666_v52, %v688_v24  ;;  %723 = vadd.xlane.f32.xlu0 %v722_v27 }
 0x1c1   :  { %v699_v30 = vsub.f32 %v667_v55, %v691_v28 }
 0x1c2   :  { %v2577_v31 = vpop.eup %2576  ;;  %v712_v32 = vmul.f32 1.442695, %v698_v29 }
 0x1c3   :  { %v714_v33 = vmul.f32 1.442695, %v699_v30  ;;  %v725_v34 = vsel %vm651_vm1, %v2577_v31, 0.0 }
 0x1c4   :  { %2582 = vpow2.f32 %v712_v32  ;;  %726 = vadd.xlane.f32.xlu1 %v725_v34 }
 0x1c5   :  { %2584 = vpow2.f32 %v714_v33 }
 0x1c6   :  { %v2579_v35 = vpop.eup %2578 }
 0x1c7   :  { %v2581_v36 = vpop.eup %2580  ;;  %v728_v37 = vsel %vm651_vm1, %v2579_v35, 0.0 }
 0x1c8   :  { %v731_v38 = vsel %vm651_vm1, %v2581_v36, 0.0  ;;  %729 = vadd.xlane.f32.xlu0 %v728_v37 }
 0x1c9   :  { %732 = vadd.xlane.f32.xlu1 %v731_v38 }
 0x1ce   :  { %v2583_v39 = vpop.eup %2582 }
 0x1cf   :  { %v2585_v40 = vpop.eup %2584  ;;  %v734_v41 = vsel %vm651_vm1, %v2583_v39, 0.0 }
 0x1d0   :  { %v737_v42 = vsel %vm651_vm1, %v2585_v40, 0.0  ;;  %735 = vadd.xlane.f32.xlu0 %v734_v41 }
 0x1d1   :  { %738 = vadd.xlane.f32.xlu1 %v737_v42 }
 0x245   :  { %v718_v43 = vpop.xlane.xlu0 %717 }
 0x246   :  { %2586 = vrcp.f32 %v718_v43 }
 0x249   :  { %v721_v44 = vpop.xlane.xlu1 %720 }
 0x24a   :  { %2588 = vrcp.f32 %v721_v44 }
 0x24d   :  { %v724_v45 = vpop.xlane.xlu0 %723 }
 0x24e   :  { %2590 = vrcp.f32 %v724_v45 }
 0x250   :  { %v2587_v46 = vpop.eup %2586 }
 0x251   :  { %v741_v47 = vmul.f32 %v2587_v46, %v2571_v8  ;;  %v727_v48 = vpop.xlane.xlu1 %726 }
 0x252   :  { %2592 = vrcp.f32 %v727_v48 }
 0x253   :  { %2329 = vmatmul.mubr.msk.f32.vlgmr.msra.gmra.mrb[8].mxu0 %vm756_vm2, %v741_v47 }
 0x254   :  { %v2589_v49 = vpop.eup %2588  ;;  %2412 = vmatpush3.bf16.msra.mxu0 %v2849_v13  ;;  %2342 = vmatprep.mubr.msk.f32.mxu0 %vm2746_vm0, %v2747_v1 }
 0x255   :  { %v743_v50 = vmul.f32 %v2589_v49, %v2573_v17  ;;  %v730_v51 = vpop.xlane.xlu0 %729  ;;  %2416 = vmatprep.subr.bf16.mxu0 %v2745_v0 }
 0x256   :  { %v733_v52 = vpop.xlane.xlu1 %732  ;;  %2594 = vrcp.f32 %v730_v51 }
 0x257   :  { %2596 = vrcp.f32 %v733_v52  ;;  %2336 = vmatmul.mubr.msk.f32.vlgmr.msra.gmra.mrb[8].mxu1 %vm756_vm2, %v743_v50 }
 0x258   :  { %v2591_v53 = vpop.eup %2590  ;;  %2415 = vmatpush3.bf16.msra.mxu1 %v2851_v14  ;;  %2349 = vmatprep.mubr.msk.f32.mxu1 %vm2746_vm0, %v2747_v1 }
 0x259   :  { %v745_v54 = vmul.f32 %v2591_v53, %v2575_v23  ;;  %2419 = vmatprep.subr.bf16.mxu1 %v2745_v0 }
 0x25b   :  { %2343 = vmatmul.mubr.msk.f32.vlgmr.msra.gmra.mrb[10].mxu0 %vm756_vm2, %v745_v54 }
 0x25c   :  { %v2593_v13 = vpop.eup %2592  ;;  %2418 = vmatpush3.bf16.msra.mxu0 %v2861_v19  ;;  %2356 = vmatprep.mubr.msk.f32.mxu0 %vm2746_vm0, %v2747_v1 }
 0x25d   :  { %v747_v55 = vmul.f32 %v2593_v13, %v2577_v31  ;;  %v736_v56 = vpop.xlane.xlu0 %735  ;;  %2422 = vmatprep.subr.bf16.mxu0 %v2745_v0 }
 0x25e   :  { %v739_v57 = vpop.xlane.xlu1 %738  ;;  %2598 = vrcp.f32 %v736_v56 }
 0x25f   :  { %2600 = vrcp.f32 %v739_v57  ;;  %2350 = vmatmul.mubr.msk.f32.vlgmr.msra.gmra.mrb[10].mxu1 %vm756_vm2, %v747_v55 }
 0x260   :  { %v2595_v14 = vpop.eup %2594  ;;  %2421 = vmatpush3.bf16.msra.mxu1 %v2863_v20  ;;  %2363 = vmatprep.mubr.msk.f32.mxu1 %vm2746_vm0, %v2747_v1 }
 0x261   :  { %v2597_v58 = vpop.eup %2596  ;;  %v749_v19 = vmul.f32 %v2595_v14, %v2579_v35  ;;  %2425 = vmatprep.subr.bf16.mxu1 %v2745_v0 }
 0x262   :  { %v751_v59 = vmul.f32 %v2597_v58, %v2581_v36 }
 0x263   :  { %2357 = vmatmul.mubr.msk.f32.vlgmr.msra.gmra.mrb[12].mxu0 %vm756_vm2, %v749_v19 }
 0x264   :  { %2364 = vmatmul.mubr.msk.f32.vlgmr.msra.gmra.mrb[12].mxu1 %vm756_vm2, %v751_v59  ;;  %2424 = vmatpush3.bf16.msra.mxu0 %v2873_v25 }
 0x265   :  { %2427 = vmatpush3.bf16.msra.mxu1 %v2875_v26  ;;  %2370 = vmatprep.mubr.msk.f32.mxu0 %vm2746_vm0, %v2747_v1 }
 0x266   :  { %2377 = vmatprep.mubr.msk.f32.mxu1 %vm2746_vm0, %v2747_v1 }
 0x268   :  { %v2599_v20 = vpop.eup %2598 }
 0x269   :  { %v2601_v60 = vpop.eup %2600  ;;  %v753_v61 = vmul.f32 %v2599_v20, %v2583_v39 }
 0x26a   :  { %v755_v62 = vmul.f32 %v2601_v60, %v2585_v40 }
 0x26b   :  { %2371 = vmatmul.mubr.msk.f32.vlgmr.msra.gmra.mrb[14].mxu0 %vm756_vm2, %v753_v61 }
 0x26c   :  { %2378 = vmatmul.mubr.msk.f32.vlgmr.msra.gmra.mrb[14].mxu1 %vm756_vm2, %v755_v62  ;;  %1662 = vmatprep.mubr.f32.mxu0 %v2747_v1 }
 0x26d   :  { %1733 = vmatprep.mubr.f32.mxu1 %v2747_v1 }
 0x326   :  { %v2947_v0 = vpop.f32.mrb[8].mxu0 }
 0x327   :  { %v2330_v25 = vpop.f32.mrb[9].mxu0 }
 0x32a   :  { %v2949_v26 = vpop.f32.mrb[8].mxu1 }
 0x32b   :  { %v1349_v63 = vrot.slane %v2949_v26, 7  ;;  %v2337_v2 = vpop.f32.mrb[9].mxu1 }
 0x32d   :  { %v1351_v3 = vsel %vm1350_vm3, %v1349_v63, %v2947_v0 }
 0x32e   :  { %v2954_v4 = vpop.f32.mrb[10].mxu0 }
 0x32f   :  { %v1352_v5 = vrot.slane %v2954_v4, 6  ;;  %v2344_v6 = vpop.f32.mrb[11].mxu0 }
 0x330   :  { %v1490_v6 = vld [vmem:[#allocation5 + $0x8] sm:$0xff] }
 0x331   :  { %v1354_v1 = vsel %vm1353_vm4, %v1352_v5, %v1351_v3 }
 0x332   :  { %v2958_v7 = vpop.f32.mrb[10].mxu1 }
 0x333   :  { %v1355_v8 = vrot.slane %v2958_v7, 5  ;;  %v2351_v9 = vpop.f32.mrb[11].mxu1 }
 0x335   :  { %v1357_v10 = vsel %vm1356_vm5, %v1355_v8, %v1354_v1  ;;  %v1494_v1 = vld [vmem:[#allocation5 + $0x28] sm:$0xff]  ;;  %v1492_v8 = vld [vmem:[#allocation5 + $0x18] sm:$0xff] }
 0x336   :  { %v2962_v11 = vpop.f32.mrb[12].mxu0  ;;  %v2428_v9 = vpack.c.bf16 %v1494_v1, %v1490_v6  ;;  %v1526_v6 = vld [vmem:[#allocation5 + $0x128] sm:$0xff]  ;;  %v1524_v1 = vld [vmem:[#allocation5 + $0x118] sm:$0xff] }
 0x337   :  { %v1358_v12 = vrot.slane %v2962_v11, 4  ;;  %v2965_v15 = vpop.f32.mrb[12].mxu1  ;;  %v2358_v16 = vpop.f32.mrb[13].mxu0 }
 0x338   :  { %v1361_v17 = vrot.slane %v2965_v15, 3  ;;  %v2365_v18 = vpop.f32.mrb[13].mxu1  ;;  %v1493_v16 = vld [vmem:[#allocation5 + $0x20] sm:$0xff]  ;;  %2429 = vmatprep.subr.bf16.mxu0 %v2428_v9 }
 0x339   :  { %v1360_v21 = vsel %vm1359_vm6, %v1358_v12, %v1357_v10  ;;  %v1496_v10 = vld [vmem:[#allocation5 + $0x38] sm:$0xff]  ;;  %v1489_v12 = vld [vmem:[#allocation5] sm:$0xff] }
 0x33a   :  { %v1363_v22 = vsel %vm1362_vm7, %v1361_v17, %v1360_v21  ;;  %v2460_v17 = vpack.c.bf16 %v1496_v10, %v1492_v8  ;;  %v2430_v18 = vpack.c.bf16 %v1493_v16, %v1489_v12  ;;  %v1491_v21 = vld [vmem:[#allocation5 + $0x10] sm:$0xff]  ;;  %v1528_v10 = vld [vmem:[#allocation5 + $0x138] sm:$0xff]  ;;  %v1521_v12 = vld [vmem:[#allocation5 + $0x100] sm:$0xff] }
 0x33b   :  { %v1525_v16 = vld [vmem:[#allocation5 + $0x120] sm:$0xff] }
 0x33c   :  { %2461 = vmatprep.subr.bf16.mxu1 %v2460_v17  ;;  %2431 = vmatpush1.bf16.msra.mxu0 %v2430_v18  ;;  %v2476_v17 = vpack.c.bf16 %v1528_v10, %v1524_v1  ;;  %v1523_v18 = vld [vmem:[#allocation5 + $0x110] sm:$0xff] }
 0x33e   :  { %v2970_v23 = vpop.f32.mrb[14].mxu0 }
 0x33f   :  { %v1364_v24 = vrot.slane %v2970_v23, 2  ;;  %v2973_v27 = vpop.f32.mrb[14].mxu1  ;;  %v2372_v28 = vpop.f32.mrb[15].mxu0 }
 0x340   :  { %v1367_v29 = vrot.slane %v2973_v27, 1  ;;  %v2379_v30 = vpop.f32.mrb[15].mxu1  ;;  %v1498_v28 = vld [vmem:[#allocation5 + $0x48] sm:$0xff] }
 0x341   :  { %v1366_v31 = vsel %vm1365_vm8, %v1364_v24, %v1363_v22  ;;  %v1495_v22 = vld [vmem:[#allocation5 + $0x30] sm:$0xff]  ;;  %v1500_v30 = vld [vmem:[#allocation5 + $0x58] sm:$0xff] }
 0x342   :  { %v1369_v32 = vsel %vm1368_vm9, %v1367_v29, %v1366_v31  ;;  %v2462_v24 = vpack.c.bf16 %v1495_v22, %v1491_v21  ;;  %v1502_v29 = vld [vmem:[#allocation5 + $0x68] sm:$0xff]  ;;  %v1527_v21 = vld [vmem:[#allocation5 + $0x130] sm:$0xff] }
 0x343   :  { %1371 = vadd.xlane.f32.xlu0 %v1369_v32  ;;  %v2432_v31 = vpack.c.bf16 %v1502_v29, %v1498_v28  ;;  %v1504_v32 = vld [vmem:[#allocation5 + $0x78] sm:$0xff]  ;;  %v1530_v22 = vld [vmem:[#allocation5 + $0x148] sm:$0xff] }
 0x344   :  { %2463 = vmatpush1.bf16.msra.mxu1 %v2462_v24  ;;  %v1534_v24 = vld [vmem:[#allocation5 + $0x168] sm:$0xff]  ;;  %v1532_v28 = vld [vmem:[#allocation5 + $0x158] sm:$0xff] }
 0x345   :  { %2433 = vmatprep.subr.bf16.mxu0 %v2432_v31  ;;  %v1536_v29 = vld [vmem:[#allocation5 + $0x178] sm:$0xff]  ;;  %v2478_v31 = vpack.c.bf16 %v1527_v21, %v1523_v18  ;;  %v2147_v18 = vld [vmem:[%s3125_s2] ss:$0 sm:$0xff] }
 0x3d0   :  { %v1372_v33 = vpop.xlane.xlu0 %1371 }
 0x3d1   :  { %v1374_v34 = vmul.f32 0.0078125, %v1372_v33  ;;  %v1497_v33 = vld [vmem:[#allocation5 + $0x40] sm:$0xff] }
 0x3d3   :  { %v1376_v35 = vrot.slane %v1374_v34, 1  ;;  %v1377_v36 = vrot.slane %v1374_v34, 2  ;;  %v1378_v37 = vrot.slane %v1374_v34, 3  ;;  %v1379_v38 = vrot.slane %v1374_v34, 4 }
 0x3d4   :  { %v1380_v39 = vrot.slane %v1374_v34, 5  ;;  %v1381_v40 = vrot.slane %v1374_v34, 6  ;;  %v1382_v41 = vrot.slane %v1374_v34, 7  ;;  %v2979_v42 = vsub.f32 %v2947_v0, %v1374_v34  ;;  %v1501_v34 = vld [vmem:[#allocation5 + $0x60] sm:$0xff] }
 0x3d5   :  { %v2982_v43 = vsub.f32 %v2949_v26, %v1376_v35  ;;  %v2985_v44 = vsub.f32 %v2954_v4, %v1377_v36  ;;  %v2988_v45 = vsub.f32 %v2958_v7, %v1378_v37  ;;  %v2991_v46 = vsub.f32 %v2962_v11, %v1379_v38  ;;  %v1499_v37 = vld [vmem:[#allocation5 + $0x50] sm:$0xff] }
 0x3d6   :  { %v2994_v47 = vsub.f32 %v2965_v15, %v1380_v39  ;;  %v2997_v48 = vsub.f32 %v2970_v23, %v1381_v40  ;;  %v3000_v49 = vsub.f32 %v2973_v27, %v1382_v41  ;;  %v1399_v54 = vmul.f32 %v2979_v42, %v2979_v42  ;;  %v1503_v38 = vld [vmem:[#allocation5 + $0x70] sm:$0xff]  ;;  %v1506_v39 = vld [vmem:[#allocation5 + $0x88] sm:$0xff] }
 0x3d7   :  { %v1400_v50 = vmul.f32 %v2982_v43, %v2982_v43  ;;  %v1401_v51 = vmul.f32 %v2985_v44, %v2985_v44  ;;  %v1402_v52 = vmul.f32 %v2988_v45, %v2988_v45  ;;  %v1403_v53 = vmul.f32 %v2991_v46, %v2991_v46  ;;  %v1510_v41 = vld [vmem:[#allocation5 + $0xa8] sm:$0xff] }
 0x3d8   :  { %v1404_v13 = vmul.f32 %v2994_v47, %v2994_v47  ;;  %v1405_v57 = vmul.f32 %v2997_v48, %v2997_v48  ;;  %v1406_v14 = vmul.f32 %v3000_v49, %v3000_v49  ;;  %v2464_v35 = vpack.c.bf16 %v1504_v32, %v1500_v30 }
 0x3d9   :  { %v1415_v55 = vrot.slane %v1400_v50, 7  ;;  %v1417_v56 = vrot.slane %v1401_v51, 6  ;;  %v1419_v19 = vrot.slane %v1402_v52, 5  ;;  %v1421_v20 = vrot.slane %v1403_v53, 4  ;;  %v1508_v50 = vld [vmem:[#allocation5 + $0x98] sm:$0xff] }
 0x3da   :  { %v1423_v61 = vrot.slane %v1404_v13, 3  ;;  %v1425_v25 = vrot.slane %v1405_v57, 2  ;;  %v1427_v2 = vrot.slane %v1406_v14, 1  ;;  %v2434_v36 = vpack.c.bf16 %v1501_v34, %v1497_v33  ;;  %v1512_v51 = vld [vmem:[#allocation5 + $0xb8] sm:$0xff]  ;;  %2465 = vmatprep.subr.bf16.mxu1 %v2464_v35  ;;  %v1509_v13 = vld [vmem:[#allocation5 + $0xa0] sm:$0xff]  ;;  %v1511_v57 = vld [vmem:[#allocation5 + $0xb0] sm:$0xff] }
 0x3db   :  { %v1416_v58 = vsel %vm1350_vm3, %v1415_v55, %v1399_v54  ;;  %v2466_v40 = vpack.c.bf16 %v1503_v38, %v1499_v37  ;;  %v2436_v52 = vpack.c.bf16 %v1510_v41, %v1506_v39  ;;  %v2468_v53 = vpack.c.bf16 %v1512_v51, %v1508_v50  ;;  %v1505_v54 = vld [vmem:[#allocation5 + $0x80] sm:$0xff]  ;;  %v1507_v55 = vld [vmem:[#allocation5 + $0x90] sm:$0xff]  ;;  %v1514_v14 = vld [vmem:[#allocation5 + $0xc8] sm:$0xff] }
 0x3dc   :  { %v1418_v59 = vsel %vm1353_vm4, %v1417_v56, %v1416_v58  ;;  %2435 = vmatpush1.bf16.msra.mxu0 %v2434_v36  ;;  %v2438_v56 = vpack.c.bf16 %v1509_v13, %v1505_v54  ;;  %v1518_v58 = vld [vmem:[#allocation5 + $0xe8] sm:$0xff]  ;;  %v2446_v30 = vpack.c.bf16 %v1525_v16, %v1521_v12  ;;  %v2448_v32 = vpack.c.bf16 %v1534_v24, %v1530_v22  ;;  %v1529_v33 = vld [vmem:[#allocation5 + $0x140] sm:$0xff]  ;;  %v1531_v35 = vld [vmem:[#allocation5 + $0x150] sm:$0xff] }
 0x3dd   :  { %v1420_v60 = vsel %vm1356_vm5, %v1419_v19, %v1418_v59  ;;  %2467 = vmatpush1.bf16.msra.mxu1 %v2466_v40  ;;  %2437 = vmatprep.subr.bf16.mxu0 %v2436_v52  ;;  %v2470_v19 = vpack.c.bf16 %v1511_v57, %v1507_v55  ;;  %v2440_v59 = vpack.c.bf16 %v1518_v58, %v1514_v14  ;;  %v1533_v34 = vld [vmem:[#allocation5 + $0x160] sm:$0xff]  ;;  %v1535_v37 = vld [vmem:[#allocation5 + $0x170] sm:$0xff]  ;;  %v1538_v38 = vld [vmem:[#allocation5 + $0x188] sm:$0xff] }
 0x3de   :  { %v1422_v62 = vsel %vm1359_vm6, %v1421_v20, %v1420_v60  ;;  %2469 = vmatprep.subr.bf16.mxu1 %v2468_v53  ;;  %v1516_v20 = vld [vmem:[#allocation5 + $0xd8] sm:$0xff]  ;;  %v2480_v36 = vpack.c.bf16 %v1536_v29, %v1532_v28  ;;  %v1542_v39 = vld [vmem:[#allocation5 + $0x1a8] sm:$0xff]  ;;  %v2450_v50 = vpack.c.bf16 %v1533_v34, %v1529_v33  ;;  %v2482_v51 = vpack.c.bf16 %v1535_v37, %v1531_v35  ;;  %v1537_v53 = vld [vmem:[#allocation5 + $0x180] sm:$0xff] }
 0x3df   :  { %v1424_v63 = vsel %vm1362_vm7, %v1423_v61, %v1422_v62  ;;  %v1520_v60 = vld [vmem:[#allocation5 + $0xf8] sm:$0xff]  ;;  %v1513_v61 = vld [vmem:[#allocation5 + $0xc0] sm:$0xff]  ;;  %v2452_v52 = vpack.c.bf16 %v1542_v39, %v1538_v38  ;;  %v1539_v13 = vld [vmem:[#allocation5 + $0x190] sm:$0xff] }
 0x3e0   :  { %v1426_v3 = vsel %vm1365_vm8, %v1425_v25, %v1424_v63  ;;  %v2472_v62 = vpack.c.bf16 %v1520_v60, %v1516_v20  ;;  %v1517_v25 = vld [vmem:[#allocation5 + $0xe0] sm:$0xff]  ;;  %v1515_v63 = vld [vmem:[#allocation5 + $0xd0] sm:$0xff]  ;;  %2439 = vmatpush1.bf16.msra.mxu0 %v2438_v56  ;;  %v1540_v40 = vld [vmem:[#allocation5 + $0x198] sm:$0xff] }
 0x3e1   :  { %v1428_v5 = vsel %vm1368_vm9, %v1427_v2, %v1426_v3  ;;  %v1519_v2 = vld [vmem:[#allocation5 + $0xf0] sm:$0xff]  ;;  %v2442_v3 = vpack.c.bf16 %v1517_v25, %v1513_v61  ;;  %2471 = vmatpush1.bf16.msra.mxu1 %v2470_v19  ;;  %2441 = vmatprep.subr.bf16.mxu0 %v2440_v59  ;;  %v1544_v41 = vld [vmem:[#allocation5 + $0x1b8] sm:$0xff]  ;;  %v1541_v54 = vld [vmem:[#allocation5 + $0x1a0] sm:$0xff] }
 0x3e2   :  { %1430 = vadd.xlane.f32.xlu1 %v1428_v5  ;;  %v1522_v5 = vld [vmem:[#allocation5 + $0x108] sm:$0xff]  ;;  %v2474_v8 = vpack.c.bf16 %v1519_v2, %v1515_v63  ;;  %2473 = vmatprep.subr.bf16.mxu1 %v2472_v62  ;;  %v2484_v55 = vpack.c.bf16 %v1544_v41, %v1540_v40  ;;  %v1543_v56 = vld [vmem:[#allocation5 + $0x1b0] sm:$0xff]  ;;  %v1548_v58 = vld [vmem:[#allocation5 + $0x1d8] sm:$0xff]  ;;  %v2454_v59 = vpack.c.bf16 %v1541_v54, %v1537_v53 }
 0x3e3   :  { %v2444_v9 = vpack.c.bf16 %v1526_v6, %v1522_v5  ;;  %v1546_v57 = vld [vmem:[#allocation5 + $0x1c8] sm:$0xff]  ;;  %v1552_v19 = vld [vmem:[#allocation5 + $0x1f8] sm:$0xff]  ;;  %v2486_v20 = vpack.c.bf16 %v1543_v56, %v1539_v13  ;;  %v1545_v61 = vld [vmem:[#allocation5 + $0x1c0] sm:$0xff] }
 0x3e4   :  { %2443 = vmatpush1.bf16.msra.mxu0 %v2442_v3  ;;  %v1550_v14 = vld [vmem:[#allocation5 + $0x1e8] sm:$0xff]  ;;  %v1549_v62 = vld [vmem:[#allocation5 + $0x1e0] sm:$0xff]  ;;  %v2488_v25 = vpack.c.bf16 %v1552_v19, %v1548_v58  ;;  %v1547_v63 = vld [vmem:[#allocation5 + $0x1d0] sm:$0xff] }
 0x3e5   :  { %2475 = vmatpush1.bf16.msra.mxu1 %v2474_v8  ;;  %2445 = vmatprep.subr.bf16.mxu0 %v2444_v9  ;;  %v2456_v60 = vpack.c.bf16 %v1550_v14, %v1546_v57  ;;  %v1551_v2 = vld [vmem:[#allocation5 + $0x1f0] sm:$0xff]  ;;  %v2458_v3 = vpack.c.bf16 %v1549_v62, %v1545_v61 }
 0x3e6   :  { %2477 = vmatprep.subr.bf16.mxu1 %v2476_v17  ;;  %v2490_v5 = vpack.c.bf16 %v1551_v2, %v1547_v63  ;;  %v1865_v63 = vld [vmem:[#allocation7 + $0x88] sm:$0xff]  ;;  %v1896_v2 = vld [vmem:[#allocation7 + $0x180] sm:$0xff] }
 0x3e8   :  { %2447 = vmatpush1.bf16.msra.mxu0 %v2446_v30 }
 0x3e9   :  { %2479 = vmatpush1.bf16.msra.mxu1 %v2478_v31  ;;  %2449 = vmatprep.subr.bf16.mxu0 %v2448_v32 }
 0x3ea   :  { %2481 = vmatprep.subr.bf16.mxu1 %v2480_v36 }
 0x3ec   :  { %2451 = vmatpush1.bf16.msra.mxu0 %v2450_v50 }
 0x3ed   :  { %2483 = vmatpush1.bf16.msra.mxu1 %v2482_v51  ;;  %2453 = vmatprep.subr.bf16.mxu0 %v2452_v52 }
 0x3ee   :  { %2485 = vmatprep.subr.bf16.mxu1 %v2484_v55 }
 0x3f0   :  { %2455 = vmatpush1.bf16.msra.mxu0 %v2454_v59 }
 0x3f1   :  { %2487 = vmatpush1.bf16.msra.mxu1 %v2486_v20  ;;  %2457 = vmatprep.subr.bf16.mxu0 %v2456_v60 }
 0x3f2   :  { %2489 = vmatprep.subr.bf16.mxu1 %v2488_v25  ;;  %v1864_v25 = vld [vmem:[#allocation7 + $0x80] sm:$0xff] }
 0x3f4   :  { %2459 = vmatpush1.bf16.msra.mxu0 %v2458_v3  ;;  %v2492_v3 = vpack.c.bf16 %v1865_v63, %v1864_v25  ;;  %v1888_v63 = vld [vmem:[#allocation7 + $0x140] sm:$0xff] }
 0x3f5   :  { %2491 = vmatpush1.bf16.msra.mxu1 %v2490_v5  ;;  %v1897_v5 = vld [vmem:[#allocation7 + $0x188] sm:$0xff] }
 0x3f6   :  { %2493 = vmatprep.subr.bf16.mxu0 %v2492_v3 }
 0x46f   :  { %v1431_v6 = vpop.xlane.xlu1 %1430 }
 0x470   :  { %v1432_v1 = vmul.f32 0.0078125, %v1431_v6  ;;  %v1848_v6 = vld [vmem:[#allocation7] sm:$0xff] }
 0x472   :  { %v1433_v8 = vadd.f32 1e-06, %v1432_v1  ;;  %v1849_v1 = vld [vmem:[#allocation7 + $0x8] sm:$0xff] }
 0x474   :  { %2602 = vrsqrt.f32 %v1433_v8  ;;  %v2524_v8 = vpack.c.bf16 %v1897_v5, %v1896_v2  ;;  %v1889_v2 = vld [vmem:[#allocation7 + $0x148] sm:$0xff]  ;;  %v1874_v5 = vld [vmem:[#allocation7 + $0xd0] sm:$0xff] }
 0x475   :  { %v2542_v3 = vpack.c.bf16 %v1889_v2, %v1888_v63 }
 0x476   :  { %2525 = vmatprep.subr.bf16.mxu1 %v2524_v8 }
 0x47e   :  { %v2603_v9 = vpop.eup %2602 }
 0x47f   :  { %v1436_v10 = vrot.slane %v2603_v9, 1  ;;  %v1437_v12 = vrot.slane %v2603_v9, 2  ;;  %v1438_v16 = vrot.slane %v2603_v9, 3  ;;  %v1439_v17 = vrot.slane %v2603_v9, 4 }
 0x480   :  { %v1440_v21 = vrot.slane %v2603_v9, 5  ;;  %v1441_v22 = vrot.slane %v2603_v9, 6  ;;  %v1442_v24 = vrot.slane %v2603_v9, 7  ;;  %v1451_v28 = vmul.f32 %v2603_v9, %v2979_v42 }
 0x481   :  { %v1452_v29 = vmul.f32 %v1436_v10, %v2982_v43  ;;  %v1453_v30 = vmul.f32 %v1437_v12, %v2985_v44  ;;  %v1454_v31 = vmul.f32 %v1438_v16, %v2988_v45  ;;  %v1455_v32 = vmul.f32 %v1439_v17, %v2991_v46  ;;  %v2148_v43 = vld [vmem:[%s3126_s3] ss:$0 sm:$0xff]  ;;  %v1881_v12 = vld [vmem:[#allocation7 + $0x108] sm:$0xff]  ;;  %v1866_v17 = vld [vmem:[#allocation7 + $0x90] sm:$0xff] }
 0x482   :  { %v1456_v33 = vmul.f32 %v1440_v21, %v2994_v47  ;;  %v1457_v34 = vmul.f32 %v1441_v22, %v2997_v48  ;;  %v1458_v35 = vmul.f32 %v1442_v24, %v3000_v49  ;;  %v1466_v36 = vmul.f32 %v2147_v18, %v1451_v28  ;;  %v1880_v10 = vld [vmem:[#allocation7 + $0x100] sm:$0xff]  ;;  %v1898_v21 = vld [vmem:[#allocation7 + $0x190] sm:$0xff]  ;;  %v1899_v24 = vld [vmem:[#allocation7 + $0x198] sm:$0xff] }
 0x483   :  { %v1467_v37 = vmul.f32 %v2147_v18, %v1452_v29  ;;  %v1468_v38 = vmul.f32 %v2147_v18, %v1453_v30  ;;  %v1469_v39 = vmul.f32 %v2147_v18, %v1454_v31  ;;  %v1470_v40 = vmul.f32 %v2147_v18, %v1455_v32  ;;  %v1850_v28 = vld [vmem:[#allocation7 + $0x10] sm:$0xff]  ;;  %v1851_v29 = vld [vmem:[#allocation7 + $0x18] sm:$0xff] }
 0x484   :  { %v1471_v42 = vmul.f32 %v2147_v18, %v1456_v33  ;;  %v1472_v41 = vmul.f32 %v2147_v18, %v1457_v34  ;;  %v1473_v44 = vmul.f32 %v2147_v18, %v1458_v35  ;;  %v1481_v51 = vadd.f32 %v2148_v43, %v1466_v36  ;;  %v1867_v18 = vld [vmem:[#allocation7 + $0x98] sm:$0xff]  ;;  %v1882_v32 = vld [vmem:[#allocation7 + $0x110] sm:$0xff]  ;;  %v1868_v35 = vld [vmem:[#allocation7 + $0xa0] sm:$0xff] }
 0x485   :  { %v1482_v45 = vadd.f32 %v2148_v43, %v1467_v37  ;;  %v1483_v46 = vadd.f32 %v2148_v43, %v1468_v38  ;;  %v1484_v50 = vadd.f32 %v2148_v43, %v1469_v39  ;;  %v1485_v47 = vadd.f32 %v2148_v43, %v1470_v40  ;;  %v1883_v33 = vld [vmem:[#allocation7 + $0x118] sm:$0xff]  ;;  %v1869_v36 = vld [vmem:[#allocation7 + $0xa8] sm:$0xff]  ;;  %v1900_v37 = vld [vmem:[#allocation7 + $0x1a0] sm:$0xff] }
 0x486   :  { %v1486_v48 = vadd.f32 %v2148_v43, %v1471_v42  ;;  %v1487_v53 = vadd.f32 %v2148_v43, %v1472_v41  ;;  %v1488_v54 = vadd.f32 %v2148_v43, %v1473_v44  ;;  %v2494_v9 = vpack.c.bf16 %v1849_v1, %v1848_v6  ;;  %v1901_v39 = vld [vmem:[#allocation7 + $0x1a8] sm:$0xff]  ;;  %v1852_v40 = vld [vmem:[#allocation7 + $0x20] sm:$0xff]  ;;  %v1875_v6 = vld [vmem:[#allocation7 + $0xd8] sm:$0xff] }
 0x487   :  { %v1583_v52 = vrot.slane %v1482_v45, 7  ;;  %v1585_v49 = vrot.slane %v1483_v46, 6  ;;  %v1587_v55 = vrot.slane %v1484_v50, 5  ;;  %v1589_v57 = vrot.slane %v1485_v47, 4  ;;  %v1853_v42 = vld [vmem:[#allocation7 + $0x28] sm:$0xff]  ;;  %v1884_v44 = vld [vmem:[#allocation7 + $0x120] sm:$0xff] }
 0x488   :  { %v1591_v58 = vrot.slane %v1486_v48, 3  ;;  %v1593_v59 = vrot.slane %v1487_v53, 2  ;;  %v1595_v60 = vrot.slane %v1488_v54, 1  ;;  %v2526_v16 = vpack.c.bf16 %v1881_v12, %v1880_v10  ;;  %v1885_v45 = vld [vmem:[#allocation7 + $0x128] sm:$0xff]  ;;  %v1870_v50 = vld [vmem:[#allocation7 + $0xb0] sm:$0xff]  ;;  %v1871_v47 = vld [vmem:[#allocation7 + $0xb8] sm:$0xff] }
 0x489   :  { %v1584_v13 = vsel %vm1350_vm3, %v1583_v52, %v1481_v51  ;;  %v2496_v22 = vpack.c.bf16 %v1867_v18, %v1866_v17  ;;  %v2528_v30 = vpack.c.bf16 %v1899_v24, %v1898_v21  ;;  %v2498_v31 = vpack.c.bf16 %v1851_v29, %v1850_v28  ;;  %v1902_v51 = vld [vmem:[#allocation7 + $0x1b0] sm:$0xff]  ;;  %v1903_v52 = vld [vmem:[#allocation7 + $0x1b8] sm:$0xff]  ;;  %v1876_v24 = vld [vmem:[#allocation7 + $0xe0] sm:$0xff] }
 0x48a   :  { %v1586_v56 = vsel %vm1353_vm4, %v1585_v49, %v1584_v13  ;;  %v2530_v34 = vpack.c.bf16 %v1883_v33, %v1882_v32  ;;  %v2500_v38 = vpack.c.bf16 %v1869_v36, %v1868_v35  ;;  %v2532_v41 = vpack.c.bf16 %v1901_v39, %v1900_v37  ;;  %v1854_v49 = vld [vmem:[#allocation7 + $0x30] sm:$0xff]  ;;  %v1855_v53 = vld [vmem:[#allocation7 + $0x38] sm:$0xff]  ;;  %v1877_v28 = vld [vmem:[#allocation7 + $0xe8] sm:$0xff] }
 0x48b   :  { %v1588_v14 = vsel %vm1356_vm5, %v1587_v55, %v1586_v56  ;;  %v2502_v43 = vpack.c.bf16 %v1853_v42, %v1852_v40  ;;  %v2534_v46 = vpack.c.bf16 %v1885_v45, %v1884_v44  ;;  %v2504_v48 = vpack.c.bf16 %v1871_v47, %v1870_v50  ;;  %v1886_v55 = vld [vmem:[#allocation7 + $0x130] sm:$0xff]  ;;  %v1887_v56 = vld [vmem:[#allocation7 + $0x138] sm:$0xff]  ;;  %v1908_v29 = vld [vmem:[#allocation7 + $0x1e0] sm:$0xff] }
 0x48c   :  { %v1590_v19 = vsel %vm1359_vm6, %v1589_v57, %v1588_v14  ;;  %v2536_v54 = vpack.c.bf16 %v1903_v52, %v1902_v51  ;;  %v2506_v13 = vpack.c.bf16 %v1855_v53, %v1854_v49  ;;  %v2538_v57 = vpack.c.bf16 %v1887_v56, %v1886_v55  ;;  %v1872_v14 = vld [vmem:[#allocation7 + $0xc0] sm:$0xff]  ;;  %v1906_v1 = vld [vmem:[#allocation7 + $0x1d0] sm:$0xff]  ;;  %v1859_v12 = vld [vmem:[#allocation7 + $0x58] sm:$0xff] }
 0x48d   :  { %v1592_v20 = vsel %vm1362_vm7, %v1591_v58, %v1590_v19  ;;  %v1873_v58 = vld [vmem:[#allocation7 + $0xc8] sm:$0xff]  ;;  %v1904_v19 = vld [vmem:[#allocation7 + $0x1c0] sm:$0xff]  ;;  %v2512_v8 = vpack.c.bf16 %v1875_v6, %v1874_v5  ;;  %v1858_v10 = vld [vmem:[#allocation7 + $0x50] sm:$0xff]  ;;  %v1555_v52 = vlaneseq }
 0x48e   :  { %v1594_v61 = vsel %vm1365_vm8, %v1593_v59, %v1592_v20  ;;  %v2508_v59 = vpack.c.bf16 %v1873_v58, %v1872_v14  ;;  %v1905_v20 = vld [vmem:[#allocation7 + $0x1c8] sm:$0xff]  ;;  %v2514_v17 = vpack.c.bf16 %v1859_v12, %v1858_v10  ;;  %v1890_v18 = vld [vmem:[#allocation7 + $0x150] sm:$0xff]  ;;  %v1891_v21 = vld [vmem:[#allocation7 + $0x158] sm:$0xff] }
 0x48f   :  { %v1596_v62 = vsel %vm1368_vm9, %v1595_v60, %v1594_v61  ;;  %v1856_v60 = vld [vmem:[#allocation7 + $0x40] sm:$0xff]  ;;  %v1857_v61 = vld [vmem:[#allocation7 + $0x48] sm:$0xff]  ;;  %v1878_v39 = vld [vmem:[#allocation7 + $0xf0] sm:$0xff]  ;;  %v1556_v49 = vshrl.u32 %v1555_v52, 7 }
 0x490   :  { %1663 = vmatmul.mubr.f32.vlgmr.msra.gmra.mrb[16].mxu0 %v1596_v62  ;;  %1734 = vmatmul.mubr.f32.vlgmr.msra.gmra.mrb[16].mxu1 %v1596_v62  ;;  %v2540_v62 = vpack.c.bf16 %v1905_v20, %v1904_v19  ;;  %v2510_v25 = vpack.c.bf16 %v1857_v61, %v1856_v60  ;;  %v1860_v32 = vld [vmem:[#allocation7 + $0x60] sm:$0xff]  ;;  %v1861_v33 = vld [vmem:[#allocation7 + $0x68] sm:$0xff]  ;;  %v1879_v40 = vld [vmem:[#allocation7 + $0xf8] sm:$0xff] }
 0x491   :  { %2495 = vmatpush3.bf16.msra.mxu0 %v2494_v9  ;;  %2527 = vmatpush3.bf16.msra.mxu1 %v2526_v16  ;;  %v1907_v9 = vld [vmem:[#allocation7 + $0x1d8] sm:$0xff]  ;;  %v2518_v35 = vpack.c.bf16 %v1861_v33, %v1860_v32  ;;  %v1892_v36 = vld [vmem:[#allocation7 + $0x160] sm:$0xff]  ;;  %v1893_v37 = vld [vmem:[#allocation7 + $0x168] sm:$0xff]  ;;  %v1557_v53 = vsub.s32 0, %v1556_v49  ;;  %v1561_v55 = vsub.s32 1, %v1556_v49  ;;  %v1569_v56 = vsub.s32 3, %v1556_v49 }
 0x492   :  { %2497 = vmatprep.subr.bf16.mxu0 %v2496_v22  ;;  %2529 = vmatprep.subr.bf16.mxu1 %v2528_v30  ;;  %v2544_v16 = vpack.c.bf16 %v1907_v9, %v1906_v1  ;;  %v2546_v22 = vpack.c.bf16 %v1891_v21, %v1890_v18  ;;  %v2516_v30 = vpack.c.bf16 %v1877_v28, %v1876_v24  ;;  %v1910_v42 = vld [vmem:[#allocation7 + $0x1f0] sm:$0xff]  ;;  %v1863_v45 = vld [vmem:[#allocation7 + $0x78] sm:$0xff] }
 0x493   :  { %v1862_v44 = vld [vmem:[#allocation7 + $0x70] sm:$0xff]  ;;  %v1895_v51 = vld [vmem:[#allocation7 + $0x178] sm:$0xff] }
 0x494   :  { %v2522_v50 = vpack.c.bf16 %v1863_v45, %v1862_v44  ;;  %v1894_v47 = vld [vmem:[#allocation7 + $0x170] sm:$0xff] }
 0x495   :  { %2499 = vmatpush3.bf16.msra.mxu0 %v2498_v31  ;;  %2531 = vmatpush3.bf16.msra.mxu1 %v2530_v34  ;;  %v1909_v31 = vld [vmem:[#allocation7 + $0x1e8] sm:$0xff] }
 0x496   :  { %2501 = vmatprep.subr.bf16.mxu0 %v2500_v38  ;;  %2533 = vmatprep.subr.bf16.mxu1 %v2532_v41  ;;  %v2548_v34 = vpack.c.bf16 %v1909_v31, %v1908_v29  ;;  %v2550_v38 = vpack.c.bf16 %v1893_v37, %v1892_v36  ;;  %v2520_v41 = vpack.c.bf16 %v1879_v40, %v1878_v39 }
 0x499   :  { %2503 = vmatpush3.bf16.msra.mxu0 %v2502_v43  ;;  %2535 = vmatpush3.bf16.msra.mxu1 %v2534_v46  ;;  %v1911_v43 = vld [vmem:[#allocation7 + $0x1f8] sm:$0xff] }
 0x49a   :  { %2505 = vmatprep.subr.bf16.mxu0 %v2504_v48  ;;  %2537 = vmatprep.subr.bf16.mxu1 %v2536_v54  ;;  %v2552_v46 = vpack.c.bf16 %v1911_v43, %v1910_v42  ;;  %v2554_v48 = vpack.c.bf16 %v1895_v51, %v1894_v47  ;;  %v1565_v54 = vsub.s32 2, %v1556_v49 }
 0x49d   :  { %2507 = vmatpush3.bf16.msra.mxu0 %v2506_v13  ;;  %2539 = vmatpush3.bf16.msra.mxu1 %v2538_v57  ;;  %v1553_v13 = vld [vmem:[%s3128_s5] sm:$0xf]  ;;  %s2748_s5 = smov [#allocation9]  }
 0x49e   :  { %2509 = vmatprep.subr.bf16.mxu0 %v2508_v59  ;;  %2541 = vmatprep.subr.bf16.mxu1 %v2540_v62  ;;  %v1558_v57 = vrot.slane %v1553_v13, %v1557_v53  ;;  %v1566_v14 = vrot.slane %v1553_v13, %v1565_v54  ;;  %v1562_v58 = vrot.slane %v1553_v13, %v1561_v55  ;;  %s2122_s30 = sshll.u32 %s2748_s5, 4  ;;  %s2123_s30 = int_to_ptr.vmem [resolvable:$true] %s2122_s30 }
 0x49f   :  { %v1570_v19 = vrot.slane %v1553_v13, %v1569_v56  ;;  %s2686_s11 = scalar_lea.vmem %s2123_s30, 128  ;;  %p2691_p11 = scmp.lt.s32.totalorder %s2123_s30, %s2123_s30 }
 0x4a0   :  { %p2687_p10 = scmp.ne.s32.totalorder %s2123_s30, %s2686_s11  ;;  %p2692_p12 = scmp.lt.s32.totalorder %s2686_s11, %s2686_s11 }
 0x4a1   :  { %2511 = vmatpush3.bf16.msra.mxu0 %v2510_v25  ;;  %2543 = vmatpush3.bf16.msra.mxu1 %v2542_v3 }
 0x4a2   :  { %2513 = vmatprep.subr.bf16.mxu0 %v2512_v8  ;;  %2545 = vmatprep.subr.bf16.mxu1 %v2544_v16  ;;  %p2693_p13 = por %p2692_p12, %p2691_p11 }
 0x4a4   :  { %p2694_p0 = pnand %p2693_p13, %p2687_p10 }
 0x4a5   :  { %2515 = vmatpush3.bf16.msra.mxu0 %v2514_v17  ;;  %2547 = vmatpush3.bf16.msra.mxu1 %v2546_v22 }
 0x4a6   :  { %2517 = vmatprep.subr.bf16.mxu0 %v2516_v30  ;;  %2549 = vmatprep.subr.bf16.mxu1 %v2548_v34 }
 0x4a9   :  { %2519 = vmatpush3.bf16.msra.mxu0 %v2518_v35  ;;  %2551 = vmatpush3.bf16.msra.mxu1 %v2550_v38 }
 0x4aa   :  { %2521 = vmatprep.subr.bf16.mxu0 %v2520_v41  ;;  %2553 = vmatprep.subr.bf16.mxu1 %v2552_v46 }
 0x4ad   :  { %2523 = vmatpush3.bf16.msra.mxu0 %v2522_v50  ;;  %2555 = vmatpush3.bf16.msra.mxu1 %v2554_v48 }
 0x563   :  { %v1664_v59 = vpop.f32.mrb[16].mxu0  ;;  %v1735_v20 = vpop.f32.mrb[16].mxu1 }
 0x564   :  { %v3049_v60 = vadd.f32 %v1664_v59, %v1558_v57  ;;  %v3051_v61 = vadd.f32 %v1735_v20, %v1566_v14  ;;  %v1666_v62 = vpop.f32.mrb[17].mxu0  ;;  %v1737_v25 = vpop.f32.mrb[17].mxu1 }
 0x565   :  { %v3053_v63 = vadd.f32 %v1666_v62, %v1562_v58  ;;  %v3055_v2 = vadd.f32 %v1737_v25, %v1570_v19 }
 0x566   :  { %v3058_v3 = vmul.f32 0.70710677, %v3049_v60  ;;  %v3061_v5 = vmul.f32 0.70710677, %v3051_v61 }
 0x567   :  { %v3064_v6 = vmul.f32 0.70710677, %v3053_v63  ;;  %v3067_v1 = vmul.f32 0.70710677, %v3055_v2 }
 0x568   :  { %v1748_v8 = vand.u32 2147483647, %v3058_v3  ;;  %v1750_v9 = vand.u32 2147483647, %v3061_v5  ;;  %vm1828_vm10 = vcmp.ge.f32.partialorder %v3058_v3, 0.0  ;;  %vm1830_vm11 = vcmp.ge.f32.partialorder %v3061_v5, 0.0 }
 0x569   :  { %v1749_v10 = vand.u32 2147483647, %v3064_v6  ;;  %v1751_v12 = vand.u32 2147483647, %v3067_v1  ;;  %vm1829_vm12 = vcmp.ge.f32.partialorder %v3064_v6, 0.0  ;;  %vm1831_vm13 = vcmp.ge.f32.partialorder %v3067_v1, 0.0 }
 0x56a   :  { %v1752_v16 = vmul.f32 0.3275911, %v1748_v8  ;;  %v1754_v17 = vmul.f32 0.3275911, %v1750_v9  ;;  %v1804_v30 = vsub.f32 0.0, %v1748_v8  ;;  %v1806_v31 = vsub.f32 0.0, %v1750_v9 }
 0x56b   :  { %v1753_v18 = vmul.f32 0.3275911, %v1749_v10  ;;  %v1755_v24 = vmul.f32 0.3275911, %v1751_v12  ;;  %v1805_v34 = vsub.f32 0.0, %v1749_v10  ;;  %v1807_v39 = vsub.f32 0.0, %v1751_v12 }
 0x56c   :  { %v1756_v21 = vadd.f32 1.0, %v1752_v16  ;;  %v1758_v22 = vadd.f32 1.0, %v1754_v17  ;;  %v1808_v33 = vmul.f32 %v1804_v30, %v1748_v8  ;;  %v1810_v37 = vmul.f32 %v1806_v31, %v1750_v9 }
 0x56d   :  { %v1757_v28 = vadd.f32 1.0, %v1753_v18  ;;  %v1759_v29 = vadd.f32 1.0, %v1755_v24  ;;  %v1809_v44 = vmul.f32 %v1805_v34, %v1749_v10  ;;  %v1811_v48 = vmul.f32 %v1807_v39, %v1751_v12 }
 0x56e   :  { %2604 = vrcp.f32 %v1756_v21  ;;  %v1812_v41 = vmul.f32 1.442695, %v1808_v33  ;;  %v1816_v46 = vmul.f32 1.442695, %v1810_v37  ;;  %v1740_v3 = vmul.f32 0.5, %v3049_v60 }
 0x56f   :  { %2606 = vrcp.f32 %v1758_v22  ;;  %v1814_v13 = vmul.f32 1.442695, %v1809_v44  ;;  %v1818_v58 = vmul.f32 1.442695, %v1811_v48 }
 0x570   :  { %2608 = vrcp.f32 %v1757_v28 }
 0x571   :  { %2610 = vrcp.f32 %v1759_v29 }
 0x572   :  { %2612 = vpow2.f32 %v1812_v41 }
 0x573   :  { %2614 = vpow2.f32 %v1816_v46 }
 0x574   :  { %2616 = vpow2.f32 %v1814_v13  ;;  %v1741_v13 = vmul.f32 0.5, %v3053_v63 }
 0x575   :  { %2618 = vpow2.f32 %v1818_v58 }
 0x578   :  { %v2605_v32 = vpop.eup %2604 }
 0x579   :  { %v2607_v35 = vpop.eup %2606  ;;  %v1768_v36 = vmul.f32 1.0614054, %v2605_v32 }
 0x57a   :  { %v1770_v38 = vmul.f32 1.0614054, %v2607_v35  ;;  %v2609_v42 = vpop.eup %2608 }
 0x57b   :  { %v1772_v40 = vadd.f32 -1.4531521, %v1768_v36  ;;  %v1769_v50 = vmul.f32 1.0614054, %v2609_v42  ;;  %v2611_v47 = vpop.eup %2610 }
 0x57c   :  { %v1774_v43 = vadd.f32 -1.4531521, %v1770_v38  ;;  %v1771_v53 = vmul.f32 1.0614054, %v2611_v47  ;;  %v2613_v28 = vpop.eup %2612 }
 0x57d   :  { %v1776_v45 = vmul.f32 %v2605_v32, %v1772_v40  ;;  %v1773_v49 = vadd.f32 -1.4531521, %v1769_v50  ;;  %v2615_v30 = vpop.eup %2614 }
 0x57e   :  { %v1778_v51 = vmul.f32 %v2607_v35, %v1774_v43  ;;  %v1775_v57 = vadd.f32 -1.4531521, %v1771_v53  ;;  %v2617_v40 = vpop.eup %2616 }
 0x57f   :  { %v1780_v52 = vadd.f32 1.4214138, %v1776_v45  ;;  %v1777_v56 = vmul.f32 %v2609_v42, %v1773_v49  ;;  %v2619_v46 = vpop.eup %2618 }
 0x580   :  { %v1782_v54 = vadd.f32 1.4214138, %v1778_v51  ;;  %v1779_v20 = vmul.f32 %v2611_v47, %v1775_v57  ;;  %v1743_v57 = vmul.f32 0.5, %v3055_v2 }
 0x581   :  { %v1784_v55 = vmul.f32 %v2605_v32, %v1780_v52  ;;  %v1781_v59 = vadd.f32 1.4214138, %v1777_v56 }
 0x582   :  { %v1786_v14 = vmul.f32 %v2607_v35, %v1782_v54  ;;  %v1783_v9 = vadd.f32 1.4214138, %v1779_v20 }
 0x583   :  { %v1788_v19 = vadd.f32 -0.28449672, %v1784_v55  ;;  %v1785_v8 = vmul.f32 %v2609_v42, %v1781_v59 }
 0x584   :  { %v1790_v62 = vadd.f32 -0.28449672, %v1786_v14  ;;  %v1787_v17 = vmul.f32 %v2611_v47, %v1783_v9 }
 0x585   :  { %v1792_v25 = vmul.f32 %v2605_v32, %v1788_v19  ;;  %v1789_v16 = vadd.f32 -0.28449672, %v1785_v8  ;;  %v1742_v19 = vmul.f32 0.5, %v3051_v61 }
 0x586   :  { %v1794_v10 = vmul.f32 %v2607_v35, %v1790_v62  ;;  %v1791_v24 = vadd.f32 -0.28449672, %v1787_v17 }
 0x587   :  { %v1796_v12 = vadd.f32 0.2548296, %v1792_v25  ;;  %v1793_v22 = vmul.f32 %v2609_v42, %v1789_v16 }
 0x588   :  { %v1798_v18 = vadd.f32 0.2548296, %v1794_v10  ;;  %v1795_v34 = vmul.f32 %v2611_v47, %v1791_v24 }
 0x589   :  { %v1800_v21 = vmul.f32 %v2605_v32, %v1796_v12  ;;  %v1797_v33 = vadd.f32 0.2548296, %v1793_v22 }
 0x58a   :  { %v1802_v29 = vmul.f32 %v2607_v35, %v1798_v18  ;;  %v1799_v39 = vadd.f32 0.2548296, %v1795_v34 }
 0x58b   :  { %v1820_v31 = vmul.f32 %v2613_v28, %v1800_v21  ;;  %v1801_v38 = vmul.f32 %v2609_v42, %v1797_v33 }
 0x58c   :  { %v1822_v36 = vmul.f32 %v2615_v30, %v1802_v29  ;;  %v1803_v45 = vmul.f32 %v2611_v47, %v1799_v39 }
 0x58d   :  { %v1824_v37 = vsub.f32 1.0, %v1820_v31  ;;  %v1821_v44 = vmul.f32 %v2617_v40, %v1801_v38 }
 0x58e   :  { %v1826_v41 = vsub.f32 1.0, %v1822_v36  ;;  %v1823_v51 = vmul.f32 %v2619_v46, %v1803_v45 }
 0x58f   :  { %v1832_v43 = vsub.f32 0.0, %v1824_v37  ;;  %v1825_v32 = vsub.f32 1.0, %v1821_v44 }
 0x590   :  { %v1834_v50 = vsub.f32 0.0, %v1826_v41  ;;  %v1827_v52 = vsub.f32 1.0, %v1823_v51 }
 0x591   :  { %v1836_v35 = vsel %vm1828_vm10, %v1824_v37, %v1832_v43  ;;  %v1833_v48 = vsub.f32 0.0, %v1825_v32 }
 0x592   :  { %v1838_v49 = vsel %vm1830_vm11, %v1826_v41, %v1834_v50  ;;  %v1840_v42 = vadd.f32 1.0, %v1836_v35  ;;  %v1835_v54 = vsub.f32 0.0, %v1827_v52 }
 0x593   :  { %v1837_v53 = vsel %vm1829_vm12, %v1825_v32, %v1833_v48  ;;  %v1842_v55 = vadd.f32 1.0, %v1838_v49 }
 0x594   :  { %v1841_v47 = vadd.f32 1.0, %v1837_v53  ;;  %v1839_v56 = vsel %vm1831_vm13, %v1827_v52, %v1835_v54  ;;  %v1844_v58 = vmul.f32 %v1840_v42, %v1740_v3 }
 0x595   :  { %v1843_v14 = vadd.f32 1.0, %v1839_v56  ;;  %v1846_v59 = vmul.f32 %v1842_v55, %v1742_v19 }
 0x596   :  { %v1845_v5 = vmul.f32 %v1841_v47, %v1741_v13 }
 0x597   :  { %v1847_v6 = vmul.f32 %v1843_v14, %v1743_v57 }
 0x598   :  { %1983 = vmatprep.mubr.f32.mxu0 %v1845_v5 }
 0x599   :  { %1984 = vmatmul.mubr.f32.vlgmr.msra.gmra.mrb[18].mxu0 %v1844_v58  ;;  %2053 = vmatprep.mubr.f32.mxu1 %v1847_v6 }
 0x59a   :  { %2054 = vmatmul.mubr.f32.vlgmr.msra.gmra.mrb[18].mxu1 %v1846_v59 }
 0x59b   :  { %2697 = shalt.err (!%p2694_p0)
}
 0x59c   :  { %s2698_s10 = scalar_lea.hbm %s3132_s9, 128 }
 0x59d   :  { %p2699_p1 = scmp.ne.s32.totalorder %s3132_s9, %s2698_s10  ;;  %p2702_p2 = scmp.lt.u32.totalorder %s2698_s10, %s3132_s9 }
 0x59f   :  { %p2704_p3 = pnand %p2702_p2, %p2699_p1 }
 0x5a1   :  { %2707 = shalt.err (!%p2704_p3)
}
 0x5a2   :  { %s2749_s17 = smov 16   ;;  %s2750_s18 = smov 1   ;;  %v2149_v61 = vld [vmem:[%s3130_s7] ss:$0 sm:$0xff] }
 0x5a3   :  { %2128 = dma.vmem_to_hbm [thread:$0]  %s2123_s30, 128, %s3132_s9, [#allocation10], %s2749_s17, %s2749_s17, %s2750_s18  }
 0x5a4   :  { %s2751_s7 = smov [#allocation8]  }
 0x5a5   :  { %s2113_s9 = sshll.u32 %s2751_s7, 4  ;;  %s2114_s9 = int_to_ptr.vmem [resolvable:$true] %s2113_s9 }
 0x5a6   :  { %s2708_s23 = scalar_lea.vmem %s2114_s9, 128  ;;  %p2713_p5 = scmp.lt.s32.totalorder %s2114_s9, %s2114_s9 }
 0x5a7   :  { %p2709_p4 = scmp.ne.s32.totalorder %s2114_s9, %s2708_s23  ;;  %p2714_p6 = scmp.lt.s32.totalorder %s2708_s23, %s2708_s23 }
 0x5a9   :  { %p2715_p7 = por %p2714_p6, %p2713_p5 }
 0x5ab   :  { %p2716_p8 = pnand %p2715_p7, %p2709_p4 }
 0x66c   :  { %v2230_v60 = vpop.f32.mrb[18].mxu0 }
 0x66d   :  { %v2231_v63 = vpop.f32.mrb[19].mxu0  ;;  %v2265_v2 = vpop.f32.mrb[18].mxu1 }
 0x66e   :  { %v2232_v1 = vadd.f32 %v2231_v63, %v2230_v60  ;;  %v2266_v20 = vpop.f32.mrb[19].mxu1 }
 0x66f   :  { %v2267_v25 = vadd.f32 %v2266_v20, %v2265_v2 }
 0x670   :  { %v1986_v62 = vadd.f32 %v2232_v1, %v2149_v61 }
 0x672   :  { %v2056_v8 = vadd.f32 %v2267_v25, %v1986_v62 }
 0x674   :  { %v2060_v9 = vrot.slane %v2056_v8, 1  ;;  %v2061_v10 = vrot.slane %v2056_v8, 2  ;;  %v2062_v12 = vrot.slane %v2056_v8, 3  ;;  %v2063_v16 = vrot.slane %v2056_v8, 4 }
 0x675   :  { %v2064_v17 = vrot.slane %v2056_v8, 5  ;;  %v2065_v18 = vrot.slane %v2056_v8, 6  ;;  %v2066_v21 = vrot.slane %v2056_v8, 7  ;;  %v2075_v22 = vadd.f32 %v2056_v8, %v2947_v0 }
 0x676   :  { %v2076_v24 = vadd.f32 %v2060_v9, %v2949_v26  ;;  %v2077_v28 = vadd.f32 %v2061_v10, %v2954_v4  ;;  %v2078_v29 = vadd.f32 %v2062_v12, %v2958_v7  ;;  %v2079_v30 = vadd.f32 %v2063_v16, %v2962_v11 }
 0x677   :  { %v2080_v31 = vadd.f32 %v2064_v17, %v2965_v15  ;;  %v2081_v33 = vadd.f32 %v2065_v18, %v2970_v23  ;;  %v2082_v34 = vadd.f32 %v2066_v21, %v2973_v27 }
 0x678   :  { %v2091_v36 = vrot.slane %v2076_v24, 7  ;;  %v2093_v37 = vrot.slane %v2077_v28, 6  ;;  %v2095_v39 = vrot.slane %v2078_v29, 5  ;;  %v2097_v26 = vrot.slane %v2079_v30, 4 }
 0x679   :  { %v2099_v40 = vrot.slane %v2080_v31, 3  ;;  %v2101_v11 = vrot.slane %v2081_v33, 2  ;;  %v2103_v23 = vrot.slane %v2082_v34, 1 }
 0x67a   :  { %v2092_v38 = vsel %vm1350_vm3, %v2091_v36, %v2075_v22 }
 0x67b   :  { %v2094_v0 = vsel %vm1353_vm4, %v2093_v37, %v2092_v38 }
 0x67c   :  { %v2096_v4 = vsel %vm1356_vm5, %v2095_v39, %v2094_v0 }
 0x67d   :  { %v2098_v7 = vsel %vm1359_vm6, %v2097_v26, %v2096_v4 }
 0x67e   :  { %v2100_v15 = vsel %vm1362_vm7, %v2099_v40, %v2098_v7 }
 0x67f   :  { %v2102_v27 = vsel %vm1365_vm8, %v2101_v11, %v2100_v15 }
 0x680   :  { %v2104_v41 = vsel %vm1368_vm9, %v2103_v23, %v2102_v27 }
 0x681   :  { %2106 = vst [vmem:[#allocation8] sm:$0xff] %v2104_v41 }
 0x682   :  { %2719 = shalt.err (!%p2716_p8)
}
 0x683   :  { %s2720_s24 = scalar_lea.hbm %s3131_s8, 128 }
 0x684   :  { %p2721_p9 = scmp.ne.s32.totalorder %s3131_s8, %s2720_s24  ;;  %p2724_p10 = scmp.lt.u32.totalorder %s2720_s24, %s3131_s8 }
 0x686   :  { %p2726_p11 = pnand %p2724_p10, %p2721_p9 }
 0x688   :  { %2729 = shalt.err (!%p2726_p11)
}
 0x689   :  { %2116 = dma.vmem_to_hbm [thread:$0]  %s2114_s9, 128, %s3131_s8, [#allocation4]  }
 0x68a   :  { %2734 = dma.done.wait [#allocation4], 128  }
 0x68b   :  { %2735 = vsyncadd [#allocation4], 4294967168 }
 0x68c   :  { %2736 = dma.done.wait [#allocation10], 128  }
 0x68d   :  { %2737 = vsyncadd [#allocation10], 4294967168 }
 0x68e   :  { %2135 = vsyncpa [#allocation3], 1 }
 0x68f   :  { %2136 = vsyncpa [#allocation6], 1 }
 0x690   :  { %2137 = vsyncpa [#allocation4], 1 }
 0x691   :  { %2138 = vsyncpa [#allocation10], 1 }

</bundles_post_ra>
